<compile_context>
chip_gen: v5e
topology: v5e:2x2
jax: 0.10.0
libtpu: 0.0.40
codegen_flags: <defaults>
</compile_context>

<pallas_src>
import functools

import jax
import jax.numpy as jnp
from jax.experimental import pallas as pl
from jax.experimental.pallas import tpu as pltpu


_VMEM_LIMIT = 64 * 1024 * 1024


def _round_up(x, m):
    return ((x + m - 1) // m) * m


def _pad_rows(a, rows):
    return a if a.shape[0] == rows else jnp.pad(a, ((0, rows - a.shape[0]), (0, 0)))


# ----------------------------- Pallas kernels ------------------------------

def _pw_bn_relu_kernel(x_ref, w_ref, s_ref, b_ref, o_ref):
    """1x1x1 conv (matmul) + folded BN + ReLU."""
    y = jnp.dot(x_ref[...], w_ref[...], preferred_element_type=jnp.float32)
    y = jnp.maximum(y * s_ref[...] + b_ref[...], 0.0)
    o_ref[...] = y.astype(o_ref.dtype)


def _fused_out_kernel(h_ref, x_ref, w3_ref, wd_ref, s3_ref, b3_ref, sd_ref, bd_ref, o_ref):
    """conv3 (1x1x1) + bn3 + downsample conv (1x1x1) + bn_d + add + ReLU, one pass."""
    y = jnp.dot(h_ref[...], w3_ref[...], preferred_element_type=jnp.float32)
    y = y * s3_ref[...] + b3_ref[...]
    r = jnp.dot(x_ref[...], wd_ref[...], preferred_element_type=jnp.float32)
    r = r * sd_ref[...] + bd_ref[...]
    o_ref[...] = jnp.maximum(y + r, 0.0).astype(o_ref.dtype)


def _conv3x3x3_kernel(x0_ref, x1_ref, x2_ref, w_ref, s_ref, b_ref, o_ref):
    """3x3x3 conv (one output d-slab per grid step) + folded BN + ReLU.

    x*_ref: three (1, 1, H+2, W+2, Cin) input slabs at padded depths d_in, d_in+1, d_in+2.
    w_ref : (3, 9*Cin, Cout) laid out as [kw, (kd, kh, Cin), Cout].
    o_ref : (1, 1, H*W, Cout)  (lane-dense 2D slab; no per-row masked stores).
    """
    Hp, Wp, Cin = x0_ref.shape[2], x0_ref.shape[3], x0_ref.shape[4]
    H, W = Hp - 2, Wp - 2
    Cout = o_ref.shape[-1]

    # Merge (kd, kh) taps into the channel axis: cheap slices along the major H axis,
    # then 3 big matmuls with K = 9*Cin keep the MXU full (vs 27 matmuls with K = Cin).
    rows = []
    for x_ref in (x0_ref, x1_ref, x2_ref):          # kd = 0, 1, 2
        xk = x_ref[0, 0]                             # (H+2, W+2, Cin)
        for kh in range(3):
            rows.append(xk[kh:kh + H])               # (H, W+2, Cin)
    big = jnp.concatenate(rows, axis=-1)             # (H, W+2, 9*Cin)

    acc = jnp.zeros((H * W, Cout), jnp.float32)
    for kw in range(3):                              # 3 matmuls, K = 9*Cin
        patch = big[:, kw:kw + W, :].reshape(H * W, 9 * Cin)
        acc = acc + jnp.dot(patch, w_ref[kw], preferred_element_type=jnp.float32)

    y = jnp.maximum(acc * s_ref[...] + b_ref[...], 0.0)
    o_ref[0, 0] = y.astype(o_ref.dtype)


# ------------------------------ kernel wrappers -----------------------------

def pointwise_conv_bn_relu(x2d, w, scale, bias, *, tile_rows=512):
    """Fused 1x1x1 conv + folded BN + ReLU.  x2d: (M, Cin), w: (Cin, Cout)."""
    M, Cin = x2d.shape
    Cout = w.shape[1]
    tm = min(tile_rows, M)
    n_blocks = pl.cdiv(M, tm)
    Mp = n_blocks * tm
    xp = _pad_rows(x2d, Mp)
    s2 = scale.reshape(1, Cout).astype(jnp.float32)
    b2 = bias.reshape(1, Cout).astype(jnp.float32)
    out = pl.pallas_call(
        _pw_bn_relu_kernel,
        out_shape=jax.ShapeDtypeStruct((Mp, Cout), x2d.dtype),
        grid=(n_blocks,),
        in_specs=[
            pl.BlockSpec((tm, Cin), lambda i: (i, 0)),
            pl.BlockSpec((Cin, Cout), lambda i: (0, 0)),
            pl.BlockSpec((1, Cout), lambda i: (0, 0)),
            pl.BlockSpec((1, Cout), lambda i: (0, 0)),
        ],
        out_specs=pl.BlockSpec((tm, Cout), lambda i: (i, 0)),
        compiler_params=pltpu.CompilerParams(
            dimension_semantics=("parallel",),
            vmem_limit_bytes=_VMEM_LIMIT),
    )(xp, w.astype(x2d.dtype), s2, b2)
    return out[:M] if Mp != M else out


def fused_conv3_downsample_add_relu(h2d, x2d, w3, wd, s3, b3, sd, bd, *, tile_rows=512):
    """relu((h @ w3)*s3 + b3 + (x @ wd)*sd + bd) — one kernel, no residual HBM round trip."""
    M, pin = h2d.shape
    Cin = x2d.shape[1]
    Cout = w3.shape[1]
    assert x2d.shape[0] == M
    tm = min(tile_rows, M)
    n_blocks = pl.cdiv(M, tm)
    Mp = n_blocks * tm
    hp = _pad_rows(h2d, Mp)
    xp = _pad_rows(x2d, Mp)
    dt = h2d.dtype
    s3r = s3.reshape(1, Cout).astype(jnp.float32)
    b3r = b3.reshape(1, Cout).astype(jnp.float32)
    sdr = sd.reshape(1, Cout).astype(jnp.float32)
    bdr = bd.reshape(1, Cout).astype(jnp.float32)
    out = pl.pallas_call(
        _fused_out_kernel,
        out_shape=jax.ShapeDtypeStruct((Mp, Cout), dt),
        grid=(n_blocks,),
        in_specs=[
            pl.BlockSpec((tm, pin), lambda i: (i, 0)),
            pl.BlockSpec((tm, Cin), lambda i: (i, 0)),
            pl.BlockSpec((pin, Cout), lambda i: (0, 0)),
            pl.BlockSpec((Cin, Cout), lambda i: (0, 0)),
            pl.BlockSpec((1, Cout), lambda i: (0, 0)),
            pl.BlockSpec((1, Cout), lambda i: (0, 0)),
            pl.BlockSpec((1, Cout), lambda i: (0, 0)),
            pl.BlockSpec((1, Cout), lambda i: (0, 0)),
        ],
        out_specs=pl.BlockSpec((tm, Cout), lambda i: (i, 0)),
        compiler_params=pltpu.CompilerParams(
            dimension_semantics=("parallel",),
            vmem_limit_bytes=_VMEM_LIMIT),
    )(hp, xp, w3.astype(dt), wd.astype(dt), s3r, b3r, sdr, bdr)
    return out[:M] if Mp != M else out


def conv3x3x3_bn_relu(x, w, scale, bias, *, stride=1):
    """3x3x3 conv (stride along D in-kernel via index_map), fused folded BN + ReLU.

    x: (N, D, H, W, Cin), w: (3, 3, 3, Cin, Cout).
    """
    N, D, H, W, Cin = x.shape
    Cout = w.shape[-1]
    Dout = (D - 1) // stride + 1
    dt = x.dtype

    # TODO(synk): fold the zero halo into the kernel with masked edge handling (and fuse conv1)
    # to remove this one-time HBM pad round trip of the bottleneck-width activation.
    xp = jnp.pad(x, ((0, 0), (1, 1), (1, 1), (1, 1), (0, 0)))
    # weight laid out as (kw, (kd, kh, Cin), Cout) so the kernel issues 3 matmuls with K = 9*Cin.
    wr = jnp.transpose(w, (2, 0, 1, 3, 4)).reshape(3, 9 * Cin, Cout).astype(dt)
    s2 = scale.reshape(1, Cout).astype(jnp.float32)
    b2 = bias.reshape(1, Cout).astype(jnp.float32)

    def slab_spec(kd):
        # block size 1 along D => block index is the element index; stride handled here.
        return pl.BlockSpec((1, 1, H + 2, W + 2, Cin),
                            lambda n, d, kd=kd: (n, d * stride + kd, 0, 0, 0))

    out = pl.pallas_call(
        _conv3x3x3_kernel,
        out_shape=jax.ShapeDtypeStruct((N, Dout, H * W, Cout), dt),
        grid=(N, Dout),
        in_specs=[slab_spec(0), slab_spec(1), slab_spec(2),
                  pl.BlockSpec((3, 9 * Cin, Cout), lambda n, d: (0, 0, 0)),
                  pl.BlockSpec((1, Cout), lambda n, d: (0, 0)),
                  pl.BlockSpec((1, Cout), lambda n, d: (0, 0))],
        out_specs=pl.BlockSpec((1, 1, H * W, Cout), lambda n, d: (n, d, 0, 0)),
        compiler_params=pltpu.CompilerParams(
            dimension_semantics=("parallel", "parallel"),
            vmem_limit_bytes=_VMEM_LIMIT),
    )(xp, xp, xp, wr, s2, b2)

    out = out.reshape(N, Dout, H, W, Cout)
    if stride > 1:
        # TODO(synk): compute only the strided H/W positions in-kernel (D stride is already exact).
        out = out[:, :, ::stride, ::stride, :]
    return out


# ----------------------------- module forward ------------------------------

def residual_block_forward(x, p, stride=1, *, compute_dtype=jnp.float32, tile_rows=512):
    """Pallas implementation of ResidualBlock.forward. x: (N, D, H, W, Cin)."""
    N, D, H, W, Cin = x.shape
    pin = p["w1"].shape[1]       # bottleneck width = planes // 4
    cout = p["w3"].shape[1]      # = planes

    xc = x.astype(compute_dtype)

    # conv1 (1x1x1) + bn1 + relu
    h = pointwise_conv_bn_relu(xc.reshape(-1, Cin), p["w1"], p["s1"], p["b1"],
                               tile_rows=tile_rows)
    h = h.reshape(N, D, H, W, pin)

    # conv2 (3x3x3, stride, padding=1) + bn2 + relu
    h = conv3x3x3_bn_relu(h, p["w2"], p["s2"], p["b2"], stride=stride)
    Do, Ho, Wo = h.shape[1], h.shape[2], h.shape[3]

    # conv3 (1x1x1) + bn3 + downsample(1x1x1 conv + bn) + add + relu, fused in ONE kernel.
    xr = xc[:, ::stride, ::stride, ::stride, :] if stride > 1 else xc
    out = fused_conv3_downsample_add_relu(
        h.reshape(-1, pin), xr.reshape(-1, Cin),
        p["w3"], p["wd"], p["s3"], p["b3"], p["sd"], p["bd"], tile_rows=tile_rows)
    return out.reshape(N, Do, Ho, Wo, cout)


# ----------------------- deterministic parameter init ----------------------

def init_params(key, inplanes, planes):
    pin = planes // 4            # module does planes = int(planes / 4)
    cout = pin * 4
    eps = 1e-5
    ks = jax.random.split(key, 8)

    def wgt(k, shape, fan_in):
        return jax.random.normal(k, shape, jnp.float32) / jnp.sqrt(float(fan_in))

    def bn(k, c):
        k1, k2, k3, k4 = jax.random.split(k, 4)
        gamma = 1.0 + 0.1 * jax.random.normal(k1, (c,), jnp.float32)
        beta = 0.1 * jax.random.normal(k2, (c,), jnp.float32)
        mean = 0.1 * jax.random.normal(k3, (c,), jnp.float32)
        var = jnp.abs(jax.random.normal(k4, (c,), jnp.float32)) + 0.5
        scale = gamma / jnp.sqrt(var + eps)
        bias = beta - mean * scale
        return scale, bias

    p = dict(
        w1=wgt(ks[0], (inplanes, pin), inplanes),            # conv1 1x1x1
        w2=wgt(ks[1], (3, 3, 3, pin, pin), 27 * pin),        # conv2 3x3x3
        w3=wgt(ks[2], (pin, cout), pin),                     # conv3 1x1x1
        wd=wgt(ks[3], (inplanes, cout), inplanes),           # downsample 1x1x1
    )
    p["s1"], p["b1"] = bn(ks[4], pin)
    p["s2"], p["b2"] = bn(ks[5], pin)
    p["s3"], p["b3"] = bn(ks[6], cout)
    p["sd"], p["bd"] = bn(ks[7], cout)
    return p


# ----------------------------- pure-JAX reference ---------------------------

def reference_forward(x, p, stride=1):
    dn = ("NDHWC", "DHWIO", "NDHWC")

    def conv(x, w, s, pad):
        return jax.lax.conv_general_dilated(
            x, w, window_strides=(s, s, s), padding=pad, dimension_numbers=dn)

    w1 = p["w1"].reshape(1, 1, 1, *p["w1"].shape)
    w3 = p["w3"].reshape(1, 1, 1, *p["w3"].shape)
    wd = p["wd"].reshape(1, 1, 1, *p["wd"].shape)
    h = jax.nn.relu(conv(x, w1, 1, "VALID") * p["s1"] + p["b1"])
    h = jax.nn.relu(conv(h, p["w2"], stride, [(1, 1)] * 3) * p["s2"] + p["b2"])
    h = conv(h, w3, 1, "VALID") * p["s3"] + p["b3"]
    r = conv(x, wd, stride, "VALID") * p["sd"] + p["bd"]
    return jax.nn.relu(h + r)


if __name__ == "__main__":
    key = jax.random.PRNGKey(0)
    kx, kp = jax.random.split(key)

    # Small shapes consistent with the module:
    # PyTorch input would be NCDHW = (2, 16, 4, 8, 8); here NDHWC = (2, 4, 8, 8, 16).
    N, D, H, W = 2, 4, 8, 8
    inplanes, planes = 16, 32       # bottleneck width 8, output channels 32

    x = jax.random.normal(kx, (N, D, H, W, inplanes), jnp.float32)
    params = init_params(kp, inplanes, planes)

    # (stride, compute dtype, atol, rtol)
    configs = [
        (1, jnp.float32, 1e-3, 1e-3),   # exact-path check
        (1, jnp.bfloat16, 1e-1, 5e-2),  # fast (bf16) path, looser tolerance
        (2, jnp.float32, 1e-3, 1e-3),   # strided path check
    ]
    for stride, cdt, atol, rtol in configs:
        fwd = jax.jit(functools.partial(residual_block_forward, p=params,
                                        stride=stride, compute_dtype=cdt))
        out = jax.block_until_ready(fwd(x))
        ref = reference_forward(x, params, stride)
        assert out.shape == ref.shape, (out.shape, ref.shape)
        out_f32 = out.astype(jnp.float32)
        ok = jnp.allclose(out_f32, ref, atol=atol, rtol=rtol)
        assert ok, (f"stride={stride} dtype={jnp.dtype(cdt).name} "
                    f"max abs err {jnp.max(jnp.abs(out_f32 - ref))}")
    print("KERNEL_OK")
</pallas_src>

<mosaic_0001>
module attributes {stable_mosaic.version = 11 : i64} {
  func.func @_fused_out_kernel(%arg0: i32, %arg1: memref<512x8xf32, #tpu.memory_space<vmem>>, %arg2: memref<512x16xf32, #tpu.memory_space<vmem>>, %arg3: memref<8x32xf32, #tpu.memory_space<vmem>>, %arg4: memref<16x32xf32, #tpu.memory_space<vmem>>, %arg5: memref<1x32xf32, #tpu.memory_space<vmem>>, %arg6: memref<1x32xf32, #tpu.memory_space<vmem>>, %arg7: memref<1x32xf32, #tpu.memory_space<vmem>>, %arg8: memref<1x32xf32, #tpu.memory_space<vmem>>, %arg9: memref<512x32xf32, #tpu.memory_space<vmem>>) attributes {dimension_semantics = [#tpu.dimension_semantics<parallel>], iteration_bounds = array<i64: 1>, scalar_prefetch = 0 : i64, scratch_operands = 0 : i64, tpu.core_type = #tpu.core_type<tc>, window_params = [{transform_indices = @transform_0, window_bounds = array<i64: 512, 8>}, {transform_indices = @transform_1, window_bounds = array<i64: 512, 16>}, {pipeline_mode = #tpu.pipeline_mode<synchronous>, transform_indices = @transform_2, window_bounds = array<i64: 8, 32>}, {pipeline_mode = #tpu.pipeline_mode<synchronous>, transform_indices = @transform_3, window_bounds = array<i64: 16, 32>}, {pipeline_mode = #tpu.pipeline_mode<synchronous>, transform_indices = @transform_4, window_bounds = array<i64: 1, 32>}, {pipeline_mode = #tpu.pipeline_mode<synchronous>, transform_indices = @transform_5, window_bounds = array<i64: 1, 32>}, {pipeline_mode = #tpu.pipeline_mode<synchronous>, transform_indices = @transform_6, window_bounds = array<i64: 1, 32>}, {pipeline_mode = #tpu.pipeline_mode<synchronous>, transform_indices = @transform_7, window_bounds = array<i64: 1, 32>}, {transform_indices = @transform_8, window_bounds = array<i64: 512, 32>}]} {
    %c0 = arith.constant 0 : index
    %c0_0 = arith.constant 0 : index
    %0 = vector.load %arg1[%c0, %c0_0] : memref<512x8xf32, #tpu.memory_space<vmem>>, vector<512x8xf32>
    %c0_1 = arith.constant 0 : index
    %c0_2 = arith.constant 0 : index
    %1 = vector.load %arg3[%c0_1, %c0_2] : memref<8x32xf32, #tpu.memory_space<vmem>>, vector<8x32xf32>
    %cst = arith.constant dense<0.000000e+00> : vector<512x32xf32>
    %2 = tpu.matmul %0, %1, %cst {dimension_numbers = #tpu.dot_dimension_numbers<[1], [0], [0], [1], [0, 0, 1, 1], [], []>} : vector<512x8xf32>, vector<8x32xf32>, vector<512x32xf32> -> vector<512x32xf32>
    %c0_3 = arith.constant 0 : index
    %c0_4 = arith.constant 0 : index
    %3 = vector.load %arg5[%c0_3, %c0_4] : memref<1x32xf32, #tpu.memory_space<vmem>>, vector<1x32xf32>
    %4 = vector.broadcast %3 : vector<1x32xf32> to vector<512x32xf32>
    %5 = arith.mulf %2, %4 : vector<512x32xf32>
    %c0_5 = arith.constant 0 : index
    %c0_6 = arith.constant 0 : index
    %6 = vector.load %arg6[%c0_5, %c0_6] : memref<1x32xf32, #tpu.memory_space<vmem>>, vector<1x32xf32>
    %7 = vector.broadcast %6 : vector<1x32xf32> to vector<512x32xf32>
    %8 = arith.addf %5, %7 : vector<512x32xf32>
    %c0_7 = arith.constant 0 : index
    %c0_8 = arith.constant 0 : index
    %9 = vector.load %arg2[%c0_7, %c0_8] : memref<512x16xf32, #tpu.memory_space<vmem>>, vector<512x16xf32>
    %c0_9 = arith.constant 0 : index
    %c0_10 = arith.constant 0 : index
    %10 = vector.load %arg4[%c0_9, %c0_10] : memref<16x32xf32, #tpu.memory_space<vmem>>, vector<16x32xf32>
    %cst_11 = arith.constant dense<0.000000e+00> : vector<512x32xf32>
    %11 = tpu.matmul %9, %10, %cst_11 {dimension_numbers = #tpu.dot_dimension_numbers<[1], [0], [0], [1], [0, 0, 1, 1], [], []>} : vector<512x16xf32>, vector<16x32xf32>, vector<512x32xf32> -> vector<512x32xf32>
    %c0_12 = arith.constant 0 : index
    %c0_13 = arith.constant 0 : index
    %12 = vector.load %arg7[%c0_12, %c0_13] : memref<1x32xf32, #tpu.memory_space<vmem>>, vector<1x32xf32>
    %13 = vector.broadcast %12 : vector<1x32xf32> to vector<512x32xf32>
    %14 = arith.mulf %11, %13 : vector<512x32xf32>
    %c0_14 = arith.constant 0 : index
    %c0_15 = arith.constant 0 : index
    %15 = vector.load %arg8[%c0_14, %c0_15] : memref<1x32xf32, #tpu.memory_space<vmem>>, vector<1x32xf32>
    %16 = vector.broadcast %15 : vector<1x32xf32> to vector<512x32xf32>
    %17 = arith.addf %14, %16 : vector<512x32xf32>
    %18 = arith.addf %8, %17 : vector<512x32xf32>
    %cst_16 = arith.constant 0.000000e+00 : f32
    %19 = vector.broadcast %cst_16 : f32 to vector<512x32xf32>
    %20 = arith.maximumf %18, %19 : vector<512x32xf32>
    %c0_17 = arith.constant 0 : index
    %c0_18 = arith.constant 0 : index
    %21 = vector.load %arg9[%c0_17, %c0_18] : memref<512x32xf32, #tpu.memory_space<vmem>>, vector<512x32xf32>
    tpu.vector_store %arg9[%c0_17, %c0_18], %20 {strides = array<i32>} : memref<512x32xf32, #tpu.memory_space<vmem>>, vector<512x32xf32>,
    return
  }
  func.func @transform_0(%arg0: i32) -> (i32, i32) {
    %c0_i32 = arith.constant 0 : i32
    %c0_i32_0 = arith.constant 0 : i32
    return %arg0, %c0_i32 : i32, i32
  }
  func.func @transform_1(%arg0: i32) -> (i32, i32) {
    %c0_i32 = arith.constant 0 : i32
    %c0_i32_0 = arith.constant 0 : i32
    return %arg0, %c0_i32 : i32, i32
  }
  func.func @transform_2(%arg0: i32) -> (i32, i32) {
    %c0_i32 = arith.constant 0 : i32
    %c0_i32_0 = arith.constant 0 : i32
    %c0_i32_1 = arith.constant 0 : i32
    return %c0_i32, %c0_i32_0 : i32, i32
  }
  func.func @transform_3(%arg0: i32) -> (i32, i32) {
    %c0_i32 = arith.constant 0 : i32
    %c0_i32_0 = arith.constant 0 : i32
    %c0_i32_1 = arith.constant 0 : i32
    return %c0_i32, %c0_i32_0 : i32, i32
  }
  func.func @transform_4(%arg0: i32) -> (i32, i32) {
    %c0_i32 = arith.constant 0 : i32
    %c0_i32_0 = arith.constant 0 : i32
    %c0_i32_1 = arith.constant 0 : i32
    return %c0_i32, %c0_i32_0 : i32, i32
  }
  func.func @transform_5(%arg0: i32) -> (i32, i32) {
    %c0_i32 = arith.constant 0 : i32
    %c0_i32_0 = arith.constant 0 : i32
    %c0_i32_1 = arith.constant 0 : i32
    return %c0_i32, %c0_i32_0 : i32, i32
  }
  func.func @transform_6(%arg0: i32) -> (i32, i32) {
    %c0_i32 = arith.constant 0 : i32
    %c0_i32_0 = arith.constant 0 : i32
    %c0_i32_1 = arith.constant 0 : i32
    return %c0_i32, %c0_i32_0 : i32, i32
  }
  func.func @transform_7(%arg0: i32) -> (i32, i32) {
    %c0_i32 = arith.constant 0 : i32
    %c0_i32_0 = arith.constant 0 : i32
    %c0_i32_1 = arith.constant 0 : i32
    return %c0_i32, %c0_i32_0 : i32, i32
  }
  func.func @transform_8(%arg0: i32) -> (i32, i32) {
    %c0_i32 = arith.constant 0 : i32
    %c0_i32_0 = arith.constant 0 : i32
    return %arg0, %c0_i32 : i32, i32
  }
}

module attributes {stable_mosaic.version = 11 : i64} {
  func.func @_pw_bn_relu_kernel(%arg0: i32, %arg1: memref<512x16xf32, #tpu.memory_space<vmem>>, %arg2: memref<16x8xf32, #tpu.memory_space<vmem>>, %arg3: memref<1x8xf32, #tpu.memory_space<vmem>>, %arg4: memref<1x8xf32, #tpu.memory_space<vmem>>, %arg5: memref<512x8xf32, #tpu.memory_space<vmem>>) attributes {dimension_semantics = [#tpu.dimension_semantics<parallel>], iteration_bounds = array<i64: 1>, scalar_prefetch = 0 : i64, scratch_operands = 0 : i64, tpu.core_type = #tpu.core_type<tc>, window_params = [{transform_indices = @transform_0, window_bounds = array<i64: 512, 16>}, {pipeline_mode = #tpu.pipeline_mode<synchronous>, transform_indices = @transform_1, window_bounds = array<i64: 16, 8>}, {pipeline_mode = #tpu.pipeline_mode<synchronous>, transform_indices = @transform_2, window_bounds = array<i64: 1, 8>}, {pipeline_mode = #tpu.pipeline_mode<synchronous>, transform_indices = @transform_3, window_bounds = array<i64: 1, 8>}, {transform_indices = @transform_4, window_bounds = array<i64: 512, 8>}]} {
    %c0 = arith.constant 0 : index
    %c0_0 = arith.constant 0 : index
    %0 = vector.load %arg1[%c0, %c0_0] : memref<512x16xf32, #tpu.memory_space<vmem>>, vector<512x16xf32>
    %c0_1 = arith.constant 0 : index
    %c0_2 = arith.constant 0 : index
    %1 = vector.load %arg2[%c0_1, %c0_2] : memref<16x8xf32, #tpu.memory_space<vmem>>, vector<16x8xf32>
    %cst = arith.constant dense<0.000000e+00> : vector<512x8xf32>
    %2 = tpu.matmul %0, %1, %cst {dimension_numbers = #tpu.dot_dimension_numbers<[1], [0], [0], [1], [0, 0, 1, 1], [], []>} : vector<512x16xf32>, vector<16x8xf32>, vector<512x8xf32> -> vector<512x8xf32>
    %c0_3 = arith.constant 0 : index
    %c0_4 = arith.constant 0 : index
    %3 = vector.load %arg3[%c0_3, %c0_4] : memref<1x8xf32, #tpu.memory_space<vmem>>, vector<1x8xf32>
    %4 = vector.broadcast %3 : vector<1x8xf32> to vector<512x8xf32>
    %5 = arith.mulf %2, %4 : vector<512x8xf32>
    %c0_5 = arith.constant 0 : index
    %c0_6 = arith.constant 0 : index
    %6 = vector.load %arg4[%c0_5, %c0_6] : memref<1x8xf32, #tpu.memory_space<vmem>>, vector<1x8xf32>
    %7 = vector.broadcast %6 : vector<1x8xf32> to vector<512x8xf32>
    %8 = arith.addf %5, %7 : vector<512x8xf32>
    %cst_7 = arith.constant 0.000000e+00 : f32
    %9 = vector.broadcast %cst_7 : f32 to vector<512x8xf32>
    %10 = arith.maximumf %8, %9 : vector<512x8xf32>
    %c0_8 = arith.constant 0 : index
    %c0_9 = arith.constant 0 : index
    %11 = vector.load %arg5[%c0_8, %c0_9] : memref<512x8xf32, #tpu.memory_space<vmem>>, vector<512x8xf32>
    tpu.vector_store %arg5[%c0_8, %c0_9], %10 {strides = array<i32>} : memref<512x8xf32, #tpu.memory_space<vmem>>, vector<512x8xf32>,
    return
  }
  func.func @transform_0(%arg0: i32) -> (i32, i32) {
    %c0_i32 = arith.constant 0 : i32
    %c0_i32_0 = arith.constant 0 : i32
    return %arg0, %c0_i32 : i32, i32
  }
  func.func @transform_1(%arg0: i32) -> (i32, i32) {
    %c0_i32 = arith.constant 0 : i32
    %c0_i32_0 = arith.constant 0 : i32
    %c0_i32_1 = arith.constant 0 : i32
    return %c0_i32, %c0_i32_0 : i32, i32
  }
  func.func @transform_2(%arg0: i32) -> (i32, i32) {
    %c0_i32 = arith.constant 0 : i32
    %c0_i32_0 = arith.constant 0 : i32
    %c0_i32_1 = arith.constant 0 : i32
    return %c0_i32, %c0_i32_0 : i32, i32
  }
  func.func @transform_3(%arg0: i32) -> (i32, i32) {
    %c0_i32 = arith.constant 0 : i32
    %c0_i32_0 = arith.constant 0 : i32
    %c0_i32_1 = arith.constant 0 : i32
    return %c0_i32, %c0_i32_0 : i32, i32
  }
  func.func @transform_4(%arg0: i32) -> (i32, i32) {
    %c0_i32 = arith.constant 0 : i32
    %c0_i32_0 = arith.constant 0 : i32
    return %arg0, %c0_i32 : i32, i32
  }
}

module attributes {stable_mosaic.version = 11 : i64} {
  func.func @_conv3x3x3_kernel(%arg0: i32, %arg1: i32, %arg2: memref<1x1x10x10x8xf32, #tpu.memory_space<vmem>>, %arg3: memref<1x1x10x10x8xf32, #tpu.memory_space<vmem>>, %arg4: memref<1x1x10x10x8xf32, #tpu.memory_space<vmem>>, %arg5: memref<3x72x8xf32, #tpu.memory_space<vmem>>, %arg6: memref<1x8xf32, #tpu.memory_space<vmem>>, %arg7: memref<1x8xf32, #tpu.memory_space<vmem>>, %arg8: memref<1x1x64x8xf32, #tpu.memory_space<vmem>>) attributes {dimension_semantics = [#tpu.dimension_semantics<parallel>, #tpu.dimension_semantics<parallel>], iteration_bounds = array<i64: 2, 4>, scalar_prefetch = 0 : i64, scratch_operands = 0 : i64, tpu.core_type = #tpu.core_type<tc>, window_params = [{transform_indices = @transform_0, window_bounds = array<i64: 1, 1, 10, 10, 8>}, {transform_indices = @transform_1, window_bounds = array<i64: 1, 1, 10, 10, 8>}, {transform_indices = @transform_2, window_bounds = array<i64: 1, 1, 10, 10, 8>}, {pipeline_mode = #tpu.pipeline_mode<synchronous>, transform_indices = @transform_3, window_bounds = array<i64: 3, 72, 8>}, {pipeline_mode = #tpu.pipeline_mode<synchronous>, transform_indices = @transform_4, window_bounds = array<i64: 1, 8>}, {pipeline_mode = #tpu.pipeline_mode<synchronous>, transform_indices = @transform_5, window_bounds = array<i64: 1, 8>}, {transform_indices = @transform_6, window_bounds = array<i64: 1, 1, 64, 8>}]} {
    %c0 = arith.constant 0 : index
    %c0_0 = arith.constant 0 : index
    %c0_1 = arith.constant 0 : index
    %c0_2 = arith.constant 0 : index
    %c0_3 = arith.constant 0 : index
    %0 = vector.load %arg2[%c0, %c0_0, %c0_1, %c0_2, %c0_3] : memref<1x1x10x10x8xf32, #tpu.memory_space<vmem>>, vector<1x1x10x10x8xf32>
    %1 = vector.shape_cast %0 : vector<1x1x10x10x8xf32> to vector<10x10x8xf32>
    %2 = vector.extract_strided_slice %1 {offsets = [0, 0, 0], sizes = [8, 10, 8], strides = [1, 1, 1]} : vector<10x10x8xf32> to vector<8x10x8xf32>
    %3 = vector.extract_strided_slice %1 {offsets = [1, 0, 0], sizes = [8, 10, 8], strides = [1, 1, 1]} : vector<10x10x8xf32> to vector<8x10x8xf32>
    %4 = vector.extract_strided_slice %1 {offsets = [2, 0, 0], sizes = [8, 10, 8], strides = [1, 1, 1]} : vector<10x10x8xf32> to vector<8x10x8xf32>
    %c0_4 = arith.constant 0 : index
    %c0_5 = arith.constant 0 : index
    %c0_6 = arith.constant 0 : index
    %c0_7 = arith.constant 0 : index
    %c0_8 = arith.constant 0 : index
    %5 = vector.load %arg3[%c0_4, %c0_5, %c0_6, %c0_7, %c0_8] : memref<1x1x10x10x8xf32, #tpu.memory_space<vmem>>, vector<1x1x10x10x8xf32>
    %6 = vector.shape_cast %5 : vector<1x1x10x10x8xf32> to vector<10x10x8xf32>
    %7 = vector.extract_strided_slice %6 {offsets = [0, 0, 0], sizes = [8, 10, 8], strides = [1, 1, 1]} : vector<10x10x8xf32> to vector<8x10x8xf32>
    %8 = vector.extract_strided_slice %6 {offsets = [1, 0, 0], sizes = [8, 10, 8], strides = [1, 1, 1]} : vector<10x10x8xf32> to vector<8x10x8xf32>
    %9 = vector.extract_strided_slice %6 {offsets = [2, 0, 0], sizes = [8, 10, 8], strides = [1, 1, 1]} : vector<10x10x8xf32> to vector<8x10x8xf32>
    %c0_9 = arith.constant 0 : index
    %c0_10 = arith.constant 0 : index
    %c0_11 = arith.constant 0 : index
    %c0_12 = arith.constant 0 : index
    %c0_13 = arith.constant 0 : index
    %10 = vector.load %arg4[%c0_9, %c0_10, %c0_11, %c0_12, %c0_13] : memref<1x1x10x10x8xf32, #tpu.memory_space<vmem>>, vector<1x1x10x10x8xf32>
    %11 = vector.shape_cast %10 : vector<1x1x10x10x8xf32> to vector<10x10x8xf32>
    %12 = vector.extract_strided_slice %11 {offsets = [0, 0, 0], sizes = [8, 10, 8], strides = [1, 1, 1]} : vector<10x10x8xf32> to vector<8x10x8xf32>
    %13 = vector.extract_strided_slice %11 {offsets = [1, 0, 0], sizes = [8, 10, 8], strides = [1, 1, 1]} : vector<10x10x8xf32> to vector<8x10x8xf32>
    %14 = vector.extract_strided_slice %11 {offsets = [2, 0, 0], sizes = [8, 10, 8], strides = [1, 1, 1]} : vector<10x10x8xf32> to vector<8x10x8xf32>
    %15 = tpu.concatenate %2, %3, %4, %7, %8, %9, %12, %13, %14 in 2 : vector<8x10x8xf32>, vector<8x10x8xf32>, vector<8x10x8xf32>, vector<8x10x8xf32>, vector<8x10x8xf32>, vector<8x10x8xf32>, vector<8x10x8xf32>, vector<8x10x8xf32>, vector<8x10x8xf32> -> vector<8x10x72xf32>
    %cst = arith.constant 0.000000e+00 : f32
    %16 = vector.broadcast %cst : f32 to vector<64x8xf32>
    %17 = vector.extract_strided_slice %15 {offsets = [0, 0, 0], sizes = [8, 8, 72], strides = [1, 1, 1]} : vector<8x10x72xf32> to vector<8x8x72xf32>
    %18 = vector.shape_cast %17 : vector<8x8x72xf32> to vector<64x72xf32>
    %c0_14 = arith.constant 0 : index
    %c0_15 = arith.constant 0 : index
    %c0_16 = arith.constant 0 : index
    %19 = vector.load %arg5[%c0_14, %c0_15, %c0_16] : memref<3x72x8xf32, #tpu.memory_space<vmem>>, vector<1x72x8xf32>
    %20 = vector.shape_cast %19 : vector<1x72x8xf32> to vector<72x8xf32>
    %cst_17 = arith.constant dense<0.000000e+00> : vector<64x8xf32>
    %21 = tpu.matmul %18, %20, %cst_17 {dimension_numbers = #tpu.dot_dimension_numbers<[1], [0], [0], [1], [0, 0, 1, 1], [], []>} : vector<64x72xf32>, vector<72x8xf32>, vector<64x8xf32> -> vector<64x8xf32>
    %22 = arith.addf %16, %21 : vector<64x8xf32>
    %23 = vector.extract_strided_slice %15 {offsets = [0, 1, 0], sizes = [8, 8, 72], strides = [1, 1, 1]} : vector<8x10x72xf32> to vector<8x8x72xf32>
    %24 = vector.shape_cast %23 : vector<8x8x72xf32> to vector<64x72xf32>
    %c1 = arith.constant 1 : index
    %c0_18 = arith.constant 0 : index
    %c0_19 = arith.constant 0 : index
    %25 = vector.load %arg5[%c1, %c0_18, %c0_19] : memref<3x72x8xf32, #tpu.memory_space<vmem>>, vector<1x72x8xf32>
    %26 = vector.shape_cast %25 : vector<1x72x8xf32> to vector<72x8xf32>
    %cst_20 = arith.constant dense<0.000000e+00> : vector<64x8xf32>
    %27 = tpu.matmul %24, %26, %cst_20 {dimension_numbers = #tpu.dot_dimension_numbers<[1], [0], [0], [1], [0, 0, 1, 1], [], []>} : vector<64x72xf32>, vector<72x8xf32>, vector<64x8xf32> -> vector<64x8xf32>
    %28 = arith.addf %22, %27 : vector<64x8xf32>
    %29 = vector.extract_strided_slice %15 {offsets = [0, 2, 0], sizes = [8, 8, 72], strides = [1, 1, 1]} : vector<8x10x72xf32> to vector<8x8x72xf32>
    %30 = vector.shape_cast %29 : vector<8x8x72xf32> to vector<64x72xf32>
    %c2 = arith.constant 2 : index
    %c0_21 = arith.constant 0 : index
    %c0_22 = arith.constant 0 : index
    %31 = vector.load %arg5[%c2, %c0_21, %c0_22] : memref<3x72x8xf32, #tpu.memory_space<vmem>>, vector<1x72x8xf32>
    %32 = vector.shape_cast %31 : vector<1x72x8xf32> to vector<72x8xf32>
    %cst_23 = arith.constant dense<0.000000e+00> : vector<64x8xf32>
    %33 = tpu.matmul %30, %32, %cst_23 {dimension_numbers = #tpu.dot_dimension_numbers<[1], [0], [0], [1], [0, 0, 1, 1], [], []>} : vector<64x72xf32>, vector<72x8xf32>, vector<64x8xf32> -> vector<64x8xf32>
    %34 = arith.addf %28, %33 : vector<64x8xf32>
    %c0_24 = arith.constant 0 : index
    %c0_25 = arith.constant 0 : index
    %35 = vector.load %arg6[%c0_24, %c0_25] : memref<1x8xf32, #tpu.memory_space<vmem>>, vector<1x8xf32>
    %36 = vector.broadcast %35 : vector<1x8xf32> to vector<64x8xf32>
    %37 = arith.mulf %34, %36 : vector<64x8xf32>
    %c0_26 = arith.constant 0 : index
    %c0_27 = arith.constant 0 : index
    %38 = vector.load %arg7[%c0_26, %c0_27] : memref<1x8xf32, #tpu.memory_space<vmem>>, vector<1x8xf32>
    %39 = vector.broadcast %38 : vector<1x8xf32> to vector<64x8xf32>
    %40 = arith.addf %37, %39 : vector<64x8xf32>
    %cst_28 = arith.constant 0.000000e+00 : f32
    %41 = vector.broadcast %cst_28 : f32 to vector<64x8xf32>
    %42 = arith.maximumf %40, %41 : vector<64x8xf32>
    %c0_29 = arith.constant 0 : index
    %c0_30 = arith.constant 0 : index
    %c0_31 = arith.constant 0 : index
    %c0_32 = arith.constant 0 : index
    %43 = vector.load %arg8[%c0_29, %c0_30, %c0_31, %c0_32] : memref<1x1x64x8xf32, #tpu.memory_space<vmem>>, vector<1x1x64x8xf32>
    %44 = vector.shape_cast %43 : vector<1x1x64x8xf32> to vector<64x8xf32>
    %45 = vector.shape_cast %42 : vector<64x8xf32> to vector<1x1x64x8xf32>
    tpu.vector_store %arg8[%c0_29, %c0_30, %c0_31, %c0_32], %45 {strides = array<i32>} : memref<1x1x64x8xf32, #tpu.memory_space<vmem>>, vector<1x1x64x8xf32>,
    return
  }
  func.func @transform_0(%arg0: i32, %arg1: i32) -> (i32, i32, i32, i32, i32) {
    %c1_i32 = arith.constant 1 : i32
    %0 = arith.muli %arg1, %c1_i32 : i32
    %c0_i32 = arith.constant 0 : i32
    %1 = arith.addi %0, %c0_i32 : i32
    %c0_i32_0 = arith.constant 0 : i32
    %c0_i32_1 = arith.constant 0 : i32
    %c0_i32_2 = arith.constant 0 : i32
    %c0_i32_3 = arith.constant 0 : i32
    return %arg0, %1, %c0_i32_0, %c0_i32_1, %c0_i32_2 : i32, i32, i32, i32, i32
  }
  func.func @transform_1(%arg0: i32, %arg1: i32) -> (i32, i32, i32, i32, i32) {
    %c1_i32 = arith.constant 1 : i32
    %0 = arith.muli %arg1, %c1_i32 : i32
    %c1_i32_0 = arith.constant 1 : i32
    %1 = arith.addi %0, %c1_i32_0 : i32
    %c0_i32 = arith.constant 0 : i32
    %c0_i32_1 = arith.constant 0 : i32
    %c0_i32_2 = arith.constant 0 : i32
    %c0_i32_3 = arith.constant 0 : i32
    return %arg0, %1, %c0_i32, %c0_i32_1, %c0_i32_2 : i32, i32, i32, i32, i32
  }
  func.func @transform_2(%arg0: i32, %arg1: i32) -> (i32, i32, i32, i32, i32) {
    %c1_i32 = arith.constant 1 : i32
    %0 = arith.muli %arg1, %c1_i32 : i32
    %c2_i32 = arith.constant 2 : i32
    %1 = arith.addi %0, %c2_i32 : i32
    %c0_i32 = arith.constant 0 : i32
    %c0_i32_0 = arith.constant 0 : i32
    %c0_i32_1 = arith.constant 0 : i32
    %c0_i32_2 = arith.constant 0 : i32
    return %arg0, %1, %c0_i32, %c0_i32_0, %c0_i32_1 : i32, i32, i32, i32, i32
  }
  func.func @transform_3(%arg0: i32, %arg1: i32) -> (i32, i32, i32) {
    %c0_i32 = arith.constant 0 : i32
    %c0_i32_0 = arith.constant 0 : i32
    %c0_i32_1 = arith.constant 0 : i32
    %c0_i32_2 = arith.constant 0 : i32
    return %c0_i32, %c0_i32_0, %c0_i32_1 : i32, i32, i32
  }
  func.func @transform_4(%arg0: i32, %arg1: i32) -> (i32, i32) {
    %c0_i32 = arith.constant 0 : i32
    %c0_i32_0 = arith.constant 0 : i32
    %c0_i32_1 = arith.constant 0 : i32
    return %c0_i32, %c0_i32_0 : i32, i32
  }
  func.func @transform_5(%arg0: i32, %arg1: i32) -> (i32, i32) {
    %c0_i32 = arith.constant 0 : i32
    %c0_i32_0 = arith.constant 0 : i32
    %c0_i32_1 = arith.constant 0 : i32
    return %c0_i32, %c0_i32_0 : i32, i32
  }
  func.func @transform_6(%arg0: i32, %arg1: i32) -> (i32, i32, i32, i32) {
    %c0_i32 = arith.constant 0 : i32
    %c0_i32_0 = arith.constant 0 : i32
    %c0_i32_1 = arith.constant 0 : i32
    return %arg0, %arg1, %c0_i32, %c0_i32_0 : i32, i32, i32, i32
  }
}

</mosaic_0001>

<bundles_post_ra>
// kernel: residual_block_forward.3
= control target key start
LH: loop header
LB: loop body
LE: loop exit
PB: predicated region body
PF: predicated region fallthrough
CT: control target
= control target key end

     0   :  { %9 = vsyncpa [#allocation3], 0  ;;  %s1409_s0 = inlined_call_operand.hbm [shape: f32[512,16], index: 0, kind: input, shape index: {}]   ;;  %s1410_s1 = inlined_call_operand.hbm [shape: f32[16,8], index: 1, kind: input, shape index: {}]   ;;  %s1411_s2 = inlined_call_operand.vmem [shape: f32[1,8], index: 2, kind: input, shape index: {}]   ;;  %s1412_s3 = inlined_call_operand.vmem [shape: f32[1,8], index: 3, kind: input, shape index: {}]   ;;  %s1413_s4 = inlined_call_operand.vmem [shape: f32[512,8], index: 4, kind: output, shape index: {}]  }
   0x1   :  { %s15_s17 = sshll.u32 %s1409_s0, 4  ;;  %s16_s17 = int_to_ptr.hbm [resolvable:$true] %s15_s17 }
   0x2   :  { %10 = vsyncpa [#allocation5], 0  ;;  %s916_s18 = smov [#allocation2]   ;;  %s28_s22 = sshll.u32 %s1410_s1, 4  ;;  %s29_s22 = int_to_ptr.hbm [resolvable:$true] %s28_s22 }
   0x3   :  { %s17_s19 = sshll.u32 %s916_s18, 4  ;;  %s917_s23 = smov 128   ;;  %s18_s19 = int_to_ptr.vmem [resolvable:$true] %s17_s19 }
   0x4   :  { %s918_s24 = smov 8   ;;  %s919_s25 = smov [#allocation4]  }
   0x5   :  { %23 = dma.hbm_to_vmem [thread:$0]  %s16_s17, 8192, %s18_s19, [#allocation3], %s917_s23, %s917_s23, %s918_s24  }
   0x6   :  { %s30_s26 = sshll.u32 %s919_s25, 4  ;;  %s31_s26 = int_to_ptr.vmem [resolvable:$true] %s30_s26 }
   0x7   :  { %36 = dma.hbm_to_vmem [thread:$0]  %s29_s22, 256, %s31_s26, [#allocation5], %s917_s23, %s917_s23, %s918_s24  }
   0x8   :  { %912 = dma.done.wait [#allocation3], 8192  }
   0x9   :  { %913 = vsyncadd [#allocation3], 4294959104 }
   0xa   :  { %914 = dma.done.wait [#allocation5], 256  }
   0xb   :  { %915 = vsyncadd [#allocation5], 4294967040  ;;  %v114_v0 = vld [vmem:[#allocation4 + $0x8] sm:$0xff]  ;;  %v113_v1 = vld [vmem:[#allocation4] sm:$0xff]  ;;  %vm115_vm0 = vcmask 130048   ;;  %vm717_vm1 = vcmask 64512  }
   0xc   :  { %853 = vmatpush.msra.mxu2 %v114_v0  ;;  %854 = vmatpush.msra.mxu3 %v114_v0  ;;  %v81_v2 = vld [vmem:[#allocation2 + $0x100] sm:$0xff]  ;;  %v82_v6 = vld [vmem:[#allocation2 + $0x108] sm:$0xff]  ;;  %v83_v10 = vld [vmem:[#allocation2 + $0x110] sm:$0xff] }
   0xd   :  { %v97_v3 = vld [vmem:[#allocation2 + $0x180] sm:$0xff]  ;;  %322 = vmatpush.msra.mxu0 %v114_v0  ;;  %852 = vmatpush.msra.mxu1 %v114_v0  ;;  %v98_v7 = vld [vmem:[#allocation2 + $0x188] sm:$0xff]  ;;  %v99_v11 = vld [vmem:[#allocation2 + $0x190] sm:$0xff] }
   0xe   :  { %856 = vmatpush.msra.mxu2 %v113_v1  ;;  %857 = vmatpush.msra.mxu3 %v113_v1  ;;  %v49_v4 = vld [vmem:[#allocation2] sm:$0xff]  ;;  %v50_v8 = vld [vmem:[#allocation2 + $0x8] sm:$0xff]  ;;  %v51_v12 = vld [vmem:[#allocation2 + $0x10] sm:$0xff] }
   0xf   :  { %v65_v5 = vld [vmem:[#allocation2 + $0x80] sm:$0xff]  ;;  %820 = vmatmul.msk.f32.vlgmr.msra.gmra.mxu2 %vm115_vm0, %v81_v2  ;;  %836 = vmatmul.msk.f32.vlgmr.msra.gmra.mxu3 %vm115_vm0, %v97_v3  ;;  %v66_v9 = vld [vmem:[#allocation2 + $0x88] sm:$0xff]  ;;  %v67_v13 = vld [vmem:[#allocation2 + $0x90] sm:$0xff] }
  0x10   :  { %323 = vmatpush.msra.mxu0 %v113_v1  ;;  %855 = vmatpush.msra.mxu1 %v113_v1  ;;  %v84_v14 = vld [vmem:[#allocation2 + $0x118] sm:$0xff]  ;;  %v85_v18 = vld [vmem:[#allocation2 + $0x120] sm:$0xff]  ;;  %v86_v22 = vld [vmem:[#allocation2 + $0x128] sm:$0xff] }
  0x11   :  { %788 = vmatmul.msk.f32.vlgmr.msra.gmra.mxu0 %vm115_vm0, %v49_v4  ;;  %804 = vmatmul.msk.f32.vlgmr.msra.gmra.mxu1 %vm115_vm0, %v65_v5  ;;  %v100_v15 = vld [vmem:[#allocation2 + $0x198] sm:$0xff]  ;;  %v101_v19 = vld [vmem:[#allocation2 + $0x1a0] sm:$0xff]  ;;  %v102_v23 = vld [vmem:[#allocation2 + $0x1a8] sm:$0xff] }
  0x12   :  { %v52_v16 = vld [vmem:[#allocation2 + $0x18] sm:$0xff]  ;;  %v53_v20 = vld [vmem:[#allocation2 + $0x20] sm:$0xff]  ;;  %v54_v24 = vld [vmem:[#allocation2 + $0x28] sm:$0xff] }
  0x13   :  { %v68_v17 = vld [vmem:[#allocation2 + $0x98] sm:$0xff]  ;;  %v69_v21 = vld [vmem:[#allocation2 + $0xa0] sm:$0xff]  ;;  %v70_v25 = vld [vmem:[#allocation2 + $0xa8] sm:$0xff] }
  0x14   :  { %v87_v26 = vld [vmem:[#allocation2 + $0x130] sm:$0xff]  ;;  %v88_v30 = vld [vmem:[#allocation2 + $0x138] sm:$0xff]  ;;  %v89_v34 = vld [vmem:[#allocation2 + $0x140] sm:$0xff] }
  0x15   :  { %v103_v27 = vld [vmem:[#allocation2 + $0x1b0] sm:$0xff]  ;;  %v104_v31 = vld [vmem:[#allocation2 + $0x1b8] sm:$0xff]  ;;  %v105_v35 = vld [vmem:[#allocation2 + $0x1c0] sm:$0xff] }
  0x16   :  { %v55_v28 = vld [vmem:[#allocation2 + $0x30] sm:$0xff]  ;;  %v56_v32 = vld [vmem:[#allocation2 + $0x38] sm:$0xff]  ;;  %v57_v36 = vld [vmem:[#allocation2 + $0x40] sm:$0xff] }
  0x17   :  { %821 = vmatmul.msk.f32.gmra.mxu2 %vm115_vm0, %v82_v6  ;;  %837 = vmatmul.msk.f32.gmra.mxu3 %vm115_vm0, %v98_v7  ;;  %v71_v29 = vld [vmem:[#allocation2 + $0xb0] sm:$0xff]  ;;  %v72_v33 = vld [vmem:[#allocation2 + $0xb8] sm:$0xff]  ;;  %v73_v37 = vld [vmem:[#allocation2 + $0xc0] sm:$0xff] }
  0x18   :  { %v90_v38 = vld [vmem:[#allocation2 + $0x148] sm:$0xff]  ;;  %v91_v42 = vld [vmem:[#allocation2 + $0x150] sm:$0xff]  ;;  %v92_v46 = vld [vmem:[#allocation2 + $0x158] sm:$0xff] }
  0x19   :  { %789 = vmatmul.msk.f32.gmra.mxu0 %vm115_vm0, %v50_v8  ;;  %805 = vmatmul.msk.f32.gmra.mxu1 %vm115_vm0, %v66_v9  ;;  %v106_v39 = vld [vmem:[#allocation2 + $0x1c8] sm:$0xff]  ;;  %v107_v43 = vld [vmem:[#allocation2 + $0x1d0] sm:$0xff]  ;;  %v108_v47 = vld [vmem:[#allocation2 + $0x1d8] sm:$0xff] }
  0x1a   :  { %v58_v40 = vld [vmem:[#allocation2 + $0x48] sm:$0xff]  ;;  %v59_v44 = vld [vmem:[#allocation2 + $0x50] sm:$0xff]  ;;  %v60_v48 = vld [vmem:[#allocation2 + $0x58] sm:$0xff] }
  0x1b   :  { %v74_v41 = vld [vmem:[#allocation2 + $0xc8] sm:$0xff]  ;;  %v75_v45 = vld [vmem:[#allocation2 + $0xd0] sm:$0xff]  ;;  %v76_v49 = vld [vmem:[#allocation2 + $0xd8] sm:$0xff] }
  0x1c   :  { %v93_v50 = vld [vmem:[#allocation2 + $0x160] sm:$0xff]  ;;  %v94_v54 = vld [vmem:[#allocation2 + $0x168] sm:$0xff]  ;;  %v95_v58 = vld [vmem:[#allocation2 + $0x170] sm:$0xff] }
  0x1d   :  { %v109_v51 = vld [vmem:[#allocation2 + $0x1e0] sm:$0xff]  ;;  %v110_v55 = vld [vmem:[#allocation2 + $0x1e8] sm:$0xff]  ;;  %v111_v59 = vld [vmem:[#allocation2 + $0x1f0] sm:$0xff] }
  0x1e   :  { %v61_v52 = vld [vmem:[#allocation2 + $0x60] sm:$0xff]  ;;  %v62_v56 = vld [vmem:[#allocation2 + $0x68] sm:$0xff]  ;;  %v63_v60 = vld [vmem:[#allocation2 + $0x70] sm:$0xff] }
  0x1f   :  { %822 = vmatmul.msk.f32.gmra.mxu2 %vm115_vm0, %v83_v10  ;;  %838 = vmatmul.msk.f32.gmra.mxu3 %vm115_vm0, %v99_v11  ;;  %v77_v53 = vld [vmem:[#allocation2 + $0xe0] sm:$0xff]  ;;  %v78_v57 = vld [vmem:[#allocation2 + $0xe8] sm:$0xff]  ;;  %v79_v61 = vld [vmem:[#allocation2 + $0xf0] sm:$0xff] }
  0x20   :  { %v96_v62 = vld [vmem:[#allocation2 + $0x178] sm:$0xff]  ;;  %v1018_v2 = vld [vmem:[%s1411_s2] ss:$0 sm:$0xff] }
  0x21   :  { %790 = vmatmul.msk.f32.gmra.mxu0 %vm115_vm0, %v51_v12  ;;  %806 = vmatmul.msk.f32.gmra.mxu1 %vm115_vm0, %v67_v13  ;;  %v112_v63 = vld [vmem:[#allocation2 + $0x1f8] sm:$0xff]  ;;  %v1023_v3 = vld [vmem:[%s1412_s3] ss:$0 sm:$0xff] }
  0x22   :  { %v64_v0 = vld [vmem:[#allocation2 + $0x78] sm:$0xff] }
  0x23   :  { %v80_v1 = vld [vmem:[#allocation2 + $0xf8] sm:$0xff] }
  0x27   :  { %823 = vmatmul.msk.f32.gmra.mxu2 %vm115_vm0, %v84_v14  ;;  %839 = vmatmul.msk.f32.gmra.mxu3 %vm115_vm0, %v100_v15 }
  0x29   :  { %791 = vmatmul.msk.f32.gmra.mxu0 %vm115_vm0, %v52_v16  ;;  %807 = vmatmul.msk.f32.gmra.mxu1 %vm115_vm0, %v68_v17 }
  0x2f   :  { %824 = vmatmul.msk.f32.gmra.mxu2 %vm115_vm0, %v85_v18  ;;  %840 = vmatmul.msk.f32.gmra.mxu3 %vm115_vm0, %v101_v19 }
  0x31   :  { %792 = vmatmul.msk.f32.gmra.mxu0 %vm115_vm0, %v53_v20  ;;  %808 = vmatmul.msk.f32.gmra.mxu1 %vm115_vm0, %v69_v21 }
  0x37   :  { %825 = vmatmul.msk.f32.gmra.mxu2 %vm115_vm0, %v86_v22  ;;  %841 = vmatmul.msk.f32.gmra.mxu3 %vm115_vm0, %v102_v23 }
  0x39   :  { %793 = vmatmul.msk.f32.gmra.mxu0 %vm115_vm0, %v54_v24  ;;  %809 = vmatmul.msk.f32.gmra.mxu1 %vm115_vm0, %v70_v25 }
  0x3f   :  { %826 = vmatmul.msk.f32.gmra.mxu2 %vm115_vm0, %v87_v26  ;;  %842 = vmatmul.msk.f32.gmra.mxu3 %vm115_vm0, %v103_v27 }
  0x41   :  { %794 = vmatmul.msk.f32.gmra.mxu0 %vm115_vm0, %v55_v28  ;;  %810 = vmatmul.msk.f32.gmra.mxu1 %vm115_vm0, %v71_v29 }
  0x47   :  { %827 = vmatmul.msk.f32.gmra.mxu2 %vm115_vm0, %v88_v30  ;;  %843 = vmatmul.msk.f32.gmra.mxu3 %vm115_vm0, %v104_v31 }
  0x49   :  { %795 = vmatmul.msk.f32.gmra.mxu0 %vm115_vm0, %v56_v32  ;;  %811 = vmatmul.msk.f32.gmra.mxu1 %vm115_vm0, %v72_v33 }
  0x4f   :  { %828 = vmatmul.msk.f32.gmra.mxu2 %vm115_vm0, %v89_v34  ;;  %844 = vmatmul.msk.f32.gmra.mxu3 %vm115_vm0, %v105_v35 }
  0x51   :  { %796 = vmatmul.msk.f32.gmra.mxu0 %vm115_vm0, %v57_v36  ;;  %812 = vmatmul.msk.f32.gmra.mxu1 %vm115_vm0, %v73_v37 }
  0x57   :  { %829 = vmatmul.msk.f32.gmra.mxu2 %vm115_vm0, %v90_v38  ;;  %845 = vmatmul.msk.f32.gmra.mxu3 %vm115_vm0, %v106_v39 }
  0x59   :  { %797 = vmatmul.msk.f32.gmra.mxu0 %vm115_vm0, %v58_v40  ;;  %813 = vmatmul.msk.f32.gmra.mxu1 %vm115_vm0, %v74_v41 }
  0x5f   :  { %830 = vmatmul.msk.f32.gmra.mxu2 %vm115_vm0, %v91_v42  ;;  %846 = vmatmul.msk.f32.gmra.mxu3 %vm115_vm0, %v107_v43 }
  0x61   :  { %798 = vmatmul.msk.f32.gmra.mxu0 %vm115_vm0, %v59_v44  ;;  %814 = vmatmul.msk.f32.gmra.mxu1 %vm115_vm0, %v75_v45 }
  0x67   :  { %831 = vmatmul.msk.f32.gmra.mxu2 %vm115_vm0, %v92_v46  ;;  %847 = vmatmul.msk.f32.gmra.mxu3 %vm115_vm0, %v108_v47 }
  0x69   :  { %799 = vmatmul.msk.f32.gmra.mxu0 %vm115_vm0, %v60_v48  ;;  %815 = vmatmul.msk.f32.gmra.mxu1 %vm115_vm0, %v76_v49 }
  0x6f   :  { %832 = vmatmul.msk.f32.gmra.mxu2 %vm115_vm0, %v93_v50  ;;  %848 = vmatmul.msk.f32.gmra.mxu3 %vm115_vm0, %v109_v51 }
  0x71   :  { %800 = vmatmul.msk.f32.gmra.mxu0 %vm115_vm0, %v61_v52  ;;  %816 = vmatmul.msk.f32.gmra.mxu1 %vm115_vm0, %v77_v53 }
  0x77   :  { %833 = vmatmul.msk.f32.gmra.mxu2 %vm115_vm0, %v94_v54  ;;  %849 = vmatmul.msk.f32.gmra.mxu3 %vm115_vm0, %v110_v55 }
  0x79   :  { %801 = vmatmul.msk.f32.gmra.mxu0 %vm115_vm0, %v62_v56  ;;  %817 = vmatmul.msk.f32.gmra.mxu1 %vm115_vm0, %v78_v57 }
  0x7f   :  { %834 = vmatmul.msk.f32.gmra.mxu2 %vm115_vm0, %v95_v58  ;;  %850 = vmatmul.msk.f32.gmra.mxu3 %vm115_vm0, %v111_v59 }
  0x81   :  { %802 = vmatmul.msk.f32.gmra.mxu0 %vm115_vm0, %v63_v60  ;;  %818 = vmatmul.msk.f32.gmra.mxu1 %vm115_vm0, %v79_v61 }
  0x87   :  { %835 = vmatmul.msk.f32.gmra.mxu2 %vm115_vm0, %v96_v62  ;;  %851 = vmatmul.msk.f32.gmra.mxu3 %vm115_vm0, %v112_v63 }
  0x89   :  { %803 = vmatmul.msk.f32.gmra.mxu0 %vm115_vm0, %v64_v0  ;;  %819 = vmatmul.msk.f32.gmra.mxu1 %vm115_vm0, %v80_v1 }
  0x8e   :  { %v325_v4 = vpop.f32.mrf.mxu0  ;;  %v373_v5 = vpop.f32.mrf.mxu1 }
  0x8f   :  { %v521_v6 = vmul.f32 %v1018_v2, %v325_v4  ;;  %v537_v7 = vmul.f32 %v1018_v2, %v373_v5 }
  0x91   :  { %v589_v8 = vadd.f32 %v1023_v3, %v521_v6  ;;  %v605_v9 = vadd.f32 %v1023_v3, %v537_v7 }
  0x92   :  { %v421_v10 = vpop.f32.mrf.mxu2  ;;  %v469_v11 = vpop.f32.mrf.mxu3 }
  0x93   :  { %v653_v12 = vmax.f32 %v589_v8, 0.0  ;;  %v669_v13 = vmax.f32 %v605_v9, 0.0  ;;  %v553_v14 = vmul.f32 %v1018_v2, %v421_v10  ;;  %v569_v15 = vmul.f32 %v1018_v2, %v469_v11 }
  0x95   :  { %718 = vst.msk [vmem:[%s1413_s4] sm:$0xff] %vm717_vm1, %v653_v12  ;;  %v621_v16 = vadd.f32 %v1023_v3, %v553_v14  ;;  %v637_v17 = vadd.f32 %v1023_v3, %v569_v15 }
  0x96   :  { %734 = vst.msk [vmem:[%s1413_s4 + $0x80] sm:$0xff] %vm717_vm1, %v669_v13  ;;  %v328_v18 = vpop.f32.mrf.mxu0  ;;  %v376_v19 = vpop.f32.mrf.mxu1 }
  0x97   :  { %v685_v20 = vmax.f32 %v621_v16, 0.0  ;;  %v701_v21 = vmax.f32 %v637_v17, 0.0  ;;  %v522_v22 = vmul.f32 %v1018_v2, %v328_v18  ;;  %v538_v23 = vmul.f32 %v1018_v2, %v376_v19 }
  0x99   :  { %750 = vst.msk [vmem:[%s1413_s4 + $0x100] sm:$0xff] %vm717_vm1, %v685_v20  ;;  %v590_v24 = vadd.f32 %v1023_v3, %v522_v22  ;;  %v606_v25 = vadd.f32 %v1023_v3, %v538_v23 }
  0x9a   :  { %766 = vst.msk [vmem:[%s1413_s4 + $0x180] sm:$0xff] %vm717_vm1, %v701_v21  ;;  %v424_v26 = vpop.f32.mrf.mxu2  ;;  %v472_v27 = vpop.f32.mrf.mxu3 }
  0x9b   :  { %v654_v28 = vmax.f32 %v590_v24, 0.0  ;;  %v670_v29 = vmax.f32 %v606_v25, 0.0  ;;  %v554_v30 = vmul.f32 %v1018_v2, %v424_v26  ;;  %v570_v31 = vmul.f32 %v1018_v2, %v472_v27 }
  0x9d   :  { %719 = vst.msk [vmem:[%s1413_s4 + $0x8] sm:$0xff] %vm717_vm1, %v654_v28  ;;  %v622_v32 = vadd.f32 %v1023_v3, %v554_v30  ;;  %v638_v33 = vadd.f32 %v1023_v3, %v570_v31 }
  0x9e   :  { %735 = vst.msk [vmem:[%s1413_s4 + $0x88] sm:$0xff] %vm717_vm1, %v670_v29  ;;  %v331_v34 = vpop.f32.mrf.mxu0  ;;  %v379_v35 = vpop.f32.mrf.mxu1 }
  0x9f   :  { %v686_v36 = vmax.f32 %v622_v32, 0.0  ;;  %v702_v37 = vmax.f32 %v638_v33, 0.0  ;;  %v523_v38 = vmul.f32 %v1018_v2, %v331_v34  ;;  %v539_v39 = vmul.f32 %v1018_v2, %v379_v35 }
  0xa1   :  { %751 = vst.msk [vmem:[%s1413_s4 + $0x108] sm:$0xff] %vm717_vm1, %v686_v36  ;;  %v591_v40 = vadd.f32 %v1023_v3, %v523_v38  ;;  %v607_v41 = vadd.f32 %v1023_v3, %v539_v39 }
  0xa2   :  { %767 = vst.msk [vmem:[%s1413_s4 + $0x188] sm:$0xff] %vm717_vm1, %v702_v37  ;;  %v427_v42 = vpop.f32.mrf.mxu2  ;;  %v475_v43 = vpop.f32.mrf.mxu3 }
  0xa3   :  { %v655_v44 = vmax.f32 %v591_v40, 0.0  ;;  %v671_v45 = vmax.f32 %v607_v41, 0.0  ;;  %v555_v46 = vmul.f32 %v1018_v2, %v427_v42  ;;  %v571_v47 = vmul.f32 %v1018_v2, %v475_v43 }
  0xa5   :  { %720 = vst.msk [vmem:[%s1413_s4 + $0x10] sm:$0xff] %vm717_vm1, %v655_v44  ;;  %v623_v48 = vadd.f32 %v1023_v3, %v555_v46  ;;  %v639_v49 = vadd.f32 %v1023_v3, %v571_v47 }
  0xa6   :  { %736 = vst.msk [vmem:[%s1413_s4 + $0x90] sm:$0xff] %vm717_vm1, %v671_v45  ;;  %v334_v50 = vpop.f32.mrf.mxu0  ;;  %v382_v51 = vpop.f32.mrf.mxu1 }
  0xa7   :  { %v687_v52 = vmax.f32 %v623_v48, 0.0  ;;  %v703_v53 = vmax.f32 %v639_v49, 0.0  ;;  %v524_v54 = vmul.f32 %v1018_v2, %v334_v50  ;;  %v540_v55 = vmul.f32 %v1018_v2, %v382_v51 }
  0xa9   :  { %752 = vst.msk [vmem:[%s1413_s4 + $0x110] sm:$0xff] %vm717_vm1, %v687_v52  ;;  %v592_v56 = vadd.f32 %v1023_v3, %v524_v54  ;;  %v608_v57 = vadd.f32 %v1023_v3, %v540_v55 }
  0xaa   :  { %768 = vst.msk [vmem:[%s1413_s4 + $0x190] sm:$0xff] %vm717_vm1, %v703_v53  ;;  %v430_v58 = vpop.f32.mrf.mxu2  ;;  %v478_v59 = vpop.f32.mrf.mxu3 }
  0xab   :  { %v656_v60 = vmax.f32 %v592_v56, 0.0  ;;  %v672_v61 = vmax.f32 %v608_v57, 0.0  ;;  %v556_v62 = vmul.f32 %v1018_v2, %v430_v58  ;;  %v572_v63 = vmul.f32 %v1018_v2, %v478_v59 }
  0xad   :  { %721 = vst.msk [vmem:[%s1413_s4 + $0x18] sm:$0xff] %vm717_vm1, %v656_v60  ;;  %v624_v0 = vadd.f32 %v1023_v3, %v556_v62  ;;  %v640_v1 = vadd.f32 %v1023_v3, %v572_v63 }
  0xae   :  { %737 = vst.msk [vmem:[%s1413_s4 + $0x98] sm:$0xff] %vm717_vm1, %v672_v61  ;;  %v337_v4 = vpop.f32.mrf.mxu0  ;;  %v385_v5 = vpop.f32.mrf.mxu1 }
  0xaf   :  { %v688_v6 = vmax.f32 %v624_v0, 0.0  ;;  %v704_v7 = vmax.f32 %v640_v1, 0.0  ;;  %v525_v8 = vmul.f32 %v1018_v2, %v337_v4  ;;  %v541_v9 = vmul.f32 %v1018_v2, %v385_v5 }
  0xb1   :  { %753 = vst.msk [vmem:[%s1413_s4 + $0x118] sm:$0xff] %vm717_vm1, %v688_v6  ;;  %v593_v10 = vadd.f32 %v1023_v3, %v525_v8  ;;  %v609_v11 = vadd.f32 %v1023_v3, %v541_v9 }
  0xb2   :  { %769 = vst.msk [vmem:[%s1413_s4 + $0x198] sm:$0xff] %vm717_vm1, %v704_v7  ;;  %v433_v12 = vpop.f32.mrf.mxu2  ;;  %v481_v13 = vpop.f32.mrf.mxu3 }
  0xb3   :  { %v657_v14 = vmax.f32 %v593_v10, 0.0  ;;  %v673_v15 = vmax.f32 %v609_v11, 0.0  ;;  %v557_v16 = vmul.f32 %v1018_v2, %v433_v12  ;;  %v573_v17 = vmul.f32 %v1018_v2, %v481_v13 }
  0xb5   :  { %722 = vst.msk [vmem:[%s1413_s4 + $0x20] sm:$0xff] %vm717_vm1, %v657_v14  ;;  %v625_v18 = vadd.f32 %v1023_v3, %v557_v16  ;;  %v641_v19 = vadd.f32 %v1023_v3, %v573_v17 }
  0xb6   :  { %738 = vst.msk [vmem:[%s1413_s4 + $0xa0] sm:$0xff] %vm717_vm1, %v673_v15  ;;  %v340_v20 = vpop.f32.mrf.mxu0  ;;  %v388_v21 = vpop.f32.mrf.mxu1 }
  0xb7   :  { %v689_v22 = vmax.f32 %v625_v18, 0.0  ;;  %v705_v23 = vmax.f32 %v641_v19, 0.0  ;;  %v526_v24 = vmul.f32 %v1018_v2, %v340_v20  ;;  %v542_v25 = vmul.f32 %v1018_v2, %v388_v21 }
  0xb9   :  { %754 = vst.msk [vmem:[%s1413_s4 + $0x120] sm:$0xff] %vm717_vm1, %v689_v22  ;;  %v594_v26 = vadd.f32 %v1023_v3, %v526_v24  ;;  %v610_v27 = vadd.f32 %v1023_v3, %v542_v25 }
  0xba   :  { %770 = vst.msk [vmem:[%s1413_s4 + $0x1a0] sm:$0xff] %vm717_vm1, %v705_v23  ;;  %v436_v28 = vpop.f32.mrf.mxu2  ;;  %v484_v29 = vpop.f32.mrf.mxu3 }
  0xbb   :  { %v658_v30 = vmax.f32 %v594_v26, 0.0  ;;  %v674_v31 = vmax.f32 %v610_v27, 0.0  ;;  %v558_v32 = vmul.f32 %v1018_v2, %v436_v28  ;;  %v574_v33 = vmul.f32 %v1018_v2, %v484_v29 }
  0xbd   :  { %723 = vst.msk [vmem:[%s1413_s4 + $0x28] sm:$0xff] %vm717_vm1, %v658_v30  ;;  %v626_v34 = vadd.f32 %v1023_v3, %v558_v32  ;;  %v642_v35 = vadd.f32 %v1023_v3, %v574_v33 }
  0xbe   :  { %739 = vst.msk [vmem:[%s1413_s4 + $0xa8] sm:$0xff] %vm717_vm1, %v674_v31  ;;  %v343_v36 = vpop.f32.mrf.mxu0  ;;  %v391_v37 = vpop.f32.mrf.mxu1 }
  0xbf   :  { %v690_v38 = vmax.f32 %v626_v34, 0.0  ;;  %v706_v39 = vmax.f32 %v642_v35, 0.0  ;;  %v527_v40 = vmul.f32 %v1018_v2, %v343_v36  ;;  %v543_v41 = vmul.f32 %v1018_v2, %v391_v37 }
  0xc1   :  { %755 = vst.msk [vmem:[%s1413_s4 + $0x128] sm:$0xff] %vm717_vm1, %v690_v38  ;;  %v595_v42 = vadd.f32 %v1023_v3, %v527_v40  ;;  %v611_v43 = vadd.f32 %v1023_v3, %v543_v41 }
  0xc2   :  { %771 = vst.msk [vmem:[%s1413_s4 + $0x1a8] sm:$0xff] %vm717_vm1, %v706_v39  ;;  %v439_v44 = vpop.f32.mrf.mxu2  ;;  %v487_v45 = vpop.f32.mrf.mxu3 }
  0xc3   :  { %v659_v46 = vmax.f32 %v595_v42, 0.0  ;;  %v675_v47 = vmax.f32 %v611_v43, 0.0  ;;  %v559_v48 = vmul.f32 %v1018_v2, %v439_v44  ;;  %v575_v49 = vmul.f32 %v1018_v2, %v487_v45 }
  0xc5   :  { %724 = vst.msk [vmem:[%s1413_s4 + $0x30] sm:$0xff] %vm717_vm1, %v659_v46  ;;  %v627_v50 = vadd.f32 %v1023_v3, %v559_v48  ;;  %v643_v51 = vadd.f32 %v1023_v3, %v575_v49 }
  0xc6   :  { %740 = vst.msk [vmem:[%s1413_s4 + $0xb0] sm:$0xff] %vm717_vm1, %v675_v47  ;;  %v346_v52 = vpop.f32.mrf.mxu0  ;;  %v394_v53 = vpop.f32.mrf.mxu1 }
  0xc7   :  { %v691_v54 = vmax.f32 %v627_v50, 0.0  ;;  %v707_v55 = vmax.f32 %v643_v51, 0.0  ;;  %v528_v56 = vmul.f32 %v1018_v2, %v346_v52  ;;  %v544_v57 = vmul.f32 %v1018_v2, %v394_v53 }
  0xc9   :  { %756 = vst.msk [vmem:[%s1413_s4 + $0x130] sm:$0xff] %vm717_vm1, %v691_v54  ;;  %v596_v58 = vadd.f32 %v1023_v3, %v528_v56  ;;  %v612_v59 = vadd.f32 %v1023_v3, %v544_v57 }
  0xca   :  { %772 = vst.msk [vmem:[%s1413_s4 + $0x1b0] sm:$0xff] %vm717_vm1, %v707_v55  ;;  %v442_v60 = vpop.f32.mrf.mxu2  ;;  %v490_v61 = vpop.f32.mrf.mxu3 }
  0xcb   :  { %v660_v62 = vmax.f32 %v596_v58, 0.0  ;;  %v676_v63 = vmax.f32 %v612_v59, 0.0  ;;  %v560_v0 = vmul.f32 %v1018_v2, %v442_v60  ;;  %v576_v1 = vmul.f32 %v1018_v2, %v490_v61 }
  0xcd   :  { %725 = vst.msk [vmem:[%s1413_s4 + $0x38] sm:$0xff] %vm717_vm1, %v660_v62  ;;  %v628_v4 = vadd.f32 %v1023_v3, %v560_v0  ;;  %v644_v5 = vadd.f32 %v1023_v3, %v576_v1 }
  0xce   :  { %741 = vst.msk [vmem:[%s1413_s4 + $0xb8] sm:$0xff] %vm717_vm1, %v676_v63  ;;  %v349_v6 = vpop.f32.mrf.mxu0  ;;  %v397_v7 = vpop.f32.mrf.mxu1 }
  0xcf   :  { %v692_v8 = vmax.f32 %v628_v4, 0.0  ;;  %v708_v9 = vmax.f32 %v644_v5, 0.0  ;;  %v529_v10 = vmul.f32 %v1018_v2, %v349_v6  ;;  %v545_v11 = vmul.f32 %v1018_v2, %v397_v7 }
  0xd1   :  { %757 = vst.msk [vmem:[%s1413_s4 + $0x138] sm:$0xff] %vm717_vm1, %v692_v8  ;;  %v597_v12 = vadd.f32 %v1023_v3, %v529_v10  ;;  %v613_v13 = vadd.f32 %v1023_v3, %v545_v11 }
  0xd2   :  { %773 = vst.msk [vmem:[%s1413_s4 + $0x1b8] sm:$0xff] %vm717_vm1, %v708_v9  ;;  %v445_v14 = vpop.f32.mrf.mxu2  ;;  %v493_v15 = vpop.f32.mrf.mxu3 }
  0xd3   :  { %v661_v16 = vmax.f32 %v597_v12, 0.0  ;;  %v677_v17 = vmax.f32 %v613_v13, 0.0  ;;  %v561_v18 = vmul.f32 %v1018_v2, %v445_v14  ;;  %v577_v19 = vmul.f32 %v1018_v2, %v493_v15 }
  0xd5   :  { %726 = vst.msk [vmem:[%s1413_s4 + $0x40] sm:$0xff] %vm717_vm1, %v661_v16  ;;  %v629_v20 = vadd.f32 %v1023_v3, %v561_v18  ;;  %v645_v21 = vadd.f32 %v1023_v3, %v577_v19 }
  0xd6   :  { %742 = vst.msk [vmem:[%s1413_s4 + $0xc0] sm:$0xff] %vm717_vm1, %v677_v17  ;;  %v352_v22 = vpop.f32.mrf.mxu0  ;;  %v400_v23 = vpop.f32.mrf.mxu1 }
  0xd7   :  { %v693_v24 = vmax.f32 %v629_v20, 0.0  ;;  %v709_v25 = vmax.f32 %v645_v21, 0.0  ;;  %v530_v26 = vmul.f32 %v1018_v2, %v352_v22  ;;  %v546_v27 = vmul.f32 %v1018_v2, %v400_v23 }
  0xd9   :  { %758 = vst.msk [vmem:[%s1413_s4 + $0x140] sm:$0xff] %vm717_vm1, %v693_v24  ;;  %v598_v28 = vadd.f32 %v1023_v3, %v530_v26  ;;  %v614_v29 = vadd.f32 %v1023_v3, %v546_v27 }
  0xda   :  { %774 = vst.msk [vmem:[%s1413_s4 + $0x1c0] sm:$0xff] %vm717_vm1, %v709_v25  ;;  %v448_v30 = vpop.f32.mrf.mxu2  ;;  %v496_v31 = vpop.f32.mrf.mxu3 }
  0xdb   :  { %v662_v32 = vmax.f32 %v598_v28, 0.0  ;;  %v678_v33 = vmax.f32 %v614_v29, 0.0  ;;  %v562_v34 = vmul.f32 %v1018_v2, %v448_v30  ;;  %v578_v35 = vmul.f32 %v1018_v2, %v496_v31 }
  0xdd   :  { %727 = vst.msk [vmem:[%s1413_s4 + $0x48] sm:$0xff] %vm717_vm1, %v662_v32  ;;  %v630_v36 = vadd.f32 %v1023_v3, %v562_v34  ;;  %v646_v37 = vadd.f32 %v1023_v3, %v578_v35 }
  0xde   :  { %743 = vst.msk [vmem:[%s1413_s4 + $0xc8] sm:$0xff] %vm717_vm1, %v678_v33  ;;  %v355_v38 = vpop.f32.mrf.mxu0  ;;  %v403_v39 = vpop.f32.mrf.mxu1 }
  0xdf   :  { %v694_v40 = vmax.f32 %v630_v36, 0.0  ;;  %v710_v41 = vmax.f32 %v646_v37, 0.0  ;;  %v531_v42 = vmul.f32 %v1018_v2, %v355_v38  ;;  %v547_v43 = vmul.f32 %v1018_v2, %v403_v39 }
  0xe1   :  { %759 = vst.msk [vmem:[%s1413_s4 + $0x148] sm:$0xff] %vm717_vm1, %v694_v40  ;;  %v599_v44 = vadd.f32 %v1023_v3, %v531_v42  ;;  %v615_v45 = vadd.f32 %v1023_v3, %v547_v43 }
  0xe2   :  { %775 = vst.msk [vmem:[%s1413_s4 + $0x1c8] sm:$0xff] %vm717_vm1, %v710_v41  ;;  %v451_v46 = vpop.f32.mrf.mxu2  ;;  %v499_v47 = vpop.f32.mrf.mxu3 }
  0xe3   :  { %v663_v48 = vmax.f32 %v599_v44, 0.0  ;;  %v679_v49 = vmax.f32 %v615_v45, 0.0  ;;  %v563_v50 = vmul.f32 %v1018_v2, %v451_v46  ;;  %v579_v51 = vmul.f32 %v1018_v2, %v499_v47 }
  0xe5   :  { %728 = vst.msk [vmem:[%s1413_s4 + $0x50] sm:$0xff] %vm717_vm1, %v663_v48  ;;  %v631_v52 = vadd.f32 %v1023_v3, %v563_v50  ;;  %v647_v53 = vadd.f32 %v1023_v3, %v579_v51 }
  0xe6   :  { %744 = vst.msk [vmem:[%s1413_s4 + $0xd0] sm:$0xff] %vm717_vm1, %v679_v49  ;;  %v358_v54 = vpop.f32.mrf.mxu0  ;;  %v406_v55 = vpop.f32.mrf.mxu1 }
  0xe7   :  { %v695_v56 = vmax.f32 %v631_v52, 0.0  ;;  %v711_v57 = vmax.f32 %v647_v53, 0.0  ;;  %v532_v58 = vmul.f32 %v1018_v2, %v358_v54  ;;  %v548_v59 = vmul.f32 %v1018_v2, %v406_v55 }
  0xe9   :  { %760 = vst.msk [vmem:[%s1413_s4 + $0x150] sm:$0xff] %vm717_vm1, %v695_v56  ;;  %v600_v60 = vadd.f32 %v1023_v3, %v532_v58  ;;  %v616_v61 = vadd.f32 %v1023_v3, %v548_v59 }
  0xea   :  { %776 = vst.msk [vmem:[%s1413_s4 + $0x1d0] sm:$0xff] %vm717_vm1, %v711_v57  ;;  %v454_v62 = vpop.f32.mrf.mxu2  ;;  %v502_v63 = vpop.f32.mrf.mxu3 }
  0xeb   :  { %v664_v0 = vmax.f32 %v600_v60, 0.0  ;;  %v680_v1 = vmax.f32 %v616_v61, 0.0  ;;  %v564_v4 = vmul.f32 %v1018_v2, %v454_v62  ;;  %v580_v5 = vmul.f32 %v1018_v2, %v502_v63 }
  0xed   :  { %729 = vst.msk [vmem:[%s1413_s4 + $0x58] sm:$0xff] %vm717_vm1, %v664_v0  ;;  %v632_v6 = vadd.f32 %v1023_v3, %v564_v4  ;;  %v648_v7 = vadd.f32 %v1023_v3, %v580_v5 }
  0xee   :  { %745 = vst.msk [vmem:[%s1413_s4 + $0xd8] sm:$0xff] %vm717_vm1, %v680_v1  ;;  %v361_v8 = vpop.f32.mrf.mxu0  ;;  %v409_v9 = vpop.f32.mrf.mxu1 }
  0xef   :  { %v696_v10 = vmax.f32 %v632_v6, 0.0  ;;  %v712_v11 = vmax.f32 %v648_v7, 0.0  ;;  %v533_v12 = vmul.f32 %v1018_v2, %v361_v8  ;;  %v549_v13 = vmul.f32 %v1018_v2, %v409_v9 }
  0xf1   :  { %761 = vst.msk [vmem:[%s1413_s4 + $0x158] sm:$0xff] %vm717_vm1, %v696_v10  ;;  %v601_v14 = vadd.f32 %v1023_v3, %v533_v12  ;;  %v617_v15 = vadd.f32 %v1023_v3, %v549_v13 }
  0xf2   :  { %777 = vst.msk [vmem:[%s1413_s4 + $0x1d8] sm:$0xff] %vm717_vm1, %v712_v11  ;;  %v457_v16 = vpop.f32.mrf.mxu2  ;;  %v505_v17 = vpop.f32.mrf.mxu3 }
  0xf3   :  { %v665_v18 = vmax.f32 %v601_v14, 0.0  ;;  %v681_v19 = vmax.f32 %v617_v15, 0.0  ;;  %v565_v20 = vmul.f32 %v1018_v2, %v457_v16  ;;  %v581_v21 = vmul.f32 %v1018_v2, %v505_v17 }
  0xf5   :  { %730 = vst.msk [vmem:[%s1413_s4 + $0x60] sm:$0xff] %vm717_vm1, %v665_v18  ;;  %v633_v22 = vadd.f32 %v1023_v3, %v565_v20  ;;  %v649_v23 = vadd.f32 %v1023_v3, %v581_v21 }
  0xf6   :  { %746 = vst.msk [vmem:[%s1413_s4 + $0xe0] sm:$0xff] %vm717_vm1, %v681_v19  ;;  %v364_v24 = vpop.f32.mrf.mxu0  ;;  %v412_v25 = vpop.f32.mrf.mxu1 }
  0xf7   :  { %v697_v26 = vmax.f32 %v633_v22, 0.0  ;;  %v713_v27 = vmax.f32 %v649_v23, 0.0  ;;  %v534_v28 = vmul.f32 %v1018_v2, %v364_v24  ;;  %v550_v29 = vmul.f32 %v1018_v2, %v412_v25 }
  0xf9   :  { %762 = vst.msk [vmem:[%s1413_s4 + $0x160] sm:$0xff] %vm717_vm1, %v697_v26  ;;  %v602_v30 = vadd.f32 %v1023_v3, %v534_v28  ;;  %v618_v31 = vadd.f32 %v1023_v3, %v550_v29 }
  0xfa   :  { %778 = vst.msk [vmem:[%s1413_s4 + $0x1e0] sm:$0xff] %vm717_vm1, %v713_v27  ;;  %v460_v32 = vpop.f32.mrf.mxu2  ;;  %v508_v33 = vpop.f32.mrf.mxu3 }
  0xfb   :  { %v666_v34 = vmax.f32 %v602_v30, 0.0  ;;  %v682_v35 = vmax.f32 %v618_v31, 0.0  ;;  %v566_v36 = vmul.f32 %v1018_v2, %v460_v32  ;;  %v582_v37 = vmul.f32 %v1018_v2, %v508_v33 }
  0xfd   :  { %731 = vst.msk [vmem:[%s1413_s4 + $0x68] sm:$0xff] %vm717_vm1, %v666_v34  ;;  %v634_v38 = vadd.f32 %v1023_v3, %v566_v36  ;;  %v650_v39 = vadd.f32 %v1023_v3, %v582_v37 }
  0xfe   :  { %747 = vst.msk [vmem:[%s1413_s4 + $0xe8] sm:$0xff] %vm717_vm1, %v682_v35  ;;  %v367_v40 = vpop.f32.mrf.mxu0  ;;  %v415_v41 = vpop.f32.mrf.mxu1 }
  0xff   :  { %v698_v42 = vmax.f32 %v634_v38, 0.0  ;;  %v714_v43 = vmax.f32 %v650_v39, 0.0  ;;  %v535_v44 = vmul.f32 %v1018_v2, %v367_v40  ;;  %v551_v45 = vmul.f32 %v1018_v2, %v415_v41 }
 0x101   :  { %763 = vst.msk [vmem:[%s1413_s4 + $0x168] sm:$0xff] %vm717_vm1, %v698_v42  ;;  %v603_v46 = vadd.f32 %v1023_v3, %v535_v44  ;;  %v619_v47 = vadd.f32 %v1023_v3, %v551_v45 }
 0x102   :  { %779 = vst.msk [vmem:[%s1413_s4 + $0x1e8] sm:$0xff] %vm717_vm1, %v714_v43  ;;  %v463_v48 = vpop.f32.mrf.mxu2  ;;  %v511_v49 = vpop.f32.mrf.mxu3 }
 0x103   :  { %v667_v50 = vmax.f32 %v603_v46, 0.0  ;;  %v683_v51 = vmax.f32 %v619_v47, 0.0  ;;  %v567_v52 = vmul.f32 %v1018_v2, %v463_v48  ;;  %v583_v53 = vmul.f32 %v1018_v2, %v511_v49 }
 0x105   :  { %732 = vst.msk [vmem:[%s1413_s4 + $0x70] sm:$0xff] %vm717_vm1, %v667_v50  ;;  %v635_v54 = vadd.f32 %v1023_v3, %v567_v52  ;;  %v651_v55 = vadd.f32 %v1023_v3, %v583_v53 }
 0x106   :  { %748 = vst.msk [vmem:[%s1413_s4 + $0xf0] sm:$0xff] %vm717_vm1, %v683_v51  ;;  %v370_v56 = vpop.f32.mrf.mxu0  ;;  %v418_v57 = vpop.f32.mrf.mxu1 }
 0x107   :  { %v699_v58 = vmax.f32 %v635_v54, 0.0  ;;  %v715_v59 = vmax.f32 %v651_v55, 0.0  ;;  %v536_v60 = vmul.f32 %v1018_v2, %v370_v56  ;;  %v552_v61 = vmul.f32 %v1018_v2, %v418_v57 }
 0x109   :  { %764 = vst.msk [vmem:[%s1413_s4 + $0x170] sm:$0xff] %vm717_vm1, %v699_v58  ;;  %v604_v62 = vadd.f32 %v1023_v3, %v536_v60  ;;  %v620_v63 = vadd.f32 %v1023_v3, %v552_v61 }
 0x10a   :  { %780 = vst.msk [vmem:[%s1413_s4 + $0x1f0] sm:$0xff] %vm717_vm1, %v715_v59  ;;  %v466_v0 = vpop.f32.mrf.mxu2  ;;  %v514_v1 = vpop.f32.mrf.mxu3 }
 0x10b   :  { %v668_v4 = vmax.f32 %v604_v62, 0.0  ;;  %v684_v5 = vmax.f32 %v620_v63, 0.0  ;;  %v568_v6 = vmul.f32 %v1018_v2, %v466_v0  ;;  %v584_v7 = vmul.f32 %v1018_v2, %v514_v1 }
 0x10d   :  { %733 = vst.msk [vmem:[%s1413_s4 + $0x78] sm:$0xff] %vm717_vm1, %v668_v4  ;;  %v636_v8 = vadd.f32 %v1023_v3, %v568_v6  ;;  %v652_v9 = vadd.f32 %v1023_v3, %v584_v7 }
 0x10e   :  { %749 = vst.msk [vmem:[%s1413_s4 + $0xf8] sm:$0xff] %vm717_vm1, %v684_v5 }
 0x10f   :  { %v700_v10 = vmax.f32 %v636_v8, 0.0  ;;  %v716_v11 = vmax.f32 %v652_v9, 0.0 }
 0x111   :  { %765 = vst.msk [vmem:[%s1413_s4 + $0x178] sm:$0xff] %vm717_vm1, %v700_v10 }
 0x112   :  { %781 = vst.msk [vmem:[%s1413_s4 + $0x1f8] sm:$0xff] %vm717_vm1, %v716_v11 }
 0x113   :  { %786 = vsyncpa [#allocation3], 1 }
 0x114   :  { %787 = vsyncpa [#allocation5], 1 }

// kernel: residual_block_forward.4
= control target key start
LH: loop header
LB: loop body
LE: loop exit
PB: predicated region body
PF: predicated region fallthrough
CT: control target
= control target key end

     0   :  { %s1679_s21 = smov 0   ;;  %s1681_s22 = smov 0   ;;  %s2615_s0 = inlined_call_operand.vmem [shape: f32[2,6,10,10,8], index: 0, kind: input, shape index: {}, may-alias: {0,1,2}]   ;;  %s2616_s1 = inlined_call_operand.vmem [shape: f32[2,6,10,10,8], index: 1, kind: input, shape index: {}, may-alias: {0,1,2}]   ;;  %s2617_s2 = inlined_call_operand.vmem [shape: f32[2,6,10,10,8], index: 2, kind: input, shape index: {}, may-alias: {0,1,2}]   ;;  %s2618_s3 = inlined_call_operand.vmem [shape: f32[3,72,8], index: 3, kind: input, shape index: {}]   ;;  %s2619_s4 = inlined_call_operand.vmem [shape: f32[1,8], index: 4, kind: input, shape index: {}]   ;;  %s2620_s5 = inlined_call_operand.vmem [shape: f32[1,8], index: 5, kind: input, shape index: {}]   ;;  %s2621_s6 = inlined_call_operand.vmem [shape: f32[2,4,64,8], index: 6, kind: output, shape index: {}]  }
   0x1   :  { %s1683_s23 = smov 0   ;;  %s1685_s24 = smov 0  }
   0x2   :  { %s1687_s25 = smov 0  }
   0x3 LB: > { %s25_s26 = sadd.s32 1, %s1626_s23  ;;  %s28_s27 = sadd.s32 1, %s1630_s24  ;;  %s1634_s25 = sphi %s1687_s25, %s16_s25   ;;  %s1630_s24 = sphi %s1685_s24, %s2625_s24   ;;  %s1626_s23 = sphi %s1683_s23, %s2624_s23   ;;  %s1622_s22 = sphi %s1681_s22, %s2623_s22   ;;  %s1618_s21 = sphi %s1679_s21, %s2622_s21  }
   0x4   : > { %p26_p0 = scmp.ge.s32.totalorder %s25_s26, 4  ;;  %p1464_p1 = scmp.ge.s32.totalorder %s1634_s25, 1 }
   0x5   : > { %p272_p2 = scmp.lt.s32.totalorder %s1634_s25, 9 }
   0x6   : > { %s2627_s26 = smov (%p26_p0, %s25_s26), 0  ;;  %s2629_s27 = smov (!%p26_p0, %s28_s27), %s1630_s24 }
   0x7   : > { %p273_p3 = pnand %p1464_p1, %p272_p2  ;;  %p30_p4 = scmp.ge.s32.totalorder %s2629_s27, 2 }
   0x8   : > { %p330_p5 = scmp.lt.s32.totalorder (!%p273_p3), %s1622_s22, 1  ;;  %p332_p6 = scmp.lt.s32.totalorder (!%p273_p3), %s1618_s21, 5 }
   0x9   : > { %s2631_s27 = smov (%p30_p4, %s2629_s27), 0  ;;  %276 = sbr.rel (%p273_p3) target bundleno = 629 (0x275), region = 44 }
   0xa   : > { %s1636_s12 = smov (!%p273_p3), 8   ;;  %s1637_s13 = smov (!%p273_p3), 16  }
   0xb   : > { %s339_s14 = sadd.s32 (!%p273_p3), 1, %s1618_s21  ;;  %s1639_s10 = smov (!%p273_p3), 40  }
   0xc   : > { %p342_p7 = scmp.lt.s32.totalorder (!%p273_p3), %s339_s14, 5  ;;  %p363_p9 = scmp.lt.s32.totalorder (!%p273_p3), %s1618_s21, 3 }
   0xe   : > { %s2633_s22 = smov (!%p330_p5, %s1622_s22), 1  ;;  %s2635_s14 = smov (!%p342_p7, %s339_s14), 5  ;;  %vm889_vm0 = vcmask 130048   ;;  %vm872_vm1 = vcmask 64512   ;;  %vm906_vm2 = vcmask 195584   ;;  %vm923_vm3 = vcmask 261120  }
   0xf   : > { %s333_s28 = scalar_select %p332_p6, %s1618_s21, 5  ;;  %vm940_vm4 = vcmask 326656   ;;  %vm957_vm5 = vcmask 392192   ;;  %vm974_vm6 = vcmask 457728   ;;  %vm991_vm7 = vcmask 523264  }
  0x10   : > { %s1716_s29 = smul.u32 120, %s2633_s22  ;;  %vm1068_vm8 = vcmask 588800   ;;  %vm1033_vm9 = vcmask 1046528   ;;  %vm1183_vm10 = vcmask 1045504  }
  0x11   : > { %s1542_s30 = smul.u32 20, %s333_s28  ;;  %s1638_s28 = smov 24  }
  0x12   : > { %s1544_s15 = smul.u32 20, %s2635_s14 }
  0x13   : > { %s336_s7 = sadd.s32 %s1716_s29, %s1542_s30  ;;  %s350_s30 = sadd.s32 2, %s1618_s21 }
  0x14   : > { %s1465_s8 = sshll.u32 %s336_s7, 3  ;;  %s346_s16 = sadd.s32 %s1544_s15, %s1716_s29 }
  0x15   : > { %s1722_s11 = scalar_lea.vmem %s2615_s0, %s1465_s8  ;;  %s1466_s17 = sshll.u32 %s346_s16, 3 }
  0x16   : > { %v1725_v0 = vld [vmem:[%s1722_s11 + $0x30] sm:$0xff]  ;;  %v1728_v1 = vld [vmem:[%s1722_s11 + $0x20] sm:$0xff]  ;;  %v1740_v3 = vld [vmem:[%s1722_s11 + $0x38] sm:$0x3]  ;;  %s1815_s20 = scalar_lea.vmem %s2616_s1, %s1466_s17  ;;  %p353_p8 = scmp.lt.s32.totalorder %s350_s30, 5 }
  0x17   : > { %v1731_v2 = vld [vmem:[%s1722_s11 + $0x10] sm:$0xff]  ;;  %454 = vrot.lane.b32.xlu2 %v1725_v0, %s1636_s12  ;;  %450 = vrot.lane.b32.xlu1 %v1728_v1, %s1636_s12  ;;  %v1743_v4 = vld [vmem:[%s1722_s11 + $0x28] sm:$0x3]  ;;  %s1641_s15 = smov 48   ;;  %s1642_s16 = smov 64  }
  0x18   : > { %446 = vrot.lane.b32.xlu0 %v1731_v2, %s1636_s12  ;;  %v1746_v5 = vld [vmem:[%s1722_s11 + $0x18] sm:$0x3]  ;;  %v1755_v6 = vld [vmem:[%s1722_s11 + $0x50] sm:$0xff]  ;;  %v1758_v7 = vld [vmem:[%s1722_s11 + $0x48] sm:$0x3]  ;;  %s2637_s30 = smov (!%p353_p8, %s350_s30), 5 }
  0x19   : > { %v1761_v8 = vld [vmem:[%s1722_s11 + $0x40] sm:$0xff]  ;;  %v1770_v9 = vld [vmem:[%s1722_s11 + $0x68] sm:$0x3]  ;;  %v1776_v11 = vld [vmem:[%s1722_s11 + $0x58] sm:$0x3]  ;;  %s1545_s7 = smul.u32 20, %s2637_s30 }
  0x1a   : > { %v1773_v10 = vld [vmem:[%s1722_s11 + $0x60] sm:$0xff]  ;;  %v1786_v13 = vld [vmem:[%s1722_s11 + $0x78] sm:$0x3]  ;;  %v1789_v14 = vld [vmem:[%s1722_s11 + $0x70] sm:$0xff]  ;;  %s1643_s17 = smov 56   ;;  %s2639_s21 = smov (!%p363_p9, %s1618_s21), 3 }
  0x1b   : > { %v386_v12 = vld [vmem:[%s1722_s11 + $0x80] sm:$0xff]  ;;  %v387_v15 = vld [vmem:[%s1722_s11 + $0x88] sm:$0x3]  ;;  %v389_v17 = vld [vmem:[%s1722_s11 + $0x98] sm:$0x3]  ;;  %s357_s8 = sadd.s32 %s1545_s7, %s1716_s29 }
  0x1c   : > { %v390_v16 = vld [vmem:[%s1815_s20] sm:$0xff]  ;;  %v388_v18 = vld [vmem:[%s1722_s11 + $0x90] sm:$0xff]  ;;  %v393_v19 = vld [vmem:[%s1815_s20 + $0x18] sm:$0x3]  ;;  %s1467_s9 = sshll.u32 %s357_s8, 3 }
  0x1d   : > { %v392_v20 = vld [vmem:[%s1815_s20 + $0x10] sm:$0xff]  ;;  %v391_v21 = vld [vmem:[%s1815_s20 + $0x8] sm:$0x3]  ;;  %v1834_v25 = vld [vmem:[%s1815_s20 + $0x20] sm:$0xff]  ;;  %s1908_s29 = scalar_lea.vmem %s2617_s2, %s1467_s9 }
  0x1e   : > { %v1828_v23 = vld [vmem:[%s1815_s20 + $0x30] sm:$0xff]  ;;  %v1831_v24 = vld [vmem:[%s1815_s20 + $0x28] sm:$0x3]  ;;  %v1848_v28 = vld [vmem:[%s1815_s20 + $0x40] sm:$0xff] }
  0x1f   : > { %456 = vrot.lane.b32.xlu2 %v1740_v3, %s1636_s12  ;;  %452 = vrot.lane.b32.xlu1 %v1743_v4, %s1636_s12  ;;  %v1845_v27 = vld [vmem:[%s1815_s20 + $0x48] sm:$0x3]  ;;  %v1851_v29 = vld [vmem:[%s1815_s20 + $0x38] sm:$0x3] }
  0x20   : > { %448 = vrot.lane.b32.xlu0 %v1746_v5, %s1636_s12  ;;  %v1862_v31 = vld [vmem:[%s1815_s20 + $0x60] sm:$0xff]  ;;  %v1865_v32 = vld [vmem:[%s1815_s20 + $0x58] sm:$0x3]  ;;  %v1869_v33 = vld [vmem:[%s1815_s20 + $0x50] sm:$0xff] }
  0x21   : > { %v1882_v37 = vld [vmem:[%s1815_s20 + $0x78] sm:$0x3]  ;;  %v1885_v38 = vld [vmem:[%s1815_s20 + $0x70] sm:$0xff]  ;;  %v1888_v39 = vld [vmem:[%s1815_s20 + $0x68] sm:$0x3] }
  0x22   : > { %v371_v43 = vld [vmem:[%s1722_s11 + $0x8] sm:$0x3]  ;;  %v410_v50 = vld [vmem:[%s1908_s29] sm:$0xff]  ;;  %v413_v57 = vld [vmem:[%s1908_s29 + $0x18] sm:$0x3] }
  0x23   : > { %v411_v49 = vld [vmem:[%s1908_s29 + $0x8] sm:$0x3]  ;;  %v1925_v56 = vld [vmem:[%s1908_s29 + $0x20] sm:$0xff]  ;;  %v412_v58 = vld [vmem:[%s1908_s29 + $0x10] sm:$0xff] }
  0x27   : > { %462 = vrot.lane.b32.xlu2 %v1755_v6, %s1636_s12  ;;  %460 = vrot.lane.b32.xlu1 %v1758_v7, %s1636_s12 }
  0x28   : > { %458 = vrot.lane.b32.xlu0 %v1761_v8, %s1636_s12 }
  0x2f   : > { %468 = vrot.lane.b32.xlu2 %v1770_v9, %s1636_s12  ;;  %466 = vrot.lane.b32.xlu1 %v1773_v10, %s1636_s12 }
  0x30   : > { %464 = vrot.lane.b32.xlu0 %v1776_v11, %s1636_s12 }
  0x37   : > { %474 = vrot.lane.b32.xlu2 %v386_v12, %s1636_s12  ;;  %472 = vrot.lane.b32.xlu1 %v1786_v13, %s1636_s12 }
  0x38   : > { %470 = vrot.lane.b32.xlu0 %v1789_v14, %s1636_s12 }
  0x3f   : > { %498 = vrot.lane.b32.xlu2 %v1743_v4, %s1637_s13  ;;  %496 = vrot.lane.b32.xlu1 %v1728_v1, %s1637_s13 }
  0x40   : > { %476 = vrot.lane.b32.xlu0 %v387_v15, %s1636_s12  ;;  %s1640_s12 = smov 32  }
  0x47   : > { %504 = vrot.lane.b32.xlu2 %v1761_v8, %s1637_s13  ;;  %502 = vrot.lane.b32.xlu1 %v1740_v3, %s1637_s13 }
  0x48   : > { %500 = vrot.lane.b32.xlu0 %v1725_v0, %s1637_s13 }
  0x4f   : > { %510 = vrot.lane.b32.xlu2 %v1776_v11, %s1637_s13  ;;  %508 = vrot.lane.b32.xlu1 %v1755_v6, %s1637_s13 }
  0x50   : > { %506 = vrot.lane.b32.xlu0 %v1758_v7, %s1637_s13 }
  0x57   : > { %516 = vrot.lane.b32.xlu2 %v1789_v14, %s1637_s13  ;;  %514 = vrot.lane.b32.xlu1 %v1770_v9, %s1637_s13 }
  0x58   : > { %512 = vrot.lane.b32.xlu0 %v1773_v10, %s1637_s13 }
  0x5f   : > { %522 = vrot.lane.b32.xlu2 %v387_v15, %s1637_s13  ;;  %520 = vrot.lane.b32.xlu1 %v386_v12, %s1637_s13  ;;  %v370_v12 = vld [vmem:[%s1722_s11] sm:$0xff] }
  0x60   : > { %518 = vrot.lane.b32.xlu0 %v1786_v13, %s1637_s13 }
  0x67   : > { %560 = vrot.lane.b32.xlu2 %v390_v16, %s1638_s28  ;;  %526 = vrot.lane.b32.xlu1 %v389_v17, %s1637_s13 }
  0x68   : > { %524 = vrot.lane.b32.xlu0 %v388_v18, %s1637_s13 }
  0x6f   : > { %566 = vrot.lane.b32.xlu2 %v393_v19, %s1638_s28  ;;  %564 = vrot.lane.b32.xlu1 %v392_v20, %s1638_s28 }
  0x70   : > { %562 = vrot.lane.b32.xlu0 %v391_v21, %s1638_s28 }
  0x71   : > { %v455_v22 = vpop.permute.xlu2 %454 }
  0x72   : > { %v877_v51 = vsel %vm872_vm1, %v1728_v1, %v455_v22  ;;  %v1939_v1 = vld [vmem:[%s1908_s29 + $0x28] sm:$0x3] }
  0x77   : > { %572 = vrot.lane.b32.xlu2 %v1828_v23, %s1638_s28  ;;  %570 = vrot.lane.b32.xlu1 %v1831_v24, %s1638_s28 }
  0x78   : > { %568 = vrot.lane.b32.xlu0 %v1834_v25, %s1638_s28 }
  0x79   : > { %v1842_v26 = vpop.permute.xlu2 %456 }
  0x7f   : > { %578 = vrot.lane.b32.xlu2 %v1845_v27, %s1638_s28  ;;  %576 = vrot.lane.b32.xlu1 %v1848_v28, %s1638_s28 }
  0x80   : > { %574 = vrot.lane.b32.xlu0 %v1851_v29, %s1638_s28 }
  0x81   : > { %v1859_v30 = vpop.permute.xlu2 %462 }
  0x87   : > { %584 = vrot.lane.b32.xlu2 %v1862_v31, %s1638_s28  ;;  %582 = vrot.lane.b32.xlu1 %v1865_v32, %s1638_s28 }
  0x88   : > { %580 = vrot.lane.b32.xlu0 %v1869_v33, %s1638_s28 }
  0x89   : > { %v1877_v34 = vpop.permute.xlu2 %468  ;;  %v1879_v35 = vpop.permute.xlu1 %450 }
  0x8a   : > { %v447_v36 = vpop.permute.xlu0 %446 }
  0x8f   : > { %590 = vrot.lane.b32.xlu2 %v1882_v37, %s1638_s28  ;;  %588 = vrot.lane.b32.xlu1 %v1885_v38, %s1638_s28 }
  0x90   : > { %586 = vrot.lane.b32.xlu0 %v1888_v39, %s1638_s28 }
  0x91   : > { %v1896_v40 = vpop.permute.xlu2 %474  ;;  %v453_v41 = vpop.permute.xlu1 %452 }
  0x92   : > { %v449_v42 = vpop.permute.xlu0 %448  ;;  %v876_v21 = vsel %vm872_vm1, %v1746_v5, %v453_v41 }
  0x93   : > { %v874_v44 = vsel %vm872_vm1, %v371_v43, %v449_v42 }
  0x97   : > { %660 = vrot.lane.b32.xlu2 %v1834_v25, %s1639_s10  ;;  %612 = vrot.lane.b32.xlu1 %v393_v19, %s1640_s12 }
  0x98   : > { %610 = vrot.lane.b32.xlu0 %v392_v20, %s1640_s12 }
  0x99   : > { %v499_v45 = vpop.permute.xlu2 %498  ;;  %v461_v46 = vpop.permute.xlu1 %460 }
  0x9a   : > { %v1911_v47 = vsel %vm889_vm0, %v874_v44, %v499_v45  ;;  %v459_v48 = vpop.permute.xlu0 %458  ;;  %v880_v59 = vsel %vm872_vm1, %v1740_v3, %v461_v46  ;;  %v873_v3 = vsel %vm872_vm1, %v370_v12, %v447_v36 }
  0x9f   : > { %726 = vrot.lane.b32.xlu2 %v411_v49, %s1641_s15  ;;  %724 = vrot.lane.b32.xlu1 %v410_v50, %s1641_s15  ;;  %v1988_v50 = vld [vmem:[%s1908_s29 + $0x38] sm:$0x3] }
  0xa0   : > { %662 = vrot.lane.b32.xlu0 %v1831_v24, %s1639_s10 }
  0xa1   : > { %v505_v52 = vpop.permute.xlu2 %504  ;;  %v467_v53 = vpop.permute.xlu1 %466 }
  0xa2   : > { %v1922_v54 = vsel %vm889_vm0, %v877_v51, %v505_v52  ;;  %v465_v55 = vpop.permute.xlu0 %464  ;;  %v883_v15 = vsel %vm872_vm1, %v1755_v6, %v467_v53  ;;  %v1991_v51 = vld [vmem:[%s1908_s29 + $0x30] sm:$0xff] }
  0xa7   : > { %824 = vrot.lane.b32.xlu2 %v1925_v56, %s1642_s16  ;;  %776 = vrot.lane.b32.xlu1 %v413_v57, %s1643_s17 }
  0xa8   : > { %774 = vrot.lane.b32.xlu0 %v412_v58, %s1643_s17 }
  0xa9   : > { %v511_v60 = vpop.permute.xlu2 %510  ;;  %v473_v61 = vpop.permute.xlu1 %472 }
  0xaa   : > { %v1936_v62 = vsel %vm889_vm0, %v880_v59, %v511_v60  ;;  %v471_v63 = vpop.permute.xlu0 %470  ;;  %v886_v6 = vsel %vm872_vm1, %v1770_v9, %v473_v61 }
  0xaf   : > { %616 = vrot.lane.b32.xlu2 %v1831_v24, %s1640_s12  ;;  %614 = vrot.lane.b32.xlu1 %v1834_v25, %s1640_s12  ;;  %v875_v25 = vsel %vm872_vm1, %v1731_v2, %v1879_v35  ;;  %v879_v2 = vsel %vm872_vm1, %v1725_v0, %v459_v48  ;;  %v878_v35 = vsel %vm872_vm1, %v1743_v4, %v1842_v26 }
  0xb0   : > { %826 = vrot.lane.b32.xlu0 %v1939_v1, %s1642_s16  ;;  %v882_v0 = vsel %vm872_vm1, %v1758_v7, %v465_v55  ;;  %v881_v48 = vsel %vm872_vm1, %v1761_v8, %v1859_v30  ;;  %v885_v7 = vsel %vm872_vm1, %v1773_v10, %v471_v63  ;;  %v884_v55 = vsel %vm872_vm1, %v1776_v11, %v1877_v34 }
  0xb1   : > { %v517_v16 = vpop.permute.xlu2 %516  ;;  %v497_v17 = vpop.permute.xlu1 %496  ;;  %v887_v63 = vsel %vm872_vm1, %v1789_v14, %v1896_v40 }
  0xb2   : > { %v1952_v18 = vsel %vm889_vm0, %v883_v15, %v517_v16  ;;  %v890_v19 = vsel %vm889_vm0, %v873_v3, %v497_v17  ;;  %v477_v20 = vpop.permute.xlu0 %476  ;;  %v2049_v17 = vld [vmem:[%s1815_s20 + $0x88] sm:$0x3] }
  0xb3   : > { %v888_v10 = vsel %vm872_vm1, %v1786_v13, %v477_v20 }
  0xb7   : > { %728 = vrot.lane.b32.xlu2 %v412_v58, %s1641_s15  ;;  %666 = vrot.lane.b32.xlu1 %v1851_v29, %s1639_s10 }
  0xb8   : > { %664 = vrot.lane.b32.xlu0 %v1828_v23, %s1639_s10 }
  0xb9   : > { %v523_v22 = vpop.permute.xlu2 %522  ;;  %v503_v24 = vpop.permute.xlu1 %502 }
  0xba   : > { %v1968_v36 = vsel %vm889_vm0, %v886_v6, %v523_v22  ;;  %v893_v42 = vsel %vm889_vm0, %v876_v21, %v503_v24  ;;  %v501_v43 = vpop.permute.xlu0 %500  ;;  %v2066_v21 = vld [vmem:[%s1908_s29 + $0x68] sm:$0x3] }
  0xbb   : > { %v892_v44 = vsel %vm889_vm0, %v875_v25, %v501_v43  ;;  %v2090_v43 = vld [vmem:[%s2618_s3 + $0x40] sm:$0xff] }
  0xbc   : > { %1149 = vmatpush.msra.mxu1 %v2090_v43 }
  0xbf   : > { %780 = vrot.lane.b32.xlu2 %v1939_v1, %s1643_s17  ;;  %778 = vrot.lane.b32.xlu1 %v1925_v56, %s1643_s17 }
  0xc0   : > { %730 = vrot.lane.b32.xlu0 %v413_v57, %s1641_s15 }
  0xc1   : > { %v561_v5 = vpop.permute.xlu2 %560  ;;  %v509_v9 = vpop.permute.xlu1 %508 }
  0xc2   : > { %v1983_v41 = vsel %vm906_vm2, %v890_v19, %v561_v5  ;;  %v896_v45 = vsel %vm889_vm0, %v879_v2, %v509_v9  ;;  %v507_v46 = vpop.permute.xlu0 %506  ;;  %v2098_v2 = vld [vmem:[%s1908_s29 + $0x78] sm:$0x3]  ;;  %v2101_v5 = vld [vmem:[%s1908_s29 + $0x70] sm:$0xff]  ;;  %v2120_v9 = vld [vmem:[%s2618_s3 + $0x28] sm:$0xff] }
  0xc3   : > { %v895_v49 = vsel %vm889_vm0, %v878_v35, %v507_v46 }
  0xc7   : > { %618 = vrot.lane.b32.xlu2 %v1828_v23, %s1640_s12  ;;  %830 = vrot.lane.b32.xlu1 %v1988_v50, %s1642_s16 }
  0xc8   : > { %828 = vrot.lane.b32.xlu0 %v1991_v51, %s1642_s16 }
  0xc9   : > { %v567_v4 = vpop.permute.xlu2 %566  ;;  %v515_v26 = vpop.permute.xlu1 %514 }
  0xca   : > { %v2005_v52 = vsel %vm906_vm2, %v893_v42, %v567_v4  ;;  %v899_v23 = vsel %vm889_vm0, %v882_v0, %v515_v26  ;;  %v513_v53 = vpop.permute.xlu0 %512  ;;  %v2128_v0 = vld [vmem:[%s1908_s29 + $0x80] sm:$0xff] }
  0xcb   : > { %v898_v57 = vsel %vm889_vm0, %v881_v48, %v513_v53  ;;  %v2138_v26 = vld [vmem:[%s2618_s3 + $0x20] sm:$0xff]  ;;  %v1479_v48 = vld [vmem:[%s2618_s3 + $0x88] sm:$0xff] }
  0xcc   : > { %v2149_v53 = vld [vmem:[%s1908_s29 + $0x48] sm:$0x3]  ;;  %1092 = vmatpush.msra.mxu0 %v1479_v48  ;;  %1515 = vmatpush.msra.mxu3 %v1479_v48 }
  0xcf   : > { %636 = vrot.lane.b32.xlu2 %v1882_v37, %s1640_s12  ;;  %634 = vrot.lane.b32.xlu1 %v1885_v38, %s1640_s12 }
  0xd0   : > { %620 = vrot.lane.b32.xlu0 %v1851_v29, %s1640_s12  ;;  %v2028_v29 = vld [vmem:[%s1815_s20 + $0x80] sm:$0xff] }
  0xd1   : > { %v573_v8 = vpop.permute.xlu2 %572  ;;  %v521_v30 = vpop.permute.xlu1 %520 }
  0xd2   : > { %v2021_v58 = vsel %vm906_vm2, %v896_v45, %v573_v8  ;;  %v902_v59 = vsel %vm889_vm0, %v885_v7, %v521_v30  ;;  %v519_v60 = vpop.permute.xlu0 %518  ;;  %v2161_v7 = vld [vmem:[%s1908_s29 + $0x40] sm:$0xff]  ;;  %v2167_v8 = vld [vmem:[%s2618_s3 + $0x10] sm:$0xff]  ;;  %v2173_v30 = vld [vmem:[%s2618_s3 + $0xc8] sm:$0xff] }
  0xd3   : > { %v2025_v61 = vsel %vm889_vm0, %v884_v55, %v519_v60  ;;  %v1477_v55 = vld [vmem:[%s2618_s3 + $0x78] sm:$0xff]  ;;  %v2193_v60 = vld [vmem:[%s2618_s3 + $0xc0] sm:$0xff] }
  0xd7   : > { %684 = vrot.lane.b32.xlu2 %v2028_v29, %s1639_s10  ;;  %670 = vrot.lane.b32.xlu1 %v1845_v27, %s1639_s10 }
  0xd8   : > { %668 = vrot.lane.b32.xlu0 %v1848_v28, %s1639_s10 }
  0xd9   : > { %v579_v11 = vpop.permute.xlu2 %578  ;;  %v527_v34 = vpop.permute.xlu1 %526 }
  0xda   : > { %v2042_v12 = vsel %vm906_vm2, %v899_v23, %v579_v11  ;;  %v905_v3 = vsel %vm889_vm0, %v888_v10, %v527_v34  ;;  %v525_v15 = vpop.permute.xlu0 %524  ;;  %v2146_v23 = vld [vmem:[%s2618_s3 + $0x18] sm:$0xff] }
  0xdb   : > { %v2046_v16 = vsel %vm889_vm0, %v887_v63, %v525_v15  ;;  %v1476_v15 = vld [vmem:[%s2618_s3 + $0x70] sm:$0xff] }
  0xdf   : > { %734 = vrot.lane.b32.xlu2 %v1939_v1, %s1641_s15  ;;  %732 = vrot.lane.b32.xlu1 %v1925_v56, %s1641_s15  ;;  %v2069_v1 = vld [vmem:[%s1908_s29 + $0x60] sm:$0xff] }
  0xe0   : > { %686 = vrot.lane.b32.xlu0 %v2049_v17, %s1639_s10 }
  0xe1   : > { %v585_v13 = vpop.permute.xlu2 %584  ;;  %v565_v14 = vpop.permute.xlu1 %564 }
  0xe2   : > { %v2058_v40 = vsel %vm906_vm2, %v902_v59, %v585_v13  ;;  %v2061_v19 = vsel %vm906_vm2, %v892_v44, %v565_v14  ;;  %v2063_v20 = vpop.permute.xlu0 %562  ;;  %v2095_v44 = vld [vmem:[%s2618_s3 + $0x38] sm:$0xff]  ;;  %v2188_v59 = vld [vmem:[%s2618_s3 + $0x8] sm:$0xff]  ;;  %v2214_v13 = vld [vmem:[%s2618_s3] sm:$0xff] }
  0xe3   : > { %1150 = vmatpush.msra.mxu1 %v2095_v44  ;;  %v1475_v14 = vld [vmem:[%s2618_s3 + $0x68] sm:$0xff] }
  0xe7   : > { %782 = vrot.lane.b32.xlu2 %v1991_v51, %s1643_s17  ;;  %750 = vrot.lane.b32.xlu1 %v2066_v21, %s1641_s15 }
  0xe8   : > { %748 = vrot.lane.b32.xlu0 %v2069_v1, %s1641_s15 }
  0xe9   : > { %v591_v56 = vpop.permute.xlu2 %590  ;;  %v571_v6 = vpop.permute.xlu1 %570 }
  0xea   : > { %v2078_v22 = vsel %vm906_vm2, %v905_v3, %v591_v56  ;;  %v2081_v24 = vsel %vm906_vm2, %v895_v49, %v571_v6  ;;  %v569_v25 = vpop.permute.xlu0 %568  ;;  %v2232_v56 = vld [vmem:[%s2618_s3 + $0xb0] sm:$0xff]  ;;  %v1474_v6 = vld [vmem:[%s2618_s3 + $0x60] sm:$0xff] }
  0xeb   : > { %v2085_v42 = vsel %vm906_vm2, %v1922_v54, %v569_v25  ;;  %v2107_v54 = vld [vmem:[%s2618_s3 + $0x30] sm:$0xff]  ;;  %v2244_v25 = vld [vmem:[%s2618_s3 + $0xa8] sm:$0xff] }
  0xec   : > { %1151 = vmatpush.msra.mxu1 %v2107_v54 }
  0xee   : > { %1152 = vmatpush.msra.mxu1 %v2120_v9 }
  0xef   : > { %800 = vrot.lane.b32.xlu2 %v2098_v2, %s1643_s17  ;;  %798 = vrot.lane.b32.xlu1 %v2101_v5, %s1643_s17 }
  0xf0   : > { %784 = vrot.lane.b32.xlu0 %v1988_v50, %s1643_s17  ;;  %1153 = vmatpush.msra.mxu1 %v2138_v26 }
  0xf1   : > { %v2122_v35 = vpop.permute.xlu2 %660  ;;  %v577_v45 = vpop.permute.xlu1 %576 }
  0xf2   : > { %v2125_v46 = vsel %vm906_vm2, %v898_v57, %v577_v45  ;;  %v575_v49 = vpop.permute.xlu0 %574  ;;  %v1478_v57 = vld [vmem:[%s2618_s3 + $0x80] sm:$0xff]  ;;  %1154 = vmatpush.msra.mxu1 %v2146_v23  ;;  %v1473_v45 = vld [vmem:[%s2618_s3 + $0x58] sm:$0xff] }
  0xf3   : > { %v2133_v4 = vsel %vm906_vm2, %v1936_v62, %v575_v49  ;;  %v2155_v62 = vld [vmem:[%s2618_s3 + $0xd0] sm:$0xff]  ;;  %1093 = vmatpush.msra.mxu0 %v1478_v57  ;;  %1516 = vmatpush.msra.mxu3 %v1478_v57 }
  0xf4   : > { %1241 = vmatpush.msra.mxu2 %v2155_v62  ;;  %1155 = vmatpush.msra.mxu1 %v2167_v8 }
  0xf5   : > { %1094 = vmatpush.msra.mxu0 %v1477_v55  ;;  %1517 = vmatpush.msra.mxu3 %v1477_v55 }
  0xf6   : > { %1242 = vmatpush.msra.mxu2 %v2173_v30  ;;  %1156 = vmatpush.msra.mxu1 %v2188_v59 }
  0xf7   : > { %848 = vrot.lane.b32.xlu2 %v2128_v0, %s1642_s16  ;;  %834 = vrot.lane.b32.xlu1 %v2149_v53, %s1642_s16 }
  0xf8   : > { %832 = vrot.lane.b32.xlu0 %v2161_v7, %s1642_s16  ;;  %1243 = vmatpush.msra.mxu2 %v2193_v60 }
  0xf9   : > { %v2195_v10 = vpop.permute.xlu2 %726  ;;  %v583_v11 = vpop.permute.xlu1 %582  ;;  %1095 = vmatpush.msra.mxu0 %v1476_v15  ;;  %1157 = vmatpush.msra.mxu1 %v2214_v13 }
  0xfa   : > { %v2200_v34 = vsel %vm906_vm2, %v2025_v61, %v583_v11  ;;  %v581_v63 = vpop.permute.xlu0 %580  ;;  %v2219_v61 = vld [vmem:[%s2618_s3 + $0xb8] sm:$0xff]  ;;  %1518 = vmatpush.msra.mxu3 %v1476_v15  ;;  %v1472_v11 = vld [vmem:[%s2618_s3 + $0x50] sm:$0xff] }
  0xfb   : > { %v2205_v3 = vsel %vm906_vm2, %v1952_v18, %v581_v63  ;;  %v2223_v18 = vld [vmem:[%s1908_s29 + $0x88] sm:$0x3]  ;;  %1244 = vmatpush.msra.mxu2 %v2219_v61  ;;  %1096 = vmatpush.msra.mxu0 %v1475_v14  ;;  %v2274_v63 = vld [vmem:[%s2618_s3 + $0x98] sm:$0xff] }
  0xfc   : > { %1519 = vmatpush.msra.mxu3 %v1475_v14 }
  0xfd   : > { %1245 = vmatpush.msra.mxu2 %v2232_v56  ;;  %1097 = vmatpush.msra.mxu0 %v1474_v6 }
  0xfe   : > { %1520 = vmatpush.msra.mxu3 %v1474_v6 }
  0xff   : > { %624 = vrot.lane.b32.xlu2 %v1845_v27, %s1640_s12  ;;  %622 = vrot.lane.b32.xlu1 %v1848_v28, %s1640_s12  ;;  %v2257_v28 = vld [vmem:[%s2618_s3 + $0xa0] sm:$0xff] }
 0x100   : > { %850 = vrot.lane.b32.xlu0 %v2223_v18, %s1642_s16  ;;  %1246 = vmatpush.msra.mxu2 %v2244_v25 }
 0x101   : > { %v2252_v49 = vpop.permute.xlu2 %824  ;;  %v589_v27 = vpop.permute.xlu1 %588  ;;  %1098 = vmatpush.msra.mxu0 %v1473_v45  ;;  %1521 = vmatpush.msra.mxu3 %v1473_v45 }
 0x102   : > { %v2261_v48 = vsel %vm906_vm2, %v2046_v16, %v589_v27  ;;  %v587_v57 = vpop.permute.xlu0 %586  ;;  %1247 = vmatpush.msra.mxu2 %v2257_v28  ;;  %v2284_v16 = vld [vmem:[%s2618_s3 + $0x90] sm:$0xff]  ;;  %v409_v27 = vld [vmem:[%s1815_s20 + $0x98] sm:$0x3] }
 0x103   : > { %v2266_v55 = vsel %vm906_vm2, %v1968_v36, %v587_v57  ;;  %1099 = vmatpush.msra.mxu0 %v1472_v11  ;;  %v1471_v36 = vld [vmem:[%s2618_s3 + $0x48] sm:$0xff]  ;;  %1522 = vmatpush.msra.mxu3 %v1472_v11  ;;  %v408_v57 = vld [vmem:[%s1815_s20 + $0x90] sm:$0xff]  ;;  %s1468_s20 = sshll.u32 %s2639_s21, 3 }
 0x104   : > { %1248 = vmatpush.msra.mxu2 %v2274_v63 }
 0x105   : > { %1100 = vmatpush.msra.mxu0 %v1471_v36  ;;  %1523 = vmatpush.msra.mxu3 %v1471_v36 }
 0x106   : > { %1249 = vmatpush.msra.mxu2 %v2284_v16 }
 0x107   : > { %672 = vrot.lane.b32.xlu2 %v1869_v33, %s1639_s10  ;;  %640 = vrot.lane.b32.xlu1 %v2049_v17, %s1640_s12 }
 0x108   : > { %638 = vrot.lane.b32.xlu0 %v2028_v29, %s1640_s12  ;;  %1524 = vmatpush.msrb.mxu3 %v2090_v43 }
 0x109   : > { %v2292_v15 = vpop.permute.xlu2 %616  ;;  %v613_v14 = vpop.permute.xlu1 %612 }
 0x10a   : > { %v611_v6 = vpop.permute.xlu0 %610  ;;  %1525 = vmatpush.msrb.mxu3 %v2095_v44 }
 0x10b   : > { %v924_v43 = vsel %vm923_vm3, %v1983_v41, %v611_v6 }
 0x10c   : > { %1526 = vmatpush.msrb.mxu3 %v2107_v54  ;;  %v941_v44 = vsel %vm940_vm4, %v924_v43, %v2122_v35 }
 0x10e   : > { %1527 = vmatpush.msrb.mxu3 %v2120_v9 }
 0x10f   : > { %690 = vrot.lane.b32.xlu2 %v409_v27, %s1639_s10  ;;  %688 = vrot.lane.b32.xlu1 %v408_v57, %s1639_s10  ;;  %v2345_v57 = vld [vmem:[%s1908_s29 + $0x50] sm:$0xff] }
 0x110   : > { %674 = vrot.lane.b32.xlu0 %v1865_v32, %s1639_s10  ;;  %1528 = vmatpush.msrb.mxu3 %v2138_v26 }
 0x111   : > { %v2303_v29 = vpop.permute.xlu2 %728  ;;  %v725_v17 = vpop.permute.xlu1 %724 }
 0x112   : > { %v663_v45 = vpop.permute.xlu0 %662  ;;  %1529 = vmatpush.msrb.mxu3 %v2146_v23  ;;  %v958_v9 = vsel %vm957_vm5, %v941_v44, %v725_v17 }
 0x114   : > { %1530 = vmatpush.msrb.mxu3 %v2167_v8 }
 0x116   : > { %1531 = vmatpush.msrb.mxu3 %v2188_v59 }
 0x117   : > { %752 = vrot.lane.b32.xlu2 %v2101_v5, %s1641_s15  ;;  %738 = vrot.lane.b32.xlu1 %v1988_v50, %s1641_s15 }
 0x118   : > { %736 = vrot.lane.b32.xlu0 %v1991_v51, %s1641_s15  ;;  %v908_v51 = vsel %vm906_vm2, %v1911_v47, %v2063_v20  ;;  %1532 = vmatpush.msrb.mxu3 %v2214_v13 }
 0x119   : > { %v781_v41 = vpop.permute.xlu2 %780  ;;  %v777_v54 = vpop.permute.xlu1 %776  ;;  %v925_v35 = vsel %vm923_vm3, %v908_v51, %v613_v14 }
 0x11a   : > { %v775_v26 = vpop.permute.xlu0 %774  ;;  %v942_v11 = vsel %vm940_vm4, %v925_v35, %v663_v45 }
 0x11b   : > { %v975_v50 = vsel %vm974_vm6, %v958_v9, %v775_v26  ;;  %v959_v47 = vsel %vm957_vm5, %v942_v11, %v2195_v10  ;;  %v428_v9 = vld [vmem:[%s1908_s29 + $0x90] sm:$0xff]  ;;  %v421_v26 = vld [vmem:[%s1908_s29 + $0x58] sm:$0x3] }
 0x11c   : > { %v992_v23 = vsel %vm991_vm7, %v975_v50, %v2252_v49  ;;  %v976_v59 = vsel %vm974_vm6, %v959_v47, %v777_v54  ;;  %v429_v54 = vld [vmem:[%s1908_s29 + $0x98] sm:$0x3] }
 0x11d   : > { %1488 = vmatmul.msk.f32.vlgmr.msra.gmra.mxu1 %vm1068_vm8, %v992_v23  ;;  %v1034_v36 = vrot.slane %v992_v23, 1  ;;  %v1184_v14 = vrot.slane %v992_v23, 2 }
 0x11f   : > { %788 = vrot.lane.b32.xlu2 %v2149_v53, %s1643_s17  ;;  %786 = vrot.lane.b32.xlu1 %v2161_v7, %s1643_s17 }
 0x120   : > { %754 = vrot.lane.b32.xlu0 %v2098_v2, %s1641_s15 }
 0x121   : > { %v2340_v20 = vpop.permute.xlu2 %618  ;;  %v615_v8 = vpop.permute.xlu1 %614 }
 0x122   : > { %v827_v49 = vpop.permute.xlu0 %826  ;;  %v926_v23 = vsel %vm923_vm3, %v2061_v19, %v615_v8 }
 0x123   : > { %v993_v13 = vsel %vm991_vm7, %v976_v59, %v827_v49 }
 0x124   : > { %v1035_v6 = vrot.slane %v993_v13, 1  ;;  %v1185_v27 = vrot.slane %v993_v13, 2 }
 0x126   : > { %v1036_v10 = vsel %vm1033_vm9, %v1034_v36, %v1035_v6  ;;  %v1186_v17 = vsel %vm1183_vm10, %v1184_v14, %v1185_v27 }
 0x127   : > { %1480 = vmatmul.msk.f32.vlgmr.msra.gmra.mxu0 %vm1068_vm8, %v1036_v10  ;;  %1505 = vmatmul.msk.f32.vlgmr.msra.gmra.mxu2 %vm1068_vm8, %v1186_v17 }
 0x128   : > { %836 = vrot.lane.b32.xlu2 %v2345_v57, %s1642_s16  ;;  %804 = vrot.lane.b32.xlu1 %v2223_v18, %s1643_s17 }
 0x129   : > { %802 = vrot.lane.b32.xlu0 %v2128_v0, %s1643_s17  ;;  %v2357_v45 = vpop.permute.xlu2 %636  ;;  %v667_v43 = vpop.permute.xlu1 %666  ;;  %v927_v0 = vsel %vm923_vm3, %v2005_v52, %v2292_v15 }
 0x12a   : > { %v665_v44 = vpop.permute.xlu0 %664  ;;  %v944_v35 = vsel %vm940_vm4, %v927_v0, %v667_v43 }
 0x12b   : > { %v943_v11 = vsel %vm940_vm4, %v926_v23, %v665_v44 }
 0x12c   : > { %v960_v59 = vsel %vm957_vm5, %v943_v11, %v2303_v29 }
 0x130   : > { %854 = vrot.lane.b32.xlu2 %v429_v54, %s1642_s16  ;;  %852 = vrot.lane.b32.xlu1 %v428_v9, %s1642_s16 }
 0x131   : > { %838 = vrot.lane.b32.xlu0 %v421_v26, %s1642_s16  ;;  %v2365_v50 = vpop.permute.xlu2 %684  ;;  %v779_v51 = vpop.permute.xlu1 %778 }
 0x132   : > { %v731_v18 = vpop.permute.xlu0 %730  ;;  %v977_v8 = vsel %vm974_vm6, %v960_v59, %v779_v51 }
 0x133   : > { %v961_v47 = vsel %vm957_vm5, %v944_v35, %v731_v18 }
 0x134   : > { %v978_v15 = vsel %vm974_vm6, %v961_v47, %v781_v41 }
 0x138   : > { %676 = vrot.lane.b32.xlu2 %v1862_v31, %s1639_s10  ;;  %628 = vrot.lane.b32.xlu1 %v1865_v32, %s1640_s12 }
 0x139   : > { %626 = vrot.lane.b32.xlu0 %v1869_v33, %s1640_s12  ;;  %v735_v52 = vpop.permute.xlu2 %734  ;;  %v831_v19 = vpop.permute.xlu1 %830 }
 0x13a   : > { %v995_v49 = vsel %vm991_vm7, %v978_v15, %v831_v19  ;;  %v829_v13 = vpop.permute.xlu0 %828 }
 0x13b   : > { %v1038_v36 = vrot.slane %v995_v49, 1  ;;  %v1188_v14 = vrot.slane %v995_v49, 2  ;;  %v994_v6 = vsel %vm991_vm7, %v977_v8, %v829_v13 }
 0x13c   : > { %v1037_v32 = vrot.slane %v994_v6, 1  ;;  %1489 = vmatmul.msk.f32.gmra.mxu1 %vm1068_vm8, %v994_v6  ;;  %v1187_v29 = vrot.slane %v994_v6, 2 }
 0x13e   : > { %v1039_v27 = vsel %vm1033_vm9, %v1037_v32, %v1038_v36  ;;  %v1189_v33 = vsel %vm1183_vm10, %v1187_v29, %v1188_v14 }
 0x13f   : > { %1481 = vmatmul.msk.f32.gmra.mxu0 %vm1068_vm8, %v1039_v27  ;;  %1506 = vmatmul.msk.f32.gmra.mxu2 %vm1068_vm8, %v1189_v33 }
 0x140   : > { %742 = vrot.lane.b32.xlu2 %v2149_v53, %s1641_s15  ;;  %740 = vrot.lane.b32.xlu1 %v2161_v7, %s1641_s15 }
 0x141   : > { %678 = vrot.lane.b32.xlu0 %v1888_v39, %s1639_s10  ;;  %v635_v41 = vpop.permute.xlu1 %634  ;;  %v783_v10 = vpop.permute.xlu2 %782 }
 0x142   : > { %v621_v17 = vpop.permute.xlu0 %620 }
 0x148   : > { %840 = vrot.lane.b32.xlu2 %v2069_v1, %s1642_s16  ;;  %792 = vrot.lane.b32.xlu1 %v421_v26, %s1643_s17 }
 0x149   : > { %790 = vrot.lane.b32.xlu0 %v2345_v57, %s1643_s17  ;;  %v671_v43 = vpop.permute.xlu1 %670  ;;  %v801_v53 = vpop.permute.xlu2 %800 }
 0x14a   : > { %v669_v44 = vpop.permute.xlu0 %668 }
 0x150   : > { %632 = vrot.lane.b32.xlu2 %v1888_v39, %s1640_s12  ;;  %630 = vrot.lane.b32.xlu1 %v1862_v31, %s1640_s12 }
 0x151   : > { %842 = vrot.lane.b32.xlu0 %v2066_v21, %s1642_s16  ;;  %v733_v7 = vpop.permute.xlu1 %732  ;;  %v849_v9 = vpop.permute.xlu2 %848 }
 0x152   : > { %v687_v54 = vpop.permute.xlu0 %686 }
 0x158   : > { %682 = vrot.lane.b32.xlu1 %v1882_v37, %s1639_s10  ;;  %744 = vrot.lane.b32.xlu2 %v2345_v57, %s1641_s15  ;;  %v929_v57 = vsel %vm923_vm3, %v2081_v24, %v621_v17 }
 0x159   : > { %680 = vrot.lane.b32.xlu0 %v1885_v38, %s1639_s10  ;;  %v751_v51 = vpop.permute.xlu1 %750  ;;  %v2415_v18 = vpop.permute.xlu2 %624  ;;  %v928_v38 = vsel %vm923_vm3, %v2085_v42, %v2340_v20  ;;  %v946_v0 = vsel %vm940_vm4, %v929_v57, %v671_v43  ;;  %s1469_s10 = sshll.u32 %s2633_s22, 5 }
 0x15a   : > { %v749_v39 = vpop.permute.xlu0 %748  ;;  %v945_v23 = vsel %vm940_vm4, %v928_v38, %v669_v44  ;;  %v963_v35 = vsel %vm957_vm5, %v946_v0, %v735_v52 }
 0x160   : > { %794 = vrot.lane.b32.xlu1 %v2069_v1, %s1643_s17  ;;  %796 = vrot.lane.b32.xlu2 %v2066_v21, %s1643_s17  ;;  %v962_v1 = vsel %vm957_vm5, %v945_v23, %v733_v7  ;;  %v936_v21 = vsel %vm923_vm3, %v2058_v40, %v635_v41  ;;  %v931_v23 = vsel %vm923_vm3, %v2133_v4, %v2415_v18 }
 0x161   : > { %746 = vrot.lane.b32.xlu0 %v421_v26, %s1641_s15  ;;  %v799_v31 = vpop.permute.xlu1 %798  ;;  %v673_v20 = vpop.permute.xlu2 %672  ;;  %v979_v47 = vsel %vm974_vm6, %v962_v1, %v783_v10  ;;  %s367_s15 = sadd.s32 %s1469_s10, %s1468_s20 }
 0x162   : > { %v785_v37 = vpop.permute.xlu0 %784  ;;  %s1470_s30 = sshll.u32 %s367_s15, 3 }
 0x163   : > { %v980_v24 = vsel %vm974_vm6, %v963_v35, %v785_v37  ;;  %s2528_s7 = scalar_lea.vmem %s2621_s6, %s1470_s30 }
 0x168   : > { %846 = vrot.lane.b32.xlu1 %v2098_v2, %s1642_s16  ;;  %v953_v2 = vsel %vm940_vm4, %v936_v21, %v2365_v50 }
 0x169   : > { %844 = vrot.lane.b32.xlu0 %v2101_v5, %s1642_s16  ;;  %v835_v42 = vpop.permute.xlu1 %834  ;;  %v937_v5 = vsel %vm923_vm3, %v2266_v55, %v2357_v45  ;;  %v970_v8 = vsel %vm957_vm5, %v953_v2, %v749_v39  ;;  %v691_v27 = vpop.permute.xlu2 %690 }
 0x16a   : > { %v997_v26 = vsel %vm991_vm7, %v980_v24, %v835_v42  ;;  %v833_v11 = vpop.permute.xlu0 %832  ;;  %v954_v49 = vsel %vm940_vm4, %v937_v5, %v687_v54  ;;  %v987_v13 = vsel %vm974_vm6, %v970_v8, %v799_v31 }
 0x16b   : > { %v1041_v59 = vrot.slane %v997_v26, 1  ;;  %v1191_v52 = vrot.slane %v997_v26, 2  ;;  %v996_v19 = vsel %vm991_vm7, %v979_v47, %v833_v11  ;;  %v971_v50 = vsel %vm957_vm5, %v954_v49, %v751_v51 }
 0x16c   : > { %v1040_v40 = vrot.slane %v996_v19, 1  ;;  %1490 = vmatmul.msk.f32.gmra.mxu1 %vm1068_vm8, %v996_v19  ;;  %v1190_v15 = vrot.slane %v996_v19, 2  ;;  %v2456_v6 = vsel %vm991_vm7, %v987_v13, %v849_v9  ;;  %v988_v45 = vsel %vm974_vm6, %v971_v50, %v801_v53 }
 0x16d   : > { %v1052_v41 = vrot.slane %v2456_v6, 1 }
 0x16e   : > { %v1042_v36 = vsel %vm1033_vm9, %v1040_v40, %v1041_v59  ;;  %v1192_v14 = vsel %vm1183_vm10, %v1190_v15, %v1191_v52 }
 0x16f   : > { %1482 = vmatmul.msk.f32.gmra.mxu0 %vm1068_vm8, %v1042_v36  ;;  %1507 = vmatmul.msk.f32.gmra.mxu2 %vm1068_vm8, %v1192_v14 }
 0x171   : > { %v623_v55 = vpop.permute.xlu1 %622  ;;  %v753_v44 = vpop.permute.xlu2 %752 }
 0x172   : > { %v851_v32 = vpop.permute.xlu0 %850 }
 0x173   : > { %v2460_v29 = vsel %vm991_vm7, %v988_v45, %v851_v32  ;;  %v2514_v32 = vld [vmem:[%s2619_s4] ss:$0 sm:$0xff] }
 0x174   : > { %v1053_v33 = vrot.slane %v2460_v29, 1 }
 0x176   : > { %v1054_v10 = vsel %vm1033_vm9, %v1052_v41, %v1053_v33 }
 0x177   : > { %1486 = vmatmul.msk.f32.vlgmr.msra.gmra.mxu3 %vm1068_vm8, %v1054_v10  ;;  %v2519_v10 = vld [vmem:[%s2620_s5] ss:$0 sm:$0xff] }
 0x178   : > { %1533 = vmatpush.msra.mxu3 %v2155_v62 }
 0x179   : > { %v641_v17 = vpop.permute.xlu1 %640  ;;  %v789_v62 = vpop.permute.xlu2 %788 }
 0x17a   : > { %v639_v43 = vpop.permute.xlu0 %638  ;;  %1534 = vmatpush.msra.mxu3 %v2173_v30 }
 0x17b   : > { %v938_v57 = vsel %vm923_vm3, %v2261_v48, %v639_v43 }
 0x17c   : > { %1535 = vmatpush.msra.mxu3 %v2193_v60  ;;  %v930_v60 = vsel %vm923_vm3, %v2021_v58, %v623_v55 }
 0x17e   : > { %1536 = vmatpush.msra.mxu3 %v2219_v61  ;;  %v947_v61 = vsel %vm940_vm4, %v930_v60, %v673_v20 }
 0x180   : > { %1537 = vmatpush.msra.mxu3 %v2232_v56 }
 0x181   : > { %v689_v53 = vpop.permute.xlu1 %688 }
 0x182   : > { %v675_v7 = vpop.permute.xlu0 %674  ;;  %1538 = vmatpush.msra.mxu3 %v2244_v25  ;;  %v837_v51 = vpop.permute.xlu2 %836  ;;  %v955_v1 = vsel %vm940_vm4, %v938_v57, %v689_v53 }
 0x183   : > { %v972_v24 = vsel %vm957_vm5, %v955_v1, %v753_v44 }
 0x184   : > { %1539 = vmatpush.msra.mxu3 %v2257_v28 }
 0x186   : > { %1540 = vmatpush.msra.mxu3 %v2274_v63  ;;  %v939_v63 = vsel %vm923_vm3, %v2078_v22, %v641_v17  ;;  %v948_v22 = vsel %vm940_vm4, %v931_v23, %v675_v7 }
 0x187   : > { %v956_v58 = vsel %vm940_vm4, %v939_v63, %v691_v27 }
 0x188   : > { %1541 = vmatpush.msra.mxu3 %v2284_v16 }
 0x189   : > { %v739_v54 = vpop.permute.xlu1 %738 }
 0x18a   : > { %v737_v30 = vpop.permute.xlu0 %736  ;;  %v855_v38 = vpop.permute.xlu2 %854  ;;  %v965_v35 = vsel %vm957_vm5, %v948_v22, %v739_v54 }
 0x18b   : > { %v964_v56 = vsel %vm957_vm5, %v947_v61, %v737_v30  ;;  %v982_v4 = vsel %vm974_vm6, %v965_v35, %v789_v62 }
 0x191   : > { %v787_v9 = vpop.permute.xlu1 %786 }
 0x192   : > { %v981_v25 = vsel %vm974_vm6, %v964_v56, %v787_v9  ;;  %v755_v39 = vpop.permute.xlu0 %754  ;;  %v677_v49 = vpop.permute.xlu2 %676 }
 0x193   : > { %v998_v28 = vsel %vm991_vm7, %v981_v25, %v837_v51  ;;  %v973_v37 = vsel %vm957_vm5, %v956_v58, %v755_v39 }
 0x194   : > { %1491 = vmatmul.msk.f32.gmra.mxu1 %vm1068_vm8, %v998_v28  ;;  %v1043_v19 = vrot.slane %v998_v28, 1  ;;  %v1193_v2 = vrot.slane %v998_v28, 2 }
 0x19a   : > { %v805_v16 = vpop.permute.xlu1 %804  ;;  %v1159_v50 = vpop.f32.mrf.mxu1 }
 0x19b   : > { %v803_v31 = vpop.permute.xlu0 %802  ;;  %v990_v0 = vsel %vm974_vm6, %v973_v37, %v805_v16  ;;  %v743_v44 = vpop.permute.xlu2 %742 }
 0x19c   : > { %v1007_v21 = vsel %vm991_vm7, %v990_v0, %v855_v38  ;;  %v989_v48 = vsel %vm974_vm6, %v972_v24, %v803_v31 }
 0x19d   : > { %v1056_v20 = vrot.slane %v1007_v21, 1  ;;  %v1206_v11 = vrot.slane %v1007_v21, 2 }
 0x1a2   : > { %v853_v42 = vpop.permute.xlu1 %852 }
 0x1a3   : > { %v1006_v26 = vsel %vm991_vm7, %v989_v48, %v853_v42  ;;  %v839_v18 = vpop.permute.xlu0 %838  ;;  %v841_v61 = vpop.permute.xlu2 %840 }
 0x1a4   : > { %v1055_v47 = vrot.slane %v1006_v26, 1  ;;  %v1205_v59 = vrot.slane %v1006_v26, 2  ;;  %v999_v52 = vsel %vm991_vm7, %v982_v4, %v839_v18  ;;  %v1102_v13 = vpop.f32.mrf.mxu0 }
 0x1a5   : > { %v1044_v40 = vrot.slane %v999_v52, 1  ;;  %v1194_v15 = vrot.slane %v999_v52, 2  ;;  %v1160_v55 = vadd.f32 %v1159_v50, %v1102_v13 }
 0x1a6   : > { %v1057_v5 = vsel %vm1033_vm9, %v1055_v47, %v1056_v20  ;;  %v1207_v8 = vsel %vm1183_vm10, %v1205_v59, %v1206_v11 }
 0x1a7   : > { %v1045_v36 = vsel %vm1033_vm9, %v1043_v19, %v1044_v40  ;;  %1487 = vmatmul.msk.f32.gmra.mxu3 %vm1068_vm8, %v1057_v5  ;;  %v1195_v14 = vsel %vm1183_vm10, %v1193_v2, %v1194_v15 }
 0x1a8   : > { %1483 = vmatmul.msk.f32.gmra.mxu0 %vm1068_vm8, %v1045_v36  ;;  %1508 = vmatmul.msk.f32.gmra.mxu2 %vm1068_vm8, %v1195_v14 }
 0x1aa   : > { %v629_v45 = vpop.permute.xlu1 %628  ;;  %v1251_v33 = vpop.f32.mrf.mxu2 }
 0x1ab   : > { %v627_v27 = vpop.permute.xlu0 %626  ;;  %v1275_v41 = vadd.f32 %v1251_v33, %v1160_v55  ;;  %v933_v39 = vsel %vm923_vm3, %v2042_v12, %v629_v45  ;;  %v633_v1 = vpop.permute.xlu2 %632 }
 0x1ac   : > { %v932_v54 = vsel %vm923_vm3, %v2125_v46, %v627_v27  ;;  %v935_v52 = vsel %vm923_vm3, %v2200_v34, %v633_v1 }
 0x1ad   : > { %v1287_v17 = vmul.f32 %v2514_v32, %v1275_v41  ;;  %v949_v30 = vsel %vm940_vm4, %v932_v54, %v677_v49 }
 0x1af   : > { %1494 = vmatmul.msk.f32.vlgmr.msrb.gmra.mxu3 %vm1068_vm8, %v2456_v6  ;;  %v1299_v43 = vadd.f32 %v2519_v10, %v1287_v17  ;;  %v1203_v17 = vrot.slane %v2460_v29, 2 }
 0x1b1   : > { %v1307_v53 = vmax.f32 %v1299_v43, 0.0  ;;  %v1202_v43 = vrot.slane %v2456_v6, 2 }
 0x1b2   : > { %v741_v7 = vpop.permute.xlu1 %740 }
 0x1b3   : > { %v679_v62 = vpop.permute.xlu0 %678  ;;  %1315 = vst.msk [vmem:[%s2528_s7] sm:$0xff] %vm872_vm1, %v1307_v53  ;;  %v966_v56 = vsel %vm957_vm5, %v949_v30, %v741_v7  ;;  %v745_v11 = vpop.permute.xlu2 %744 }
 0x1b4   : > { %v950_v46 = vsel %vm940_vm4, %v933_v39, %v679_v62 }
 0x1b5   : > { %v967_v58 = vsel %vm957_vm5, %v950_v46, %v743_v44  ;;  %v1204_v44 = vsel %vm1183_vm10, %v1202_v43, %v1203_v17 }
 0x1b7   : > { %1495 = vmatmul.msk.f32.gmra.mxu3 %vm1068_vm8, %v1006_v26 }
 0x1b9   : > { %v1162_v63 = vpop.f32.mrf.mxu1 }
 0x1ba   : > { %v793_v60 = vpop.permute.xlu1 %792 }
 0x1bb   : > { %v791_v9 = vpop.permute.xlu0 %790  ;;  %v984_v57 = vsel %vm974_vm6, %v967_v58, %v793_v60  ;;  %v797_v5 = vpop.permute.xlu2 %796 }
 0x1bc   : > { %v983_v51 = vsel %vm974_vm6, %v966_v56, %v791_v9  ;;  %v1105_v28 = vpop.f32.mrf.mxu0 }
 0x1bd   : > { %v1000_v25 = vsel %vm991_vm7, %v983_v51, %v841_v61  ;;  %v1163_v16 = vadd.f32 %v1162_v63, %v1105_v28 }
 0x1be   : > { %1492 = vmatmul.msk.f32.gmra.mxu1 %vm1068_vm8, %v1000_v25  ;;  %v1046_v23 = vrot.slane %v1000_v25, 1  ;;  %v1196_v22 = vrot.slane %v1000_v25, 2 }
 0x1bf   : > { %1512 = vmatmul.msk.f32.vlgmr.msra.gmra.mxu3 %vm1068_vm8, %v1207_v8 }
 0x1c2   : > { %v631_v31 = vpop.permute.xlu1 %630  ;;  %v1254_v37 = vpop.f32.mrf.mxu2 }
 0x1c3   : > { %v843_v38 = vpop.permute.xlu0 %842  ;;  %v1276_v0 = vadd.f32 %v1254_v37, %v1163_v16  ;;  %v934_v19 = vsel %vm923_vm3, %v2205_v3, %v631_v31 }
 0x1c4   : > { %v1001_v12 = vsel %vm991_vm7, %v984_v57, %v843_v38 }
 0x1c5   : > { %v1047_v35 = vrot.slane %v1001_v12, 1  ;;  %v1197_v21 = vrot.slane %v1001_v12, 2  ;;  %v1288_v24 = vmul.f32 %v2514_v32, %v1276_v0 }
 0x1c7   : > { %v1300_v48 = vadd.f32 %v2519_v10, %v1288_v24  ;;  %v1048_v42 = vsel %vm1033_vm9, %v1046_v23, %v1047_v35  ;;  %v1198_v20 = vsel %vm1183_vm10, %v1196_v22, %v1197_v21 }
 0x1c8   : > { %1484 = vmatmul.msk.f32.gmra.mxu0 %vm1068_vm8, %v1048_v42  ;;  %1509 = vmatmul.msk.f32.gmra.mxu2 %vm1068_vm8, %v1198_v20 }
 0x1c9   : > { %v1308_v26 = vmax.f32 %v1300_v48, 0.0 }
 0x1ca   : > { %v683_v4 = vpop.permute.xlu1 %682 }
 0x1cb   : > { %1316 = vst.msk [vmem:[%s2528_s7 + $0x8] sm:$0xff] %vm872_vm1, %v1308_v26  ;;  %v681_v18 = vpop.permute.xlu0 %680  ;;  %v952_v2 = vsel %vm940_vm4, %v935_v52, %v683_v4 }
 0x1cc   : > { %v951_v40 = vsel %vm940_vm4, %v934_v19, %v681_v18 }
 0x1cd   : > { %v968_v8 = vsel %vm957_vm5, %v951_v40, %v745_v11 }
 0x1d2   : > { %v795_v47 = vpop.permute.xlu1 %794 }
 0x1d3   : > { %v747_v59 = vpop.permute.xlu0 %746  ;;  %v985_v36 = vsel %vm974_vm6, %v968_v8, %v795_v47 }
 0x1d4   : > { %v969_v15 = vsel %vm957_vm5, %v952_v2, %v747_v59 }
 0x1d5   : > { %v986_v49 = vsel %vm974_vm6, %v969_v15, %v797_v5 }
 0x1da   : > { %v847_v13 = vpop.permute.xlu1 %846 }
 0x1db   : > { %v1003_v14 = vsel %vm991_vm7, %v986_v49, %v847_v13  ;;  %v845_v34 = vpop.permute.xlu0 %844 }
 0x1dc   : > { %v1050_v50 = vrot.slane %v1003_v14, 1  ;;  %v1200_v55 = vrot.slane %v1003_v14, 2  ;;  %v1002_v3 = vsel %vm991_vm7, %v985_v36, %v845_v34 }
 0x1dd   : > { %v1049_v45 = vrot.slane %v1002_v3, 1  ;;  %1493 = vmatmul.msk.f32.gmra.mxu1 %vm1068_vm8, %v1002_v3  ;;  %v1199_v27 = vrot.slane %v1002_v3, 2 }
 0x1df   : > { %v1051_v33 = vsel %vm1033_vm9, %v1049_v45, %v1050_v50  ;;  %v1201_v41 = vsel %vm1183_vm10, %v1199_v27, %v1200_v55 }
 0x1e0   : > { %1485 = vmatmul.msk.f32.gmra.mxu0 %vm1068_vm8, %v1051_v33  ;;  %1510 = vmatmul.msk.f32.gmra.mxu2 %vm1068_vm8, %v1201_v41 }
 0x1e8   : > { %1511 = vmatmul.msk.f32.gmra.mxu2 %vm1068_vm8, %v1204_v44 }
 0x1e9   : > { %v1165_v7 = vpop.f32.mrf.mxu1 }
 0x1ec   : > { %v1108_v53 = vpop.f32.mrf.mxu0 }
 0x1ed   : > { %v1166_v62 = vadd.f32 %v1165_v7, %v1108_v53 }
 0x1f2   : > { %v1257_v54 = vpop.f32.mrf.mxu2 }
 0x1f3   : > { %v1277_v30 = vadd.f32 %v1257_v54, %v1166_v62 }
 0x1f5   : > { %v1289_v60 = vmul.f32 %v2514_v32, %v1277_v30 }
 0x1f7   : > { %v1301_v61 = vadd.f32 %v2519_v10, %v1289_v60 }
 0x1f9   : > { %v1309_v56 = vmax.f32 %v1301_v61, 0.0 }
 0x1fa   : > { %v1120_v29 = vpop.f32.mrf.mxu3 }
 0x1fb   : > { %1317 = vst.msk [vmem:[%s2528_s7 + $0x10] sm:$0xff] %vm872_vm1, %v1309_v56 }
 0x211   : > { %v1168_v6 = vpop.f32.mrf.mxu1 }
 0x225   : > { %v1111_v9 = vpop.f32.mrf.mxu0 }
 0x226   : > { %v1169_v51 = vadd.f32 %v1168_v6, %v1111_v9 }
 0x22a   : > { %v1123_v25 = vpop.f32.mrf.mxu3 }
 0x22b   : > { %v1260_v39 = vpop.f32.mrf.mxu2 }
 0x22c   : > { %v1278_v28 = vadd.f32 %v1260_v39, %v1169_v51 }
 0x22e   : > { %v1290_v46 = vmul.f32 %v2514_v32, %v1278_v28 }
 0x230   : > { %v1302_v63 = vadd.f32 %v2519_v10, %v1290_v46 }
 0x232   : > { %v1310_v16 = vmax.f32 %v1302_v63, 0.0  ;;  %v1177_v58 = vpop.f32.mrf.mxu3 }
 0x233   : > { %v1178_v19 = vadd.f32 %v1177_v58, %v1120_v29 }
 0x234   : > { %1318 = vst.msk [vmem:[%s2528_s7 + $0x18] sm:$0xff] %vm872_vm1, %v1310_v16 }
 0x23a   : > { %v1180_v31 = vpop.f32.mrf.mxu3 }
 0x23b   : > { %v1181_v37 = vadd.f32 %v1180_v31, %v1123_v25  ;;  %v1171_v1 = vpop.f32.mrf.mxu1 }
 0x242   : > { %v1272_v57 = vpop.f32.mrf.mxu3 }
 0x243   : > { %v1282_v38 = vadd.f32 %v1272_v57, %v1181_v37 }
 0x245   : > { %v1294_v0 = vmul.f32 %v2514_v32, %v1282_v38  ;;  %v1114_v12 = vpop.f32.mrf.mxu0 }
 0x246   : > { %v1172_v35 = vadd.f32 %v1171_v1, %v1114_v12 }
 0x247   : > { %v1306_v23 = vadd.f32 %v2519_v10, %v1294_v0 }
 0x249   : > { %v1314_v22 = vmax.f32 %v1306_v23, 0.0 }
 0x24b   : > { %1322 = vst.msk [vmem:[%s2528_s7 + $0x38] sm:$0xff] %vm872_vm1, %v1314_v22  ;;  %v1263_v21 = vpop.f32.mrf.mxu2 }
 0x24c   : > { %v1279_v24 = vadd.f32 %v1263_v21, %v1172_v35 }
 0x24e   : > { %v1291_v48 = vmul.f32 %v2514_v32, %v1279_v24 }
 0x250   : > { %v1303_v42 = vadd.f32 %v2519_v10, %v1291_v48 }
 0x252   : > { %v1311_v20 = vmax.f32 %v1303_v42, 0.0 }
 0x254   : > { %1319 = vst.msk [vmem:[%s2528_s7 + $0x20] sm:$0xff] %vm872_vm1, %v1311_v20 }
 0x25a   : > { %v1174_v4 = vpop.f32.mrf.mxu1 }
 0x25d   : > { %v1117_v26 = vpop.f32.mrf.mxu0 }
 0x25e   : > { %v1175_v18 = vadd.f32 %v1174_v4, %v1117_v26 }
 0x263   : > { %v1266_v11 = vpop.f32.mrf.mxu2 }
 0x264   : > { %v1280_v47 = vadd.f32 %v1266_v11, %v1175_v18 }
 0x266   : > { %v1292_v59 = vmul.f32 %v2514_v32, %v1280_v47 }
 0x268   : > { %v1304_v52 = vadd.f32 %v2519_v10, %v1292_v59 }
 0x26a   : > { %v1312_v2 = vmax.f32 %v1304_v52, 0.0 }
 0x26b   : > { %v1269_v40 = vpop.f32.mrf.mxu2 }
 0x26c   : > { %1320 = vst.msk [vmem:[%s2528_s7 + $0x28] sm:$0xff] %vm872_vm1, %v1312_v2  ;;  %v1281_v15 = vadd.f32 %v1269_v40, %v1178_v19 }
 0x26e   : > { %v1293_v5 = vmul.f32 %v2514_v32, %v1281_v15 }
 0x270   : > { %v1305_v8 = vadd.f32 %v2519_v10, %v1293_v5 }
 0x272   : > { %v1313_v49 = vmax.f32 %v1305_v8, 0.0 }
 0x274   : > { %1321 = vst.msk [vmem:[%s2528_s7 + $0x30] sm:$0xff] %vm872_vm1, %v1313_v49 }
 0x275 PF: > { %s16_s25 = sadd.s32 1, %s1634_s25   ;;  %s2622_s21 = smov %s1626_s23 }
 0x276   : > { %p13_p10 = scmp.ge.s32.totalorder %s16_s25, 10   ;;  %s2623_s22 = smov %s1630_s24 }
 0x277   : > { %s2624_s23 = smov %s2627_s26  ;;  %s2625_s24 = smov %s2631_s27 }
 0x278   :  { %15 = sbr.rel (!%p13_p10) target bundleno = 3 (0x3), region = 82 }

// kernel: residual_block_forward.5
= control target key start
LH: loop header
LB: loop body
LE: loop exit
PB: predicated region body
PF: predicated region fallthrough
CT: control target
= control target key end

     0   :  { %vm95_vm0 = vcmask 64512   ;;  %vm699_vm1 = vcmask 130048   ;;  %s2551_s0 = inlined_call_operand.vmem [shape: f32[512,8], index: 0, kind: input, shape index: {}]   ;;  %s2552_s1 = inlined_call_operand.vmem [shape: f32[512,16], index: 1, kind: input, shape index: {}]   ;;  %s2553_s2 = inlined_call_operand.vmem [shape: f32[8,32], index: 2, kind: input, shape index: {}]   ;;  %s2554_s3 = inlined_call_operand.vmem [shape: f32[16,32], index: 3, kind: input, shape index: {}]   ;;  %s2555_s4 = inlined_call_operand.vmem [shape: f32[1,32], index: 4, kind: input, shape index: {}]   ;;  %s2556_s5 = inlined_call_operand.vmem [shape: f32[1,32], index: 5, kind: input, shape index: {}]   ;;  %s2557_s6 = inlined_call_operand.vmem [shape: f32[1,32], index: 6, kind: input, shape index: {}]   ;;  %s2558_s7 = inlined_call_operand.vmem [shape: f32[1,32], index: 7, kind: input, shape index: {}]   ;;  %s2559_s8 = inlined_call_operand.hbm [shape: f32[512,32], index: 8, kind: output, shape index: {}]  }
   0x1   :  { %v94_v0 = vld [vmem:[%s2553_s2] sm:$0xff]  ;;  %v698_v1 = vld [vmem:[%s2554_s3 + $0x8] sm:$0xff] }
   0x2   :  { %v30_v2 = vld [vmem:[%s2551_s0] sm:$0xff]  ;;  %303 = vmatpush.msra.mxu0 %v94_v0  ;;  %906 = vmatpush.msra.mxu1 %v698_v1  ;;  %v63_v6 = vld [vmem:[%s2551_s0 + $0x108] sm:$0xff] }
   0x3   :  { %v697_v3 = vld [vmem:[%s2554_s3] sm:$0xff]  ;;  %1577 = vmatpush.msra.mxu2 %v698_v1  ;;  %1448 = vmatmul.msk.f32.vlgmr.msra.gmra.mxu0 %vm95_vm0, %v30_v2  ;;  %v31_v7 = vld [vmem:[%s2551_s0 + $0x8] sm:$0xff] }
   0x4   :  { %v633_v4 = vld [vmem:[%s2552_s1] sm:$0xff]  ;;  %907 = vmatpush.msra.mxu1 %v697_v3  ;;  %1576 = vmatpush.msra.mxu3 %v94_v0  ;;  %v634_v8 = vld [vmem:[%s2552_s1 + $0x8] sm:$0xff] }
   0x5   :  { %v665_v5 = vld [vmem:[%s2552_s1 + $0x100] sm:$0xff]  ;;  %1578 = vmatpush.msra.mxu2 %v697_v3  ;;  %1512 = vmatmul.msk.f32.vlgmr.msra.gmra.mxu1 %vm699_vm1, %v633_v4 }
   0x6   :  { %1544 = vmatmul.msk.f32.vlgmr.msra.gmra.mxu2 %vm699_vm1, %v665_v5  ;;  %1481 = vmatmul.msk.f32.vlgmr.msra.gmra.mxu3 %vm95_vm0, %v63_v6 }
   0x7   :  { %13 = vsyncpa [#allocation3], 0  ;;  %v666_v9 = vld [vmem:[%s2552_s1 + $0x108] sm:$0xff]  ;;  %v64_v10 = vld [vmem:[%s2551_s0 + $0x110] sm:$0xff]  ;;  %vm1365_vm2 = vcmask 261120   ;;  %s1436_s16 = sshll.u32 %s2559_s8, 4  ;;  %s1437_s16 = int_to_ptr.hbm [resolvable:$true] %s1436_s16 }
   0x8   :  { %v32_v11 = vld [vmem:[%s2551_s0 + $0x10] sm:$0xff]  ;;  %v65_v14 = vld [vmem:[%s2551_s0 + $0x118] sm:$0xff]  ;;  %v66_v18 = vld [vmem:[%s2551_s0 + $0x120] sm:$0xff]  ;;  %s1617_s17 = smov 128   ;;  %s1618_s3 = smov 8  }
   0x9   :  { %v635_v12 = vld [vmem:[%s2552_s1 + $0x10] sm:$0xff]  ;;  %v33_v15 = vld [vmem:[%s2551_s0 + $0x18] sm:$0xff]  ;;  %v34_v19 = vld [vmem:[%s2551_s0 + $0x20] sm:$0xff] }
   0xa   :  { %v667_v13 = vld [vmem:[%s2552_s1 + $0x110] sm:$0xff]  ;;  %v636_v16 = vld [vmem:[%s2552_s1 + $0x18] sm:$0xff]  ;;  %v637_v20 = vld [vmem:[%s2552_s1 + $0x20] sm:$0xff] }
   0xb   :  { %1449 = vmatmul.msk.f32.gmra.mxu0 %vm95_vm0, %v31_v7  ;;  %v668_v17 = vld [vmem:[%s2552_s1 + $0x118] sm:$0xff]  ;;  %v669_v21 = vld [vmem:[%s2552_s1 + $0x120] sm:$0xff]  ;;  %v67_v22 = vld [vmem:[%s2551_s0 + $0x128] sm:$0xff] }
   0xc   :  { %v35_v23 = vld [vmem:[%s2551_s0 + $0x28] sm:$0xff]  ;;  %v68_v26 = vld [vmem:[%s2551_s0 + $0x130] sm:$0xff]  ;;  %v69_v30 = vld [vmem:[%s2551_s0 + $0x138] sm:$0xff] }
   0xd   :  { %1513 = vmatmul.msk.f32.gmra.mxu1 %vm699_vm1, %v634_v8  ;;  %v638_v24 = vld [vmem:[%s2552_s1 + $0x28] sm:$0xff]  ;;  %v36_v27 = vld [vmem:[%s2551_s0 + $0x30] sm:$0xff]  ;;  %v37_v31 = vld [vmem:[%s2551_s0 + $0x38] sm:$0xff] }
   0xe   :  { %1545 = vmatmul.msk.f32.gmra.mxu2 %vm699_vm1, %v666_v9  ;;  %1482 = vmatmul.msk.f32.gmra.mxu3 %vm95_vm0, %v64_v10  ;;  %v670_v25 = vld [vmem:[%s2552_s1 + $0x128] sm:$0xff]  ;;  %v639_v28 = vld [vmem:[%s2552_s1 + $0x30] sm:$0xff]  ;;  %v640_v32 = vld [vmem:[%s2552_s1 + $0x38] sm:$0xff] }
   0xf   :  { %v671_v29 = vld [vmem:[%s2552_s1 + $0x130] sm:$0xff]  ;;  %v672_v33 = vld [vmem:[%s2552_s1 + $0x138] sm:$0xff]  ;;  %v70_v34 = vld [vmem:[%s2551_s0 + $0x140] sm:$0xff] }
  0x10   :  { %v38_v35 = vld [vmem:[%s2551_s0 + $0x40] sm:$0xff]  ;;  %v71_v38 = vld [vmem:[%s2551_s0 + $0x148] sm:$0xff]  ;;  %v72_v42 = vld [vmem:[%s2551_s0 + $0x150] sm:$0xff] }
  0x11   :  { %v641_v36 = vld [vmem:[%s2552_s1 + $0x40] sm:$0xff]  ;;  %v39_v39 = vld [vmem:[%s2551_s0 + $0x48] sm:$0xff]  ;;  %v40_v43 = vld [vmem:[%s2551_s0 + $0x50] sm:$0xff] }
  0x12   :  { %v673_v37 = vld [vmem:[%s2552_s1 + $0x140] sm:$0xff]  ;;  %v642_v40 = vld [vmem:[%s2552_s1 + $0x48] sm:$0xff]  ;;  %v643_v44 = vld [vmem:[%s2552_s1 + $0x50] sm:$0xff] }
  0x13   :  { %1450 = vmatmul.msk.f32.gmra.mxu0 %vm95_vm0, %v32_v11  ;;  %v674_v41 = vld [vmem:[%s2552_s1 + $0x148] sm:$0xff]  ;;  %v675_v45 = vld [vmem:[%s2552_s1 + $0x150] sm:$0xff]  ;;  %v73_v46 = vld [vmem:[%s2551_s0 + $0x158] sm:$0xff] }
  0x14   :  { %v41_v47 = vld [vmem:[%s2551_s0 + $0x58] sm:$0xff]  ;;  %v74_v50 = vld [vmem:[%s2551_s0 + $0x160] sm:$0xff]  ;;  %v75_v54 = vld [vmem:[%s2551_s0 + $0x168] sm:$0xff] }
  0x15   :  { %1514 = vmatmul.msk.f32.gmra.mxu1 %vm699_vm1, %v635_v12  ;;  %v644_v48 = vld [vmem:[%s2552_s1 + $0x58] sm:$0xff]  ;;  %v42_v51 = vld [vmem:[%s2551_s0 + $0x60] sm:$0xff]  ;;  %v43_v55 = vld [vmem:[%s2551_s0 + $0x68] sm:$0xff] }
  0x16   :  { %1546 = vmatmul.msk.f32.gmra.mxu2 %vm699_vm1, %v667_v13  ;;  %1483 = vmatmul.msk.f32.gmra.mxu3 %vm95_vm0, %v65_v14  ;;  %v676_v49 = vld [vmem:[%s2552_s1 + $0x158] sm:$0xff]  ;;  %v645_v52 = vld [vmem:[%s2552_s1 + $0x60] sm:$0xff]  ;;  %v646_v56 = vld [vmem:[%s2552_s1 + $0x68] sm:$0xff] }
  0x17   :  { %v677_v53 = vld [vmem:[%s2552_s1 + $0x160] sm:$0xff]  ;;  %v678_v57 = vld [vmem:[%s2552_s1 + $0x168] sm:$0xff]  ;;  %v76_v58 = vld [vmem:[%s2551_s0 + $0x170] sm:$0xff] }
  0x18   :  { %v44_v59 = vld [vmem:[%s2551_s0 + $0x70] sm:$0xff]  ;;  %v77_v62 = vld [vmem:[%s2551_s0 + $0x178] sm:$0xff]  ;;  %v78_v2 = vld [vmem:[%s2551_s0 + $0x180] sm:$0xff] }
  0x19   :  { %v647_v60 = vld [vmem:[%s2552_s1 + $0x70] sm:$0xff]  ;;  %v45_v63 = vld [vmem:[%s2551_s0 + $0x78] sm:$0xff]  ;;  %v1930_v3 = vld [vmem:[%s2555_s4] ss:$0 sm:$0xff] }
  0x1a   :  { %v679_v61 = vld [vmem:[%s2552_s1 + $0x170] sm:$0xff]  ;;  %v648_v0 = vld [vmem:[%s2552_s1 + $0x78] sm:$0xff]  ;;  %v1937_v4 = vld [vmem:[%s2557_s6] ss:$0 sm:$0xff] }
  0x1b   :  { %1451 = vmatmul.msk.f32.gmra.mxu0 %vm95_vm0, %v33_v15  ;;  %v680_v1 = vld [vmem:[%s2552_s1 + $0x178] sm:$0xff]  ;;  %v46_v6 = vld [vmem:[%s2551_s0 + $0x80] sm:$0xff]  ;;  %v79_v14 = vld [vmem:[%s2551_s0 + $0x188] sm:$0xff] }
  0x1c   :  { %v1946_v8 = vld [vmem:[%s2556_s5] ss:$0 sm:$0xff] }
  0x1d   :  { %1515 = vmatmul.msk.f32.gmra.mxu1 %vm699_vm1, %v636_v16  ;;  %v1951_v9 = vld [vmem:[%s2558_s7] ss:$0 sm:$0xff] }
  0x1e   :  { %1547 = vmatmul.msk.f32.gmra.mxu2 %vm699_vm1, %v668_v17  ;;  %1484 = vmatmul.msk.f32.gmra.mxu3 %vm95_vm0, %v66_v18  ;;  %v649_v11 = vld [vmem:[%s2552_s1 + $0x80] sm:$0xff] }
  0x1f   :  { %v681_v13 = vld [vmem:[%s2552_s1 + $0x180] sm:$0xff] }
  0x23   :  { %1452 = vmatmul.msk.f32.gmra.mxu0 %vm95_vm0, %v34_v19  ;;  %v47_v19 = vld [vmem:[%s2551_s0 + $0x88] sm:$0xff] }
  0x25   :  { %1516 = vmatmul.msk.f32.gmra.mxu1 %vm699_vm1, %v637_v20 }
  0x26   :  { %1548 = vmatmul.msk.f32.gmra.mxu2 %vm699_vm1, %v669_v21  ;;  %1485 = vmatmul.msk.f32.gmra.mxu3 %vm95_vm0, %v67_v22 }
  0x2b   :  { %1453 = vmatmul.msk.f32.gmra.mxu0 %vm95_vm0, %v35_v23 }
  0x2d   :  { %1517 = vmatmul.msk.f32.gmra.mxu1 %vm699_vm1, %v638_v24 }
  0x2e   :  { %1549 = vmatmul.msk.f32.gmra.mxu2 %vm699_vm1, %v670_v25  ;;  %1486 = vmatmul.msk.f32.gmra.mxu3 %vm95_vm0, %v68_v26  ;;  %v650_v25 = vld [vmem:[%s2552_s1 + $0x88] sm:$0xff] }
  0x33   :  { %1454 = vmatmul.msk.f32.gmra.mxu0 %vm95_vm0, %v36_v27  ;;  %v682_v27 = vld [vmem:[%s2552_s1 + $0x188] sm:$0xff] }
  0x35   :  { %1518 = vmatmul.msk.f32.gmra.mxu1 %vm699_vm1, %v639_v28  ;;  %v80_v28 = vld [vmem:[%s2551_s0 + $0x190] sm:$0xff] }
  0x36   :  { %1550 = vmatmul.msk.f32.gmra.mxu2 %vm699_vm1, %v671_v29  ;;  %1487 = vmatmul.msk.f32.gmra.mxu3 %vm95_vm0, %v69_v30 }
  0x3b   :  { %1455 = vmatmul.msk.f32.gmra.mxu0 %vm95_vm0, %v37_v31 }
  0x3d   :  { %1519 = vmatmul.msk.f32.gmra.mxu1 %vm699_vm1, %v640_v32 }
  0x3e   :  { %1551 = vmatmul.msk.f32.gmra.mxu2 %vm699_vm1, %v672_v33  ;;  %1488 = vmatmul.msk.f32.gmra.mxu3 %vm95_vm0, %v70_v34  ;;  %v48_v34 = vld [vmem:[%s2551_s0 + $0x90] sm:$0xff] }
  0x43   :  { %1456 = vmatmul.msk.f32.gmra.mxu0 %vm95_vm0, %v38_v35 }
  0x45   :  { %1520 = vmatmul.msk.f32.gmra.mxu1 %vm699_vm1, %v641_v36 }
  0x46   :  { %1552 = vmatmul.msk.f32.gmra.mxu2 %vm699_vm1, %v673_v37  ;;  %1489 = vmatmul.msk.f32.gmra.mxu3 %vm95_vm0, %v71_v38 }
  0x4b   :  { %1457 = vmatmul.msk.f32.gmra.mxu0 %vm95_vm0, %v39_v39 }
  0x4d   :  { %1521 = vmatmul.msk.f32.gmra.mxu1 %vm699_vm1, %v642_v40 }
  0x4e   :  { %1553 = vmatmul.msk.f32.gmra.mxu2 %vm699_vm1, %v674_v41  ;;  %1490 = vmatmul.msk.f32.gmra.mxu3 %vm95_vm0, %v72_v42  ;;  %v651_v42 = vld [vmem:[%s2552_s1 + $0x90] sm:$0xff] }
  0x53   :  { %1458 = vmatmul.msk.f32.gmra.mxu0 %vm95_vm0, %v40_v43 }
  0x55   :  { %1522 = vmatmul.msk.f32.gmra.mxu1 %vm699_vm1, %v643_v44  ;;  %v683_v44 = vld [vmem:[%s2552_s1 + $0x190] sm:$0xff] }
  0x56   :  { %1554 = vmatmul.msk.f32.gmra.mxu2 %vm699_vm1, %v675_v45  ;;  %1491 = vmatmul.msk.f32.gmra.mxu3 %vm95_vm0, %v73_v46  ;;  %v81_v45 = vld [vmem:[%s2551_s0 + $0x198] sm:$0xff] }
  0x5b   :  { %1459 = vmatmul.msk.f32.gmra.mxu0 %vm95_vm0, %v41_v47 }
  0x5d   :  { %1523 = vmatmul.msk.f32.gmra.mxu1 %vm699_vm1, %v644_v48 }
  0x5e   :  { %1555 = vmatmul.msk.f32.gmra.mxu2 %vm699_vm1, %v676_v49  ;;  %1492 = vmatmul.msk.f32.gmra.mxu3 %vm95_vm0, %v74_v50 }
  0x63   :  { %1460 = vmatmul.msk.f32.gmra.mxu0 %vm95_vm0, %v42_v51 }
  0x65   :  { %1524 = vmatmul.msk.f32.gmra.mxu1 %vm699_vm1, %v645_v52 }
  0x66   :  { %1556 = vmatmul.msk.f32.gmra.mxu2 %vm699_vm1, %v677_v53  ;;  %1493 = vmatmul.msk.f32.gmra.mxu3 %vm95_vm0, %v75_v54  ;;  %v49_v54 = vld [vmem:[%s2551_s0 + $0x98] sm:$0xff] }
  0x6b   :  { %1461 = vmatmul.msk.f32.gmra.mxu0 %vm95_vm0, %v43_v55 }
  0x6d   :  { %1525 = vmatmul.msk.f32.gmra.mxu1 %vm699_vm1, %v646_v56 }
  0x6e   :  { %1557 = vmatmul.msk.f32.gmra.mxu2 %vm699_vm1, %v678_v57  ;;  %1494 = vmatmul.msk.f32.gmra.mxu3 %vm95_vm0, %v76_v58 }
  0x73   :  { %1462 = vmatmul.msk.f32.gmra.mxu0 %vm95_vm0, %v44_v59 }
  0x75   :  { %1526 = vmatmul.msk.f32.gmra.mxu1 %vm699_vm1, %v647_v60 }
  0x76   :  { %1558 = vmatmul.msk.f32.gmra.mxu2 %vm699_vm1, %v679_v61  ;;  %1495 = vmatmul.msk.f32.gmra.mxu3 %vm95_vm0, %v77_v62  ;;  %v652_v62 = vld [vmem:[%s2552_s1 + $0x98] sm:$0xff] }
  0x7b   :  { %1463 = vmatmul.msk.f32.gmra.mxu0 %vm95_vm0, %v45_v63 }
  0x7d   :  { %1527 = vmatmul.msk.f32.gmra.mxu1 %vm699_vm1, %v648_v0  ;;  %v684_v0 = vld [vmem:[%s2552_s1 + $0x198] sm:$0xff] }
  0x7e   :  { %1559 = vmatmul.msk.f32.gmra.mxu2 %vm699_vm1, %v680_v1  ;;  %1496 = vmatmul.msk.f32.gmra.mxu3 %vm95_vm0, %v78_v2  ;;  %v82_v1 = vld [vmem:[%s2551_s0 + $0x1a0] sm:$0xff] }
  0x80   :  { %v305_v5 = vpop.f32.mrf.mxu0 }
  0x81   :  { %v501_v7 = vmul.f32 %v1930_v3, %v305_v5 }
  0x82   :  { %v909_v10 = vpop.f32.mrf.mxu1 }
  0x83   :  { %v1105_v12 = vmul.f32 %v1937_v4, %v909_v10  ;;  %1464 = vmatmul.msk.f32.gmra.mxu0 %vm95_vm0, %v46_v6  ;;  %v569_v15 = vadd.f32 %v1946_v8, %v501_v7 }
  0x85   :  { %v1173_v16 = vadd.f32 %v1951_v9, %v1105_v12  ;;  %1528 = vmatmul.msk.f32.gmra.mxu1 %vm699_vm1, %v649_v11 }
  0x86   :  { %1560 = vmatmul.msk.f32.gmra.mxu2 %vm699_vm1, %v681_v13  ;;  %1497 = vmatmul.msk.f32.gmra.mxu3 %vm95_vm0, %v79_v14  ;;  %v50_v14 = vld [vmem:[%s2551_s0 + $0xa0] sm:$0xff] }
  0x87   :  { %v1237_v17 = vadd.f32 %v1173_v16, %v569_v15 }
  0x88   :  { %v308_v18 = vpop.f32.mrf.mxu0 }
  0x89   :  { %v1301_v20 = vmax.f32 %v1237_v17, 0.0  ;;  %v502_v21 = vmul.f32 %v1930_v3, %v308_v18  ;;  %v1973_v22 = vpop.f32.mrf.mxu2  ;;  %v404_v23 = vpop.f32.mrf.mxu3 }
  0x8a   :  { %v912_v24 = vpop.f32.mrf.mxu1  ;;  %v534_v31 = vmul.f32 %v1930_v3, %v404_v23  ;;  %v653_v23 = vld [vmem:[%s2552_s1 + $0xa0] sm:$0xff] }
  0x8b   :  { %1366 = vst.msk [vmem:[#allocation2] sm:$0xff] %vm1365_vm2, %v1301_v20  ;;  %v1106_v26 = vmul.f32 %v1937_v4, %v912_v24  ;;  %1465 = vmatmul.msk.f32.gmra.mxu0 %vm95_vm0, %v47_v19  ;;  %v570_v29 = vadd.f32 %v1946_v8, %v502_v21 }
  0x8c   :  { %v602_v39 = vadd.f32 %v1946_v8, %v534_v31 }
  0x8d   :  { %v1174_v30 = vadd.f32 %v1951_v9, %v1106_v26  ;;  %1529 = vmatmul.msk.f32.gmra.mxu1 %vm699_vm1, %v650_v25  ;;  %v685_v25 = vld [vmem:[%s2552_s1 + $0x1a0] sm:$0xff]  ;;  %v83_v26 = vld [vmem:[%s2551_s0 + $0x1a8] sm:$0xff] }
  0x8e   :  { %1561 = vmatmul.msk.f32.gmra.mxu2 %vm699_vm1, %v682_v27  ;;  %1498 = vmatmul.msk.f32.gmra.mxu3 %vm95_vm0, %v80_v28 }
  0x8f   :  { %v1238_v32 = vadd.f32 %v1174_v30, %v570_v29 }
  0x90   :  { %v311_v33 = vpop.f32.mrf.mxu0 }
  0x91   :  { %v1302_v35 = vmax.f32 %v1238_v32, 0.0  ;;  %v503_v36 = vmul.f32 %v1930_v3, %v311_v33  ;;  %v1008_v37 = vpop.f32.mrf.mxu2  ;;  %v407_v38 = vpop.f32.mrf.mxu3 }
  0x92   :  { %v1138_v40 = vmul.f32 %v1937_v4, %v1008_v37  ;;  %v915_v41 = vpop.f32.mrf.mxu1  ;;  %v535_v50 = vmul.f32 %v1930_v3, %v407_v38 }
  0x93   :  { %1367 = vst.msk [vmem:[#allocation2 + $0x8] sm:$0xff] %vm1365_vm2, %v1302_v35  ;;  %v1107_v43 = vmul.f32 %v1937_v4, %v915_v41  ;;  %1466 = vmatmul.msk.f32.gmra.mxu0 %vm95_vm0, %v48_v34  ;;  %v571_v47 = vadd.f32 %v1946_v8, %v503_v36  ;;  %v51_v35 = vld [vmem:[%s2551_s0 + $0xa8] sm:$0xff] }
  0x94   :  { %v1206_v46 = vadd.f32 %v1951_v9, %v1138_v40  ;;  %v603_v59 = vadd.f32 %v1946_v8, %v535_v50 }
  0x95   :  { %v1175_v48 = vadd.f32 %v1951_v9, %v1107_v43  ;;  %1530 = vmatmul.msk.f32.gmra.mxu1 %vm699_vm1, %v651_v42  ;;  %v654_v43 = vld [vmem:[%s2552_s1 + $0xa8] sm:$0xff] }
  0x96   :  { %v1270_v49 = vadd.f32 %v1206_v46, %v602_v39  ;;  %1562 = vmatmul.msk.f32.gmra.mxu2 %vm699_vm1, %v683_v44  ;;  %1499 = vmatmul.msk.f32.gmra.mxu3 %vm95_vm0, %v81_v45  ;;  %v686_v45 = vld [vmem:[%s2552_s1 + $0x1a8] sm:$0xff]  ;;  %v84_v46 = vld [vmem:[%s2551_s0 + $0x1b0] sm:$0xff] }
  0x97   :  { %v1239_v51 = vadd.f32 %v1175_v48, %v571_v47 }
  0x98   :  { %v1334_v52 = vmax.f32 %v1270_v49, 0.0  ;;  %v314_v53 = vpop.f32.mrf.mxu0 }
  0x99   :  { %v1303_v55 = vmax.f32 %v1239_v51, 0.0  ;;  %v504_v56 = vmul.f32 %v1930_v3, %v314_v53  ;;  %v1011_v57 = vpop.f32.mrf.mxu2  ;;  %v410_v58 = vpop.f32.mrf.mxu3 }
  0x9a   :  { %1399 = vst.msk [vmem:[#allocation2 + $0x108] sm:$0xff] %vm1365_vm2, %v1334_v52  ;;  %v1139_v60 = vmul.f32 %v1937_v4, %v1011_v57  ;;  %v918_v61 = vpop.f32.mrf.mxu1  ;;  %v536_v10 = vmul.f32 %v1930_v3, %v410_v58 }
  0x9b   :  { %1368 = vst.msk [vmem:[#allocation2 + $0x10] sm:$0xff] %vm1365_vm2, %v1303_v55  ;;  %v1108_v63 = vmul.f32 %v1937_v4, %v918_v61  ;;  %1467 = vmatmul.msk.f32.gmra.mxu0 %vm95_vm0, %v49_v54  ;;  %v572_v5 = vadd.f32 %v1946_v8, %v504_v56  ;;  %v52_v55 = vld [vmem:[%s2551_s0 + $0xb0] sm:$0xff] }
  0x9c   :  { %v1207_v2 = vadd.f32 %v1951_v9, %v1139_v60  ;;  %v604_v19 = vadd.f32 %v1946_v8, %v536_v10 }
  0x9d   :  { %v1176_v6 = vadd.f32 %v1951_v9, %v1108_v63  ;;  %1531 = vmatmul.msk.f32.gmra.mxu1 %vm699_vm1, %v652_v62  ;;  %v655_v63 = vld [vmem:[%s2552_s1 + $0xb0] sm:$0xff] }
  0x9e   :  { %v1271_v7 = vadd.f32 %v1207_v2, %v603_v59  ;;  %1563 = vmatmul.msk.f32.gmra.mxu2 %vm699_vm1, %v684_v0  ;;  %1500 = vmatmul.msk.f32.gmra.mxu3 %vm95_vm0, %v82_v1  ;;  %v687_v1 = vld [vmem:[%s2552_s1 + $0x1b0] sm:$0xff]  ;;  %v85_v2 = vld [vmem:[%s2551_s0 + $0x1b8] sm:$0xff] }
  0x9f   :  { %v1240_v11 = vadd.f32 %v1176_v6, %v572_v5 }
  0xa0   :  { %v1335_v12 = vmax.f32 %v1271_v7, 0.0  ;;  %v317_v13 = vpop.f32.mrf.mxu0 }
  0xa1   :  { %v1304_v15 = vmax.f32 %v1240_v11, 0.0  ;;  %v505_v16 = vmul.f32 %v1930_v3, %v317_v13  ;;  %v1014_v17 = vpop.f32.mrf.mxu2  ;;  %v413_v18 = vpop.f32.mrf.mxu3 }
  0xa2   :  { %1400 = vst.msk [vmem:[#allocation2 + $0x110] sm:$0xff] %vm1365_vm2, %v1335_v12  ;;  %v1140_v20 = vmul.f32 %v1937_v4, %v1014_v17  ;;  %v921_v21 = vpop.f32.mrf.mxu1  ;;  %v537_v31 = vmul.f32 %v1930_v3, %v413_v18 }
  0xa3   :  { %1369 = vst.msk [vmem:[#allocation2 + $0x18] sm:$0xff] %vm1365_vm2, %v1304_v15  ;;  %v1109_v24 = vmul.f32 %v1937_v4, %v921_v21  ;;  %1468 = vmatmul.msk.f32.gmra.mxu0 %vm95_vm0, %v50_v14  ;;  %v573_v28 = vadd.f32 %v1946_v8, %v505_v16  ;;  %v53_v15 = vld [vmem:[%s2551_s0 + $0xb8] sm:$0xff] }
  0xa4   :  { %v1208_v27 = vadd.f32 %v1951_v9, %v1140_v20  ;;  %v605_v40 = vadd.f32 %v1946_v8, %v537_v31 }
  0xa5   :  { %v1177_v29 = vadd.f32 %v1951_v9, %v1109_v24  ;;  %1532 = vmatmul.msk.f32.gmra.mxu1 %vm699_vm1, %v653_v23  ;;  %v656_v24 = vld [vmem:[%s2552_s1 + $0xb8] sm:$0xff] }
  0xa6   :  { %v1272_v30 = vadd.f32 %v1208_v27, %v604_v19  ;;  %1564 = vmatmul.msk.f32.gmra.mxu2 %vm699_vm1, %v685_v25  ;;  %1501 = vmatmul.msk.f32.gmra.mxu3 %vm95_vm0, %v83_v26  ;;  %v688_v26 = vld [vmem:[%s2552_s1 + $0x1b8] sm:$0xff]  ;;  %v86_v27 = vld [vmem:[%s2551_s0 + $0x1c0] sm:$0xff] }
  0xa7   :  { %v1241_v32 = vadd.f32 %v1177_v29, %v573_v28 }
  0xa8   :  { %v1336_v33 = vmax.f32 %v1272_v30, 0.0  ;;  %v320_v34 = vpop.f32.mrf.mxu0 }
  0xa9   :  { %v1305_v36 = vmax.f32 %v1241_v32, 0.0  ;;  %v506_v37 = vmul.f32 %v1930_v3, %v320_v34  ;;  %v1017_v38 = vpop.f32.mrf.mxu2  ;;  %v416_v39 = vpop.f32.mrf.mxu3 }
  0xaa   :  { %1401 = vst.msk [vmem:[#allocation2 + $0x118] sm:$0xff] %vm1365_vm2, %v1336_v33  ;;  %v1141_v41 = vmul.f32 %v1937_v4, %v1017_v38  ;;  %v924_v42 = vpop.f32.mrf.mxu1  ;;  %v538_v51 = vmul.f32 %v1930_v3, %v416_v39 }
  0xab   :  { %1370 = vst.msk [vmem:[#allocation2 + $0x20] sm:$0xff] %vm1365_vm2, %v1305_v36  ;;  %v1110_v44 = vmul.f32 %v1937_v4, %v924_v42  ;;  %1469 = vmatmul.msk.f32.gmra.mxu0 %vm95_vm0, %v51_v35  ;;  %v574_v48 = vadd.f32 %v1946_v8, %v506_v37  ;;  %v54_v36 = vld [vmem:[%s2551_s0 + $0xc0] sm:$0xff] }
  0xac   :  { %v1209_v47 = vadd.f32 %v1951_v9, %v1141_v41  ;;  %v606_v60 = vadd.f32 %v1946_v8, %v538_v51 }
  0xad   :  { %v1178_v49 = vadd.f32 %v1951_v9, %v1110_v44  ;;  %1533 = vmatmul.msk.f32.gmra.mxu1 %vm699_vm1, %v654_v43  ;;  %v657_v44 = vld [vmem:[%s2552_s1 + $0xc0] sm:$0xff] }
  0xae   :  { %v1273_v50 = vadd.f32 %v1209_v47, %v605_v40  ;;  %1565 = vmatmul.msk.f32.gmra.mxu2 %vm699_vm1, %v686_v45  ;;  %1502 = vmatmul.msk.f32.gmra.mxu3 %vm95_vm0, %v84_v46  ;;  %v689_v46 = vld [vmem:[%s2552_s1 + $0x1c0] sm:$0xff]  ;;  %v87_v47 = vld [vmem:[%s2551_s0 + $0x1c8] sm:$0xff] }
  0xaf   :  { %v1242_v52 = vadd.f32 %v1178_v49, %v574_v48 }
  0xb0   :  { %v1337_v53 = vmax.f32 %v1273_v50, 0.0  ;;  %v323_v54 = vpop.f32.mrf.mxu0 }
  0xb1   :  { %v1306_v56 = vmax.f32 %v1242_v52, 0.0  ;;  %v507_v57 = vmul.f32 %v1930_v3, %v323_v54  ;;  %v1020_v58 = vpop.f32.mrf.mxu2  ;;  %v419_v59 = vpop.f32.mrf.mxu3 }
  0xb2   :  { %1402 = vst.msk [vmem:[#allocation2 + $0x120] sm:$0xff] %vm1365_vm2, %v1337_v53  ;;  %v1142_v61 = vmul.f32 %v1937_v4, %v1020_v58  ;;  %v927_v62 = vpop.f32.mrf.mxu1  ;;  %v539_v11 = vmul.f32 %v1930_v3, %v419_v59 }
  0xb3   :  { %1371 = vst.msk [vmem:[#allocation2 + $0x28] sm:$0xff] %vm1365_vm2, %v1306_v56  ;;  %v1111_v0 = vmul.f32 %v1937_v4, %v927_v62  ;;  %1470 = vmatmul.msk.f32.gmra.mxu0 %vm95_vm0, %v52_v55  ;;  %v575_v6 = vadd.f32 %v1946_v8, %v507_v57  ;;  %v55_v56 = vld [vmem:[%s2551_s0 + $0xc8] sm:$0xff] }
  0xb4   :  { %v1210_v5 = vadd.f32 %v1951_v9, %v1142_v61  ;;  %v607_v20 = vadd.f32 %v1946_v8, %v539_v11 }
  0xb5   :  { %v1179_v7 = vadd.f32 %v1951_v9, %v1111_v0  ;;  %1534 = vmatmul.msk.f32.gmra.mxu1 %vm699_vm1, %v655_v63  ;;  %v658_v0 = vld [vmem:[%s2552_s1 + $0xc8] sm:$0xff] }
  0xb6   :  { %v1274_v10 = vadd.f32 %v1210_v5, %v606_v60  ;;  %1566 = vmatmul.msk.f32.gmra.mxu2 %vm699_vm1, %v687_v1  ;;  %1503 = vmatmul.msk.f32.gmra.mxu3 %vm95_vm0, %v85_v2  ;;  %v690_v2 = vld [vmem:[%s2552_s1 + $0x1c8] sm:$0xff]  ;;  %v88_v5 = vld [vmem:[%s2551_s0 + $0x1d0] sm:$0xff] }
  0xb7   :  { %v1243_v12 = vadd.f32 %v1179_v7, %v575_v6 }
  0xb8   :  { %v1338_v13 = vmax.f32 %v1274_v10, 0.0  ;;  %v326_v14 = vpop.f32.mrf.mxu0 }
  0xb9   :  { %v1307_v16 = vmax.f32 %v1243_v12, 0.0  ;;  %v508_v17 = vmul.f32 %v1930_v3, %v326_v14  ;;  %v1023_v18 = vpop.f32.mrf.mxu2  ;;  %v422_v19 = vpop.f32.mrf.mxu3 }
  0xba   :  { %1403 = vst.msk [vmem:[#allocation2 + $0x128] sm:$0xff] %vm1365_vm2, %v1338_v13  ;;  %v1143_v21 = vmul.f32 %v1937_v4, %v1023_v18  ;;  %v930_v23 = vpop.f32.mrf.mxu1  ;;  %v540_v32 = vmul.f32 %v1930_v3, %v422_v19 }
  0xbb   :  { %1372 = vst.msk [vmem:[#allocation2 + $0x30] sm:$0xff] %vm1365_vm2, %v1307_v16  ;;  %v1112_v25 = vmul.f32 %v1937_v4, %v930_v23  ;;  %1471 = vmatmul.msk.f32.gmra.mxu0 %vm95_vm0, %v53_v15  ;;  %v576_v29 = vadd.f32 %v1946_v8, %v508_v17  ;;  %v56_v16 = vld [vmem:[%s2551_s0 + $0xd0] sm:$0xff] }
  0xbc   :  { %v1211_v28 = vadd.f32 %v1951_v9, %v1143_v21  ;;  %v608_v41 = vadd.f32 %v1946_v8, %v540_v32 }
  0xbd   :  { %v1180_v30 = vadd.f32 %v1951_v9, %v1112_v25  ;;  %1535 = vmatmul.msk.f32.gmra.mxu1 %vm699_vm1, %v656_v24  ;;  %v659_v25 = vld [vmem:[%s2552_s1 + $0xd0] sm:$0xff] }
  0xbe   :  { %v1275_v31 = vadd.f32 %v1211_v28, %v607_v20  ;;  %1567 = vmatmul.msk.f32.gmra.mxu2 %vm699_vm1, %v688_v26  ;;  %1504 = vmatmul.msk.f32.gmra.mxu3 %vm95_vm0, %v86_v27  ;;  %v691_v27 = vld [vmem:[%s2552_s1 + $0x1d0] sm:$0xff]  ;;  %v89_v28 = vld [vmem:[%s2551_s0 + $0x1d8] sm:$0xff] }
  0xbf   :  { %v1244_v33 = vadd.f32 %v1180_v30, %v576_v29 }
  0xc0   :  { %v1339_v34 = vmax.f32 %v1275_v31, 0.0  ;;  %v329_v35 = vpop.f32.mrf.mxu0 }
  0xc1   :  { %v1308_v37 = vmax.f32 %v1244_v33, 0.0  ;;  %v509_v38 = vmul.f32 %v1930_v3, %v329_v35  ;;  %v1026_v39 = vpop.f32.mrf.mxu2  ;;  %v425_v40 = vpop.f32.mrf.mxu3 }
  0xc2   :  { %1404 = vst.msk [vmem:[#allocation2 + $0x130] sm:$0xff] %vm1365_vm2, %v1339_v34  ;;  %v1144_v42 = vmul.f32 %v1937_v4, %v1026_v39  ;;  %v933_v43 = vpop.f32.mrf.mxu1  ;;  %v541_v52 = vmul.f32 %v1930_v3, %v425_v40 }
  0xc3   :  { %1373 = vst.msk [vmem:[#allocation2 + $0x38] sm:$0xff] %vm1365_vm2, %v1308_v37  ;;  %v1113_v45 = vmul.f32 %v1937_v4, %v933_v43  ;;  %1472 = vmatmul.msk.f32.gmra.mxu0 %vm95_vm0, %v54_v36  ;;  %v577_v49 = vadd.f32 %v1946_v8, %v509_v38  ;;  %v57_v37 = vld [vmem:[%s2551_s0 + $0xd8] sm:$0xff] }
  0xc4   :  { %v1212_v48 = vadd.f32 %v1951_v9, %v1144_v42  ;;  %v609_v61 = vadd.f32 %v1946_v8, %v541_v52 }
  0xc5   :  { %v1181_v50 = vadd.f32 %v1951_v9, %v1113_v45  ;;  %1536 = vmatmul.msk.f32.gmra.mxu1 %vm699_vm1, %v657_v44  ;;  %v660_v45 = vld [vmem:[%s2552_s1 + $0xd8] sm:$0xff] }
  0xc6   :  { %v1276_v51 = vadd.f32 %v1212_v48, %v608_v41  ;;  %1568 = vmatmul.msk.f32.gmra.mxu2 %vm699_vm1, %v689_v46  ;;  %1505 = vmatmul.msk.f32.gmra.mxu3 %vm95_vm0, %v87_v47  ;;  %v692_v47 = vld [vmem:[%s2552_s1 + $0x1d8] sm:$0xff]  ;;  %v90_v48 = vld [vmem:[%s2551_s0 + $0x1e0] sm:$0xff] }
  0xc7   :  { %v1245_v53 = vadd.f32 %v1181_v50, %v577_v49 }
  0xc8   :  { %v1340_v54 = vmax.f32 %v1276_v51, 0.0  ;;  %v332_v55 = vpop.f32.mrf.mxu0 }
  0xc9   :  { %v1309_v57 = vmax.f32 %v1245_v53, 0.0  ;;  %v510_v58 = vmul.f32 %v1930_v3, %v332_v55  ;;  %v1029_v59 = vpop.f32.mrf.mxu2  ;;  %v428_v60 = vpop.f32.mrf.mxu3 }
  0xca   :  { %1405 = vst.msk [vmem:[#allocation2 + $0x138] sm:$0xff] %vm1365_vm2, %v1340_v54  ;;  %v1145_v62 = vmul.f32 %v1937_v4, %v1029_v59  ;;  %v936_v63 = vpop.f32.mrf.mxu1  ;;  %v542_v12 = vmul.f32 %v1930_v3, %v428_v60 }
  0xcb   :  { %1374 = vst.msk [vmem:[#allocation2 + $0x40] sm:$0xff] %vm1365_vm2, %v1309_v57  ;;  %v1114_v1 = vmul.f32 %v1937_v4, %v936_v63  ;;  %1473 = vmatmul.msk.f32.gmra.mxu0 %vm95_vm0, %v55_v56  ;;  %v578_v7 = vadd.f32 %v1946_v8, %v510_v58  ;;  %v58_v57 = vld [vmem:[%s2551_s0 + $0xe0] sm:$0xff] }
  0xcc   :  { %v1213_v6 = vadd.f32 %v1951_v9, %v1145_v62  ;;  %v610_v21 = vadd.f32 %v1946_v8, %v542_v12 }
  0xcd   :  { %v1182_v10 = vadd.f32 %v1951_v9, %v1114_v1  ;;  %1537 = vmatmul.msk.f32.gmra.mxu1 %vm699_vm1, %v658_v0  ;;  %v661_v1 = vld [vmem:[%s2552_s1 + $0xe0] sm:$0xff] }
  0xce   :  { %v1277_v11 = vadd.f32 %v1213_v6, %v609_v61  ;;  %1569 = vmatmul.msk.f32.gmra.mxu2 %vm699_vm1, %v690_v2  ;;  %1506 = vmatmul.msk.f32.gmra.mxu3 %vm95_vm0, %v88_v5  ;;  %v693_v5 = vld [vmem:[%s2552_s1 + $0x1e0] sm:$0xff]  ;;  %v91_v6 = vld [vmem:[%s2551_s0 + $0x1e8] sm:$0xff] }
  0xcf   :  { %v1246_v13 = vadd.f32 %v1182_v10, %v578_v7 }
  0xd0   :  { %v1341_v14 = vmax.f32 %v1277_v11, 0.0  ;;  %v335_v15 = vpop.f32.mrf.mxu0 }
  0xd1   :  { %v1310_v17 = vmax.f32 %v1246_v13, 0.0  ;;  %v511_v18 = vmul.f32 %v1930_v3, %v335_v15  ;;  %v1032_v19 = vpop.f32.mrf.mxu2  ;;  %v431_v20 = vpop.f32.mrf.mxu3 }
  0xd2   :  { %1406 = vst.msk [vmem:[#allocation2 + $0x140] sm:$0xff] %vm1365_vm2, %v1341_v14  ;;  %v1146_v23 = vmul.f32 %v1937_v4, %v1032_v19  ;;  %v939_v24 = vpop.f32.mrf.mxu1  ;;  %v543_v33 = vmul.f32 %v1930_v3, %v431_v20 }
  0xd3   :  { %1375 = vst.msk [vmem:[#allocation2 + $0x48] sm:$0xff] %vm1365_vm2, %v1310_v17  ;;  %v1115_v26 = vmul.f32 %v1937_v4, %v939_v24  ;;  %1474 = vmatmul.msk.f32.gmra.mxu0 %vm95_vm0, %v56_v16  ;;  %v579_v30 = vadd.f32 %v1946_v8, %v511_v18  ;;  %v59_v17 = vld [vmem:[%s2551_s0 + $0xe8] sm:$0xff] }
  0xd4   :  { %v1214_v29 = vadd.f32 %v1951_v9, %v1146_v23  ;;  %v611_v42 = vadd.f32 %v1946_v8, %v543_v33 }
  0xd5   :  { %v1183_v31 = vadd.f32 %v1951_v9, %v1115_v26  ;;  %1538 = vmatmul.msk.f32.gmra.mxu1 %vm699_vm1, %v659_v25  ;;  %v662_v26 = vld [vmem:[%s2552_s1 + $0xe8] sm:$0xff] }
  0xd6   :  { %v1278_v32 = vadd.f32 %v1214_v29, %v610_v21  ;;  %1570 = vmatmul.msk.f32.gmra.mxu2 %vm699_vm1, %v691_v27  ;;  %1507 = vmatmul.msk.f32.gmra.mxu3 %vm95_vm0, %v89_v28  ;;  %v694_v28 = vld [vmem:[%s2552_s1 + $0x1e8] sm:$0xff]  ;;  %v92_v29 = vld [vmem:[%s2551_s0 + $0x1f0] sm:$0xff] }
  0xd7   :  { %v1247_v34 = vadd.f32 %v1183_v31, %v579_v30 }
  0xd8   :  { %v1342_v35 = vmax.f32 %v1278_v32, 0.0  ;;  %v338_v36 = vpop.f32.mrf.mxu0 }
  0xd9   :  { %v1311_v38 = vmax.f32 %v1247_v34, 0.0  ;;  %v512_v39 = vmul.f32 %v1930_v3, %v338_v36  ;;  %v1035_v40 = vpop.f32.mrf.mxu2  ;;  %v434_v41 = vpop.f32.mrf.mxu3 }
  0xda   :  { %1407 = vst.msk [vmem:[#allocation2 + $0x148] sm:$0xff] %vm1365_vm2, %v1342_v35  ;;  %v1147_v43 = vmul.f32 %v1937_v4, %v1035_v40  ;;  %v942_v44 = vpop.f32.mrf.mxu1  ;;  %v544_v53 = vmul.f32 %v1930_v3, %v434_v41 }
  0xdb   :  { %1376 = vst.msk [vmem:[#allocation2 + $0x50] sm:$0xff] %vm1365_vm2, %v1311_v38  ;;  %v1116_v46 = vmul.f32 %v1937_v4, %v942_v44  ;;  %1475 = vmatmul.msk.f32.gmra.mxu0 %vm95_vm0, %v57_v37  ;;  %v580_v50 = vadd.f32 %v1946_v8, %v512_v39  ;;  %v60_v38 = vld [vmem:[%s2551_s0 + $0xf0] sm:$0xff] }
  0xdc   :  { %v1215_v49 = vadd.f32 %v1951_v9, %v1147_v43  ;;  %v612_v62 = vadd.f32 %v1946_v8, %v544_v53 }
  0xdd   :  { %v1184_v51 = vadd.f32 %v1951_v9, %v1116_v46  ;;  %1539 = vmatmul.msk.f32.gmra.mxu1 %vm699_vm1, %v660_v45  ;;  %v663_v46 = vld [vmem:[%s2552_s1 + $0xf0] sm:$0xff] }
  0xde   :  { %v1279_v52 = vadd.f32 %v1215_v49, %v611_v42  ;;  %1571 = vmatmul.msk.f32.gmra.mxu2 %vm699_vm1, %v692_v47  ;;  %1508 = vmatmul.msk.f32.gmra.mxu3 %vm95_vm0, %v90_v48  ;;  %v695_v48 = vld [vmem:[%s2552_s1 + $0x1f0] sm:$0xff]  ;;  %v93_v49 = vld [vmem:[%s2551_s0 + $0x1f8] sm:$0xff] }
  0xdf   :  { %v1248_v54 = vadd.f32 %v1184_v51, %v580_v50 }
  0xe0   :  { %v1343_v55 = vmax.f32 %v1279_v52, 0.0  ;;  %v341_v56 = vpop.f32.mrf.mxu0 }
  0xe1   :  { %v1312_v58 = vmax.f32 %v1248_v54, 0.0  ;;  %v513_v59 = vmul.f32 %v1930_v3, %v341_v56  ;;  %v1038_v60 = vpop.f32.mrf.mxu2  ;;  %v437_v61 = vpop.f32.mrf.mxu3 }
  0xe2   :  { %1408 = vst.msk [vmem:[#allocation2 + $0x150] sm:$0xff] %vm1365_vm2, %v1343_v55  ;;  %v1148_v63 = vmul.f32 %v1937_v4, %v1038_v60  ;;  %v945_v0 = vpop.f32.mrf.mxu1  ;;  %v545_v13 = vmul.f32 %v1930_v3, %v437_v61 }
  0xe3   :  { %1377 = vst.msk [vmem:[#allocation2 + $0x58] sm:$0xff] %vm1365_vm2, %v1312_v58  ;;  %v1117_v2 = vmul.f32 %v1937_v4, %v945_v0  ;;  %1476 = vmatmul.msk.f32.gmra.mxu0 %vm95_vm0, %v58_v57  ;;  %v581_v10 = vadd.f32 %v1946_v8, %v513_v59  ;;  %v61_v58 = vld [vmem:[%s2551_s0 + $0xf8] sm:$0xff] }
  0xe4   :  { %v1216_v7 = vadd.f32 %v1951_v9, %v1148_v63  ;;  %v613_v23 = vadd.f32 %v1946_v8, %v545_v13 }
  0xe5   :  { %v1185_v11 = vadd.f32 %v1951_v9, %v1117_v2  ;;  %1540 = vmatmul.msk.f32.gmra.mxu1 %vm699_vm1, %v661_v1  ;;  %v664_v2 = vld [vmem:[%s2552_s1 + $0xf8] sm:$0xff] }
  0xe6   :  { %v1280_v12 = vadd.f32 %v1216_v7, %v612_v62  ;;  %1572 = vmatmul.msk.f32.gmra.mxu2 %vm699_vm1, %v693_v5  ;;  %1509 = vmatmul.msk.f32.gmra.mxu3 %vm95_vm0, %v91_v6  ;;  %v696_v6 = vld [vmem:[%s2552_s1 + $0x1f8] sm:$0xff] }
  0xe7   :  { %v1249_v14 = vadd.f32 %v1185_v11, %v581_v10 }
  0xe8   :  { %v1344_v15 = vmax.f32 %v1280_v12, 0.0  ;;  %v344_v16 = vpop.f32.mrf.mxu0 }
  0xe9   :  { %v1313_v18 = vmax.f32 %v1249_v14, 0.0  ;;  %v514_v19 = vmul.f32 %v1930_v3, %v344_v16  ;;  %v1041_v20 = vpop.f32.mrf.mxu2  ;;  %v440_v21 = vpop.f32.mrf.mxu3 }
  0xea   :  { %1409 = vst.msk [vmem:[#allocation2 + $0x158] sm:$0xff] %vm1365_vm2, %v1344_v15  ;;  %v1149_v24 = vmul.f32 %v1937_v4, %v1041_v20  ;;  %v948_v25 = vpop.f32.mrf.mxu1  ;;  %v546_v34 = vmul.f32 %v1930_v3, %v440_v21 }
  0xeb   :  { %1378 = vst.msk [vmem:[#allocation2 + $0x60] sm:$0xff] %vm1365_vm2, %v1313_v18  ;;  %v1118_v27 = vmul.f32 %v1937_v4, %v948_v25  ;;  %1477 = vmatmul.msk.f32.gmra.mxu0 %vm95_vm0, %v59_v17  ;;  %v582_v31 = vadd.f32 %v1946_v8, %v514_v19  ;;  %v62_v17 = vld [vmem:[%s2551_s0 + $0x100] sm:$0xff] }
  0xec   :  { %v1217_v30 = vadd.f32 %v1951_v9, %v1149_v24  ;;  %v614_v43 = vadd.f32 %v1946_v8, %v546_v34 }
  0xed   :  { %v1186_v32 = vadd.f32 %v1951_v9, %v1118_v27  ;;  %1541 = vmatmul.msk.f32.gmra.mxu1 %vm699_vm1, %v662_v26 }
  0xee   :  { %v1281_v33 = vadd.f32 %v1217_v30, %v613_v23  ;;  %1573 = vmatmul.msk.f32.gmra.mxu2 %vm699_vm1, %v694_v28  ;;  %1510 = vmatmul.msk.f32.gmra.mxu3 %vm95_vm0, %v92_v29 }
  0xef   :  { %v1250_v35 = vadd.f32 %v1186_v32, %v582_v31 }
  0xf0   :  { %v1345_v36 = vmax.f32 %v1281_v33, 0.0  ;;  %v347_v37 = vpop.f32.mrf.mxu0 }
  0xf1   :  { %v1314_v39 = vmax.f32 %v1250_v35, 0.0  ;;  %v515_v40 = vmul.f32 %v1930_v3, %v347_v37  ;;  %v1044_v41 = vpop.f32.mrf.mxu2  ;;  %v443_v42 = vpop.f32.mrf.mxu3 }
  0xf2   :  { %1410 = vst.msk [vmem:[#allocation2 + $0x160] sm:$0xff] %vm1365_vm2, %v1345_v36  ;;  %v1150_v44 = vmul.f32 %v1937_v4, %v1044_v41  ;;  %v951_v45 = vpop.f32.mrf.mxu1  ;;  %v547_v54 = vmul.f32 %v1930_v3, %v443_v42 }
  0xf3   :  { %1379 = vst.msk [vmem:[#allocation2 + $0x68] sm:$0xff] %vm1365_vm2, %v1314_v39  ;;  %v1119_v47 = vmul.f32 %v1937_v4, %v951_v45  ;;  %1478 = vmatmul.msk.f32.gmra.mxu0 %vm95_vm0, %v60_v38  ;;  %v583_v51 = vadd.f32 %v1946_v8, %v515_v40 }
  0xf4   :  { %v1218_v50 = vadd.f32 %v1951_v9, %v1150_v44  ;;  %v615_v63 = vadd.f32 %v1946_v8, %v547_v54 }
  0xf5   :  { %v1187_v52 = vadd.f32 %v1951_v9, %v1119_v47  ;;  %1542 = vmatmul.msk.f32.gmra.mxu1 %vm699_vm1, %v663_v46 }
  0xf6   :  { %v1282_v53 = vadd.f32 %v1218_v50, %v614_v43  ;;  %1574 = vmatmul.msk.f32.gmra.mxu2 %vm699_vm1, %v695_v48  ;;  %1511 = vmatmul.msk.f32.gmra.mxu3 %vm95_vm0, %v93_v49 }
  0xf7   :  { %v1251_v55 = vadd.f32 %v1187_v52, %v583_v51 }
  0xf8   :  { %v1346_v56 = vmax.f32 %v1282_v53, 0.0  ;;  %v350_v57 = vpop.f32.mrf.mxu0 }
  0xf9   :  { %v1315_v59 = vmax.f32 %v1251_v55, 0.0  ;;  %v516_v60 = vmul.f32 %v1930_v3, %v350_v57  ;;  %v1047_v61 = vpop.f32.mrf.mxu2  ;;  %v446_v62 = vpop.f32.mrf.mxu3 }
  0xfa   :  { %1411 = vst.msk [vmem:[#allocation2 + $0x168] sm:$0xff] %vm1365_vm2, %v1346_v56  ;;  %v1151_v0 = vmul.f32 %v1937_v4, %v1047_v61  ;;  %v954_v1 = vpop.f32.mrf.mxu1  ;;  %v548_v13 = vmul.f32 %v1930_v3, %v446_v62 }
  0xfb   :  { %1380 = vst.msk [vmem:[#allocation2 + $0x70] sm:$0xff] %vm1365_vm2, %v1315_v59  ;;  %v1120_v5 = vmul.f32 %v1937_v4, %v954_v1  ;;  %1479 = vmatmul.msk.f32.gmra.mxu0 %vm95_vm0, %v61_v58  ;;  %v584_v10 = vadd.f32 %v1946_v8, %v516_v60 }
  0xfc   :  { %v1219_v7 = vadd.f32 %v1951_v9, %v1151_v0  ;;  %v616_v23 = vadd.f32 %v1946_v8, %v548_v13 }
  0xfd   :  { %v1188_v11 = vadd.f32 %v1951_v9, %v1120_v5  ;;  %1543 = vmatmul.msk.f32.gmra.mxu1 %vm699_vm1, %v664_v2 }
  0xfe   :  { %v1283_v12 = vadd.f32 %v1219_v7, %v615_v63  ;;  %1575 = vmatmul.msk.f32.gmra.mxu2 %vm699_vm1, %v696_v6 }
  0xff   :  { %v1252_v14 = vadd.f32 %v1188_v11, %v584_v10 }
 0x100   :  { %v1347_v15 = vmax.f32 %v1283_v12, 0.0  ;;  %v353_v16 = vpop.f32.mrf.mxu0 }
 0x101   :  { %v1316_v18 = vmax.f32 %v1252_v14, 0.0  ;;  %v517_v19 = vmul.f32 %v1930_v3, %v353_v16  ;;  %v1050_v20 = vpop.f32.mrf.mxu2  ;;  %v449_v21 = vpop.f32.mrf.mxu3 }
 0x102   :  { %1412 = vst.msk [vmem:[#allocation2 + $0x170] sm:$0xff] %vm1365_vm2, %v1347_v15  ;;  %v1152_v24 = vmul.f32 %v1937_v4, %v1050_v20  ;;  %v957_v25 = vpop.f32.mrf.mxu1  ;;  %v549_v31 = vmul.f32 %v1930_v3, %v449_v21 }
 0x103   :  { %1381 = vst.msk [vmem:[#allocation2 + $0x78] sm:$0xff] %vm1365_vm2, %v1316_v18  ;;  %v1121_v26 = vmul.f32 %v1937_v4, %v957_v25  ;;  %1480 = vmatmul.msk.f32.gmra.mxu0 %vm95_vm0, %v62_v17  ;;  %v585_v28 = vadd.f32 %v1946_v8, %v517_v19 }
 0x104   :  { %v1220_v27 = vadd.f32 %v1951_v9, %v1152_v24  ;;  %v617_v39 = vadd.f32 %v1946_v8, %v549_v31 }
 0x105   :  { %v1189_v29 = vadd.f32 %v1951_v9, %v1121_v26 }
 0x106   :  { %v1284_v30 = vadd.f32 %v1220_v27, %v616_v23 }
 0x107   :  { %v1253_v32 = vadd.f32 %v1189_v29, %v585_v28 }
 0x108   :  { %v1348_v33 = vmax.f32 %v1284_v30, 0.0  ;;  %v356_v34 = vpop.f32.mrf.mxu0 }
 0x109   :  { %v1317_v35 = vmax.f32 %v1253_v32, 0.0  ;;  %v518_v36 = vmul.f32 %v1930_v3, %v356_v34  ;;  %v1053_v37 = vpop.f32.mrf.mxu2  ;;  %v452_v38 = vpop.f32.mrf.mxu3 }
 0x10a   :  { %1413 = vst.msk [vmem:[#allocation2 + $0x178] sm:$0xff] %vm1365_vm2, %v1348_v33  ;;  %v1153_v40 = vmul.f32 %v1937_v4, %v1053_v37  ;;  %v960_v41 = vpop.f32.mrf.mxu1  ;;  %v550_v47 = vmul.f32 %v1930_v3, %v452_v38 }
 0x10b   :  { %1382 = vst.msk [vmem:[#allocation2 + $0x80] sm:$0xff] %vm1365_vm2, %v1317_v35  ;;  %v1122_v42 = vmul.f32 %v1937_v4, %v960_v41  ;;  %v586_v44 = vadd.f32 %v1946_v8, %v518_v36 }
 0x10c   :  { %v1221_v43 = vadd.f32 %v1951_v9, %v1153_v40  ;;  %v618_v55 = vadd.f32 %v1946_v8, %v550_v47 }
 0x10d   :  { %v1190_v45 = vadd.f32 %v1951_v9, %v1122_v42 }
 0x10e   :  { %v1285_v46 = vadd.f32 %v1221_v43, %v617_v39 }
 0x10f   :  { %v1254_v48 = vadd.f32 %v1190_v45, %v586_v44 }
 0x110   :  { %v1349_v49 = vmax.f32 %v1285_v46, 0.0  ;;  %v359_v50 = vpop.f32.mrf.mxu0 }
 0x111   :  { %v1318_v51 = vmax.f32 %v1254_v48, 0.0  ;;  %v519_v52 = vmul.f32 %v1930_v3, %v359_v50  ;;  %v1056_v53 = vpop.f32.mrf.mxu2  ;;  %v455_v54 = vpop.f32.mrf.mxu3 }
 0x112   :  { %1414 = vst.msk [vmem:[#allocation2 + $0x180] sm:$0xff] %vm1365_vm2, %v1349_v49  ;;  %v1154_v56 = vmul.f32 %v1937_v4, %v1056_v53  ;;  %v963_v57 = vpop.f32.mrf.mxu1  ;;  %v551_v63 = vmul.f32 %v1930_v3, %v455_v54 }
 0x113   :  { %1383 = vst.msk [vmem:[#allocation2 + $0x88] sm:$0xff] %vm1365_vm2, %v1318_v51  ;;  %v1123_v58 = vmul.f32 %v1937_v4, %v963_v57  ;;  %v587_v60 = vadd.f32 %v1946_v8, %v519_v52  ;;  %v2419_v57 = vld [vmem:[%s2555_s4] ss:$0 sm:$0xff] }
 0x114   :  { %v1222_v59 = vadd.f32 %v1951_v9, %v1154_v56  ;;  %v619_v11 = vadd.f32 %v1946_v8, %v551_v63  ;;  %v2440_v63 = vld [vmem:[%s2558_s7] ss:$0 sm:$0xff] }
 0x115   :  { %v1191_v61 = vadd.f32 %v1951_v9, %v1123_v58 }
 0x116   :  { %v1286_v62 = vadd.f32 %v1222_v59, %v618_v55 }
 0x117   :  { %v1255_v0 = vadd.f32 %v1191_v61, %v587_v60 }
 0x118   :  { %v1350_v1 = vmax.f32 %v1286_v62, 0.0  ;;  %v362_v2 = vpop.f32.mrf.mxu0 }
 0x119   :  { %v1319_v5 = vmax.f32 %v1255_v0, 0.0  ;;  %v520_v6 = vmul.f32 %v1930_v3, %v362_v2  ;;  %v1059_v7 = vpop.f32.mrf.mxu2  ;;  %v458_v10 = vpop.f32.mrf.mxu3 }
 0x11a   :  { %1415 = vst.msk [vmem:[#allocation2 + $0x188] sm:$0xff] %vm1365_vm2, %v1350_v1  ;;  %v1155_v12 = vmul.f32 %v1937_v4, %v1059_v7  ;;  %v966_v13 = vpop.f32.mrf.mxu1  ;;  %v552_v19 = vmul.f32 %v1930_v3, %v458_v10 }
 0x11b   :  { %1384 = vst.msk [vmem:[#allocation2 + $0x90] sm:$0xff] %vm1365_vm2, %v1319_v5  ;;  %v1124_v14 = vmul.f32 %v1937_v4, %v966_v13  ;;  %v588_v16 = vadd.f32 %v1946_v8, %v520_v6 }
 0x11c   :  { %v1223_v15 = vadd.f32 %v1951_v9, %v1155_v12  ;;  %v620_v28 = vadd.f32 %v1946_v8, %v552_v19 }
 0x11d   :  { %v1192_v17 = vadd.f32 %v1951_v9, %v1124_v14 }
 0x11e   :  { %v1287_v18 = vadd.f32 %v1223_v15, %v619_v11 }
 0x11f   :  { %v1256_v20 = vadd.f32 %v1192_v17, %v588_v16 }
 0x120   :  { %v1351_v21 = vmax.f32 %v1287_v18, 0.0  ;;  %v365_v23 = vpop.f32.mrf.mxu0 }
 0x121   :  { %v1320_v24 = vmax.f32 %v1256_v20, 0.0  ;;  %v521_v25 = vmul.f32 %v1930_v3, %v365_v23  ;;  %v1062_v26 = vpop.f32.mrf.mxu2  ;;  %v461_v27 = vpop.f32.mrf.mxu3 }
 0x122   :  { %1416 = vst.msk [vmem:[#allocation2 + $0x190] sm:$0xff] %vm1365_vm2, %v1351_v21  ;;  %v1156_v29 = vmul.f32 %v1937_v4, %v1062_v26  ;;  %v969_v30 = vpop.f32.mrf.mxu1  ;;  %v553_v36 = vmul.f32 %v1930_v3, %v461_v27 }
 0x123   :  { %1385 = vst.msk [vmem:[#allocation2 + $0x98] sm:$0xff] %vm1365_vm2, %v1320_v24  ;;  %v1125_v31 = vmul.f32 %v1937_v4, %v969_v30  ;;  %v589_v33 = vadd.f32 %v1946_v8, %v521_v25 }
 0x124   :  { %v1224_v32 = vadd.f32 %v1951_v9, %v1156_v29  ;;  %v621_v44 = vadd.f32 %v1946_v8, %v553_v36 }
 0x125   :  { %v1193_v34 = vadd.f32 %v1951_v9, %v1125_v31 }
 0x126   :  { %v1288_v35 = vadd.f32 %v1224_v32, %v620_v28 }
 0x127   :  { %v1257_v37 = vadd.f32 %v1193_v34, %v589_v33 }
 0x128   :  { %v1352_v38 = vmax.f32 %v1288_v35, 0.0  ;;  %v368_v39 = vpop.f32.mrf.mxu0 }
 0x129   :  { %v1321_v40 = vmax.f32 %v1257_v37, 0.0  ;;  %v522_v41 = vmul.f32 %v1930_v3, %v368_v39  ;;  %v1065_v42 = vpop.f32.mrf.mxu2  ;;  %v464_v43 = vpop.f32.mrf.mxu3 }
 0x12a   :  { %1417 = vst.msk [vmem:[#allocation2 + $0x198] sm:$0xff] %vm1365_vm2, %v1352_v38  ;;  %v1157_v45 = vmul.f32 %v1937_v4, %v1065_v42  ;;  %v972_v46 = vpop.f32.mrf.mxu1  ;;  %v554_v52 = vmul.f32 %v1930_v3, %v464_v43 }
 0x12b   :  { %1386 = vst.msk [vmem:[#allocation2 + $0xa0] sm:$0xff] %vm1365_vm2, %v1321_v40  ;;  %v1126_v47 = vmul.f32 %v1937_v4, %v972_v46  ;;  %v590_v49 = vadd.f32 %v1946_v8, %v522_v41  ;;  %v2426_v8 = vld [vmem:[%s2556_s5] ss:$0 sm:$0xff]  ;;  %s1616_s5 = smov [#allocation2]  }
 0x12c   :  { %v1225_v48 = vadd.f32 %v1951_v9, %v1157_v45  ;;  %v622_v3 = vadd.f32 %v2426_v8, %v554_v52 }
 0x12d   :  { %v1194_v50 = vadd.f32 %v1951_v9, %v1126_v47  ;;  %v2432_v9 = vld [vmem:[%s2557_s6] ss:$0 sm:$0xff]  ;;  %s1434_s6 = sshll.u32 %s1616_s5, 4  ;;  %s1435_s6 = int_to_ptr.vmem [resolvable:$true] %s1434_s6 }
 0x12e   :  { %v1289_v51 = vadd.f32 %v1225_v48, %v621_v44 }
 0x12f   :  { %v1258_v53 = vadd.f32 %v1194_v50, %v590_v49 }
 0x130   :  { %v1353_v54 = vmax.f32 %v1289_v51, 0.0  ;;  %v371_v55 = vpop.f32.mrf.mxu0 }
 0x131   :  { %v1322_v56 = vmax.f32 %v1258_v53, 0.0  ;;  %v523_v4 = vmul.f32 %v2419_v57, %v371_v55  ;;  %v1068_v58 = vpop.f32.mrf.mxu2  ;;  %v467_v59 = vpop.f32.mrf.mxu3 }
 0x132   :  { %1418 = vst.msk [vmem:[#allocation2 + $0x1a0] sm:$0xff] %vm1365_vm2, %v1353_v54  ;;  %v1158_v60 = vmul.f32 %v2432_v9, %v1068_v58  ;;  %v975_v61 = vpop.f32.mrf.mxu1  ;;  %v555_v6 = vmul.f32 %v2419_v57, %v467_v59 }
 0x133   :  { %1387 = vst.msk [vmem:[#allocation2 + $0xa8] sm:$0xff] %vm1365_vm2, %v1322_v56  ;;  %v1127_v62 = vmul.f32 %v2432_v9, %v975_v61  ;;  %v591_v1 = vadd.f32 %v2426_v8, %v523_v4 }
 0x134   :  { %v1226_v0 = vadd.f32 %v2440_v63, %v1158_v60  ;;  %v623_v16 = vadd.f32 %v2426_v8, %v555_v6 }
 0x135   :  { %v1195_v2 = vadd.f32 %v2440_v63, %v1127_v62 }
 0x136   :  { %v1290_v5 = vadd.f32 %v1226_v0, %v622_v3 }
 0x137   :  { %v1259_v7 = vadd.f32 %v1195_v2, %v591_v1 }
 0x138   :  { %v1354_v10 = vmax.f32 %v1290_v5, 0.0  ;;  %v374_v11 = vpop.f32.mrf.mxu0 }
 0x139   :  { %v1323_v12 = vmax.f32 %v1259_v7, 0.0  ;;  %v524_v13 = vmul.f32 %v2419_v57, %v374_v11  ;;  %v1071_v14 = vpop.f32.mrf.mxu2  ;;  %v470_v15 = vpop.f32.mrf.mxu3 }
 0x13a   :  { %1419 = vst.msk [vmem:[#allocation2 + $0x1a8] sm:$0xff] %vm1365_vm2, %v1354_v10  ;;  %v1159_v17 = vmul.f32 %v2432_v9, %v1071_v14  ;;  %v978_v18 = vpop.f32.mrf.mxu1  ;;  %v556_v25 = vmul.f32 %v2419_v57, %v470_v15 }
 0x13b   :  { %1388 = vst.msk [vmem:[#allocation2 + $0xb0] sm:$0xff] %vm1365_vm2, %v1323_v12  ;;  %v1128_v19 = vmul.f32 %v2432_v9, %v978_v18  ;;  %v592_v21 = vadd.f32 %v2426_v8, %v524_v13 }
 0x13c   :  { %v1227_v20 = vadd.f32 %v2440_v63, %v1159_v17  ;;  %v624_v33 = vadd.f32 %v2426_v8, %v556_v25 }
 0x13d   :  { %v1196_v23 = vadd.f32 %v2440_v63, %v1128_v19 }
 0x13e   :  { %v1291_v24 = vadd.f32 %v1227_v20, %v623_v16 }
 0x13f   :  { %v1260_v26 = vadd.f32 %v1196_v23, %v592_v21 }
 0x140   :  { %v1355_v27 = vmax.f32 %v1291_v24, 0.0  ;;  %v377_v28 = vpop.f32.mrf.mxu0 }
 0x141   :  { %v1324_v29 = vmax.f32 %v1260_v26, 0.0  ;;  %v525_v30 = vmul.f32 %v2419_v57, %v377_v28  ;;  %v1074_v31 = vpop.f32.mrf.mxu2  ;;  %v473_v32 = vpop.f32.mrf.mxu3 }
 0x142   :  { %1420 = vst.msk [vmem:[#allocation2 + $0x1b0] sm:$0xff] %vm1365_vm2, %v1355_v27  ;;  %v1160_v34 = vmul.f32 %v2432_v9, %v1074_v31  ;;  %v981_v35 = vpop.f32.mrf.mxu1  ;;  %v557_v41 = vmul.f32 %v2419_v57, %v473_v32 }
 0x143   :  { %1389 = vst.msk [vmem:[#allocation2 + $0xb8] sm:$0xff] %vm1365_vm2, %v1324_v29  ;;  %v1129_v36 = vmul.f32 %v2432_v9, %v981_v35  ;;  %v593_v38 = vadd.f32 %v2426_v8, %v525_v30 }
 0x144   :  { %v1228_v37 = vadd.f32 %v2440_v63, %v1160_v34  ;;  %v625_v49 = vadd.f32 %v2426_v8, %v557_v41 }
 0x145   :  { %v1197_v39 = vadd.f32 %v2440_v63, %v1129_v36 }
 0x146   :  { %v1292_v40 = vadd.f32 %v1228_v37, %v624_v33 }
 0x147   :  { %v1261_v42 = vadd.f32 %v1197_v39, %v593_v38 }
 0x148   :  { %v1356_v43 = vmax.f32 %v1292_v40, 0.0  ;;  %v380_v44 = vpop.f32.mrf.mxu0 }
 0x149   :  { %v1325_v45 = vmax.f32 %v1261_v42, 0.0  ;;  %v526_v46 = vmul.f32 %v2419_v57, %v380_v44  ;;  %v1077_v47 = vpop.f32.mrf.mxu2  ;;  %v476_v48 = vpop.f32.mrf.mxu3 }
 0x14a   :  { %1421 = vst.msk [vmem:[#allocation2 + $0x1b8] sm:$0xff] %vm1365_vm2, %v1356_v43  ;;  %v1161_v50 = vmul.f32 %v2432_v9, %v1077_v47  ;;  %v984_v51 = vpop.f32.mrf.mxu1  ;;  %v558_v4 = vmul.f32 %v2419_v57, %v476_v48 }
 0x14b   :  { %1390 = vst.msk [vmem:[#allocation2 + $0xc0] sm:$0xff] %vm1365_vm2, %v1325_v45  ;;  %v1130_v52 = vmul.f32 %v2432_v9, %v984_v51  ;;  %v594_v54 = vadd.f32 %v2426_v8, %v526_v46 }
 0x14c   :  { %v1229_v53 = vadd.f32 %v2440_v63, %v1161_v50  ;;  %v626_v1 = vadd.f32 %v2426_v8, %v558_v4 }
 0x14d   :  { %v1198_v55 = vadd.f32 %v2440_v63, %v1130_v52 }
 0x14e   :  { %v1293_v56 = vadd.f32 %v1229_v53, %v625_v49 }
 0x14f   :  { %v1262_v58 = vadd.f32 %v1198_v55, %v594_v54 }
 0x150   :  { %v1357_v59 = vmax.f32 %v1293_v56, 0.0  ;;  %v383_v3 = vpop.f32.mrf.mxu0 }
 0x151   :  { %v1326_v60 = vmax.f32 %v1262_v58, 0.0  ;;  %v527_v61 = vmul.f32 %v2419_v57, %v383_v3  ;;  %v1080_v62 = vpop.f32.mrf.mxu2  ;;  %v479_v0 = vpop.f32.mrf.mxu3 }
 0x152   :  { %1422 = vst.msk [vmem:[#allocation2 + $0x1c0] sm:$0xff] %vm1365_vm2, %v1357_v59  ;;  %v1162_v2 = vmul.f32 %v2432_v9, %v1080_v62  ;;  %v987_v5 = vpop.f32.mrf.mxu1  ;;  %v559_v13 = vmul.f32 %v2419_v57, %v479_v0 }
 0x153   :  { %1391 = vst.msk [vmem:[#allocation2 + $0xc8] sm:$0xff] %vm1365_vm2, %v1326_v60  ;;  %v1131_v6 = vmul.f32 %v2432_v9, %v987_v5  ;;  %v595_v10 = vadd.f32 %v2426_v8, %v527_v61 }
 0x154   :  { %v1230_v7 = vadd.f32 %v2440_v63, %v1162_v2  ;;  %v627_v21 = vadd.f32 %v2426_v8, %v559_v13 }
 0x155   :  { %v1199_v11 = vadd.f32 %v2440_v63, %v1131_v6 }
 0x156   :  { %v1294_v12 = vadd.f32 %v1230_v7, %v626_v1 }
 0x157   :  { %v1263_v14 = vadd.f32 %v1199_v11, %v595_v10 }
 0x158   :  { %v1358_v15 = vmax.f32 %v1294_v12, 0.0  ;;  %v386_v16 = vpop.f32.mrf.mxu0 }
 0x159   :  { %v1327_v17 = vmax.f32 %v1263_v14, 0.0  ;;  %v528_v18 = vmul.f32 %v2419_v57, %v386_v16  ;;  %v1083_v19 = vpop.f32.mrf.mxu2  ;;  %v482_v20 = vpop.f32.mrf.mxu3 }
 0x15a   :  { %1423 = vst.msk [vmem:[#allocation2 + $0x1c8] sm:$0xff] %vm1365_vm2, %v1358_v15  ;;  %v1163_v23 = vmul.f32 %v2432_v9, %v1083_v19  ;;  %v990_v24 = vpop.f32.mrf.mxu1  ;;  %v560_v30 = vmul.f32 %v2419_v57, %v482_v20 }
 0x15b   :  { %1392 = vst.msk [vmem:[#allocation2 + $0xd0] sm:$0xff] %vm1365_vm2, %v1327_v17  ;;  %v1132_v25 = vmul.f32 %v2432_v9, %v990_v24  ;;  %v596_v27 = vadd.f32 %v2426_v8, %v528_v18 }
 0x15c   :  { %v1231_v26 = vadd.f32 %v2440_v63, %v1163_v23  ;;  %v628_v38 = vadd.f32 %v2426_v8, %v560_v30 }
 0x15d   :  { %v1200_v28 = vadd.f32 %v2440_v63, %v1132_v25 }
 0x15e   :  { %v1295_v29 = vadd.f32 %v1231_v26, %v627_v21 }
 0x15f   :  { %v1264_v31 = vadd.f32 %v1200_v28, %v596_v27 }
 0x160   :  { %v1359_v32 = vmax.f32 %v1295_v29, 0.0  ;;  %v389_v33 = vpop.f32.mrf.mxu0 }
 0x161   :  { %v1328_v34 = vmax.f32 %v1264_v31, 0.0  ;;  %v529_v35 = vmul.f32 %v2419_v57, %v389_v33  ;;  %v1086_v36 = vpop.f32.mrf.mxu2  ;;  %v485_v37 = vpop.f32.mrf.mxu3 }
 0x162   :  { %1424 = vst.msk [vmem:[#allocation2 + $0x1d0] sm:$0xff] %vm1365_vm2, %v1359_v32  ;;  %v1164_v39 = vmul.f32 %v2432_v9, %v1086_v36  ;;  %v993_v40 = vpop.f32.mrf.mxu1  ;;  %v561_v46 = vmul.f32 %v2419_v57, %v485_v37  ;;  %v1137_v36 = vmul.f32 %v2432_v9, %v1973_v22 }
 0x163   :  { %1393 = vst.msk [vmem:[#allocation2 + $0xd8] sm:$0xff] %vm1365_vm2, %v1328_v34  ;;  %v1133_v41 = vmul.f32 %v2432_v9, %v993_v40  ;;  %v597_v43 = vadd.f32 %v2426_v8, %v529_v35 }
 0x164   :  { %v1232_v42 = vadd.f32 %v2440_v63, %v1164_v39  ;;  %v629_v54 = vadd.f32 %v2426_v8, %v561_v46 }
 0x165   :  { %v1201_v44 = vadd.f32 %v2440_v63, %v1133_v41 }
 0x166   :  { %v1296_v45 = vadd.f32 %v1232_v42, %v628_v38 }
 0x167   :  { %v1265_v47 = vadd.f32 %v1201_v44, %v597_v43 }
 0x168   :  { %v1360_v48 = vmax.f32 %v1296_v45, 0.0  ;;  %v392_v49 = vpop.f32.mrf.mxu0  ;;  %v1205_v45 = vadd.f32 %v2440_v63, %v1137_v36 }
 0x169   :  { %v1329_v50 = vmax.f32 %v1265_v47, 0.0  ;;  %v530_v51 = vmul.f32 %v2419_v57, %v392_v49  ;;  %v1089_v52 = vpop.f32.mrf.mxu2  ;;  %v488_v53 = vpop.f32.mrf.mxu3 }
 0x16a   :  { %1425 = vst.msk [vmem:[#allocation2 + $0x1d8] sm:$0xff] %vm1365_vm2, %v1360_v48  ;;  %v1165_v55 = vmul.f32 %v2432_v9, %v1089_v52  ;;  %v996_v56 = vpop.f32.mrf.mxu1  ;;  %v562_v61 = vmul.f32 %v2419_v57, %v488_v53 }
 0x16b   :  { %1394 = vst.msk [vmem:[#allocation2 + $0xe0] sm:$0xff] %vm1365_vm2, %v1329_v50  ;;  %v1134_v4 = vmul.f32 %v2432_v9, %v996_v56  ;;  %v598_v59 = vadd.f32 %v2426_v8, %v530_v51 }
 0x16c   :  { %v1233_v58 = vadd.f32 %v2440_v63, %v1165_v55  ;;  %v630_v10 = vadd.f32 %v2426_v8, %v562_v61 }
 0x16d   :  { %v1202_v3 = vadd.f32 %v2440_v63, %v1134_v4 }
 0x16e   :  { %v1297_v60 = vadd.f32 %v1233_v58, %v629_v54 }
 0x16f   :  { %v1266_v62 = vadd.f32 %v1202_v3, %v598_v59 }
 0x170   :  { %v1361_v0 = vmax.f32 %v1297_v60, 0.0  ;;  %v395_v1 = vpop.f32.mrf.mxu0 }
 0x171   :  { %v1330_v2 = vmax.f32 %v1266_v62, 0.0  ;;  %v531_v5 = vmul.f32 %v2419_v57, %v395_v1  ;;  %v1092_v6 = vpop.f32.mrf.mxu2  ;;  %v491_v7 = vpop.f32.mrf.mxu3 }
 0x172   :  { %1426 = vst.msk [vmem:[#allocation2 + $0x1e0] sm:$0xff] %vm1365_vm2, %v1361_v0  ;;  %v1166_v11 = vmul.f32 %v2432_v9, %v1092_v6  ;;  %v999_v12 = vpop.f32.mrf.mxu1  ;;  %v563_v18 = vmul.f32 %v2419_v57, %v491_v7 }
 0x173   :  { %1395 = vst.msk [vmem:[#allocation2 + $0xe8] sm:$0xff] %vm1365_vm2, %v1330_v2  ;;  %v1135_v13 = vmul.f32 %v2432_v9, %v999_v12  ;;  %v599_v15 = vadd.f32 %v2426_v8, %v531_v5 }
 0x174   :  { %v1234_v14 = vadd.f32 %v2440_v63, %v1166_v11  ;;  %v631_v26 = vadd.f32 %v2426_v8, %v563_v18 }
 0x175   :  { %v1203_v16 = vadd.f32 %v2440_v63, %v1135_v13 }
 0x176   :  { %v1298_v17 = vadd.f32 %v1234_v14, %v630_v10 }
 0x177   :  { %v1267_v19 = vadd.f32 %v1203_v16, %v599_v15 }
 0x178   :  { %v1362_v20 = vmax.f32 %v1298_v17, 0.0  ;;  %v398_v21 = vpop.f32.mrf.mxu0 }
 0x179   :  { %v1331_v23 = vmax.f32 %v1267_v19, 0.0  ;;  %v532_v24 = vmul.f32 %v2419_v57, %v398_v21  ;;  %v1095_v25 = vpop.f32.mrf.mxu2  ;;  %v494_v30 = vpop.f32.mrf.mxu3 }
 0x17a   :  { %1427 = vst.msk [vmem:[#allocation2 + $0x1e8] sm:$0xff] %vm1365_vm2, %v1362_v20  ;;  %v1167_v27 = vmul.f32 %v2432_v9, %v1095_v25  ;;  %v1002_v28 = vpop.f32.mrf.mxu1  ;;  %v564_v35 = vmul.f32 %v2419_v57, %v494_v30 }
 0x17b   :  { %1396 = vst.msk [vmem:[#allocation2 + $0xf0] sm:$0xff] %vm1365_vm2, %v1331_v23  ;;  %v1136_v29 = vmul.f32 %v2432_v9, %v1002_v28  ;;  %v600_v32 = vadd.f32 %v2426_v8, %v532_v24 }
 0x17c   :  { %v1235_v31 = vadd.f32 %v2440_v63, %v1167_v27  ;;  %v632_v43 = vadd.f32 %v2426_v8, %v564_v35 }
 0x17d   :  { %v1204_v33 = vadd.f32 %v2440_v63, %v1136_v29 }
 0x17e   :  { %v1299_v34 = vadd.f32 %v1235_v31, %v631_v26 }
 0x17f   :  { %v1268_v37 = vadd.f32 %v1204_v33, %v600_v32 }
 0x180   :  { %v1363_v38 = vmax.f32 %v1299_v34, 0.0  ;;  %v401_v39 = vpop.f32.mrf.mxu0 }
 0x181   :  { %v1332_v40 = vmax.f32 %v1268_v37, 0.0  ;;  %v533_v41 = vmul.f32 %v2419_v57, %v401_v39  ;;  %v1098_v42 = vpop.f32.mrf.mxu2 }
 0x182   :  { %1428 = vst.msk [vmem:[#allocation2 + $0x1f0] sm:$0xff] %vm1365_vm2, %v1363_v38  ;;  %v1168_v44 = vmul.f32 %v2432_v9, %v1098_v42 }
 0x183   :  { %1397 = vst.msk [vmem:[#allocation2 + $0xf8] sm:$0xff] %vm1365_vm2, %v1332_v40  ;;  %v601_v46 = vadd.f32 %v2426_v8, %v533_v41 }
 0x184   :  { %v1236_v22 = vadd.f32 %v2440_v63, %v1168_v44 }
 0x185   :  { %v1269_v57 = vadd.f32 %v1205_v45, %v601_v46 }
 0x186   :  { %v1300_v47 = vadd.f32 %v1236_v22, %v632_v43 }
 0x187   :  { %v1333_v48 = vmax.f32 %v1269_v57, 0.0 }
 0x188   :  { %v1364_v9 = vmax.f32 %v1300_v47, 0.0 }
 0x189   :  { %1398 = vst.msk [vmem:[#allocation2 + $0x100] sm:$0xff] %vm1365_vm2, %v1333_v48 }
 0x18a   :  { %1429 = vst.msk [vmem:[#allocation2 + $0x1f8] sm:$0xff] %vm1365_vm2, %v1364_v9 }
 0x18b   :  { %1442 = dma.vmem_to_hbm [thread:$0]  %s1435_s6, 8192, %s1437_s16, [#allocation3], %s1617_s17, %s1617_s17, %s1618_s3  }
 0x18c   :  { %1614 = dma.done.wait [#allocation3], 8192  }
 0x18d   :  { %1615 = vsyncadd [#allocation3], 4294959104 }
 0x18e   :  { %1447 = vsyncpa [#allocation3], 1 }

</bundles_post_ra>
